<compile_context>
chip_gen: v6e
topology: v6e:2x2x1
jax: 0.10.0
libtpu: 0.0.40
codegen_flags: <defaults>
</compile_context>

<pallas_src>
import functools

import jax
import jax.numpy as jnp
from jax import lax
from jax.experimental import pallas as pl
from jax.experimental.pallas import tpu as pltpu

_VMEM_LIMIT = 32 * 1024 * 1024


def _round_up(x, m):
    return (x + m - 1) // m * m


def _row_block(n, target):
    return n if n <= target else target


# ----------------------------------------------------------------------------
# Reducer kernel:  Dropout(id) -> LeakyReLU(0.2) -> [BN folded] Linear
# Emits the two column-halves of the Linear output separately so downstream
# GRU inputs stay lane-dense per half.
# ----------------------------------------------------------------------------
def _reducer_kernel(x_ref, wa_ref, wb_ref, ba_ref, bb_ref, oa_ref, ob_ref):
    x = x_ref[...].astype(jnp.float32)                  # (bn, F)
    x = jnp.where(x >= 0.0, x, 0.2 * x)                 # Dropout=id, LeakyReLU
    xb16 = x.astype(jnp.bfloat16)                       # bf16 MXU operand
    oa_ref[...] = (jnp.dot(xb16, wa_ref[...], preferred_element_type=jnp.float32)
                   + ba_ref[...]).astype(oa_ref.dtype)
    ob_ref[...] = (jnp.dot(xb16, wb_ref[...], preferred_element_type=jnp.float32)
                   + bb_ref[...]).astype(ob_ref.dtype)


def reducer_pallas(x2d, wa, wb, ba, bb, *, block_rows=512):
    n, f = x2d.shape
    h = wa.shape[1]
    bn = _row_block(n, block_rows)
    out = jax.ShapeDtypeStruct((n, h), jnp.bfloat16)
    return pl.pallas_call(
        _reducer_kernel,
        out_shape=(out, out),
        grid=(pl.cdiv(n, bn),),
        in_specs=[pl.BlockSpec((bn, f), lambda i: (i, 0)),
                  pl.BlockSpec((f, h), lambda i: (0, 0)),
                  pl.BlockSpec((f, h), lambda i: (0, 0)),
                  pl.BlockSpec((1, h), lambda i: (0, 0)),
                  pl.BlockSpec((1, h), lambda i: (0, 0))],
        out_specs=(pl.BlockSpec((bn, h), lambda i: (i, 0)),
                   pl.BlockSpec((bn, h), lambda i: (i, 0))),
        compiler_params=pltpu.CompilerParams(
            dimension_semantics=("parallel",),
            vmem_limit_bytes=_VMEM_LIMIT),
    )(x2d, wa, wb, ba, bb)


# ----------------------------------------------------------------------------
# Hoisted GRU input projections (both directions), row-tiled "parallel" grid.
# Input is given as two lane-dense halves xa, xb with Wi split by rows.
# ----------------------------------------------------------------------------
def _gate_proj_kernel(xa_ref, xb_ref, wfa_ref, wfb_ref, wba_ref, wbb_ref,
                      bf_ref, bb_ref, gxf_ref, gxb_ref):
    xa = xa_ref[...].astype(jnp.bfloat16)
    xb = xb_ref[...].astype(jnp.bfloat16)
    gf = (jnp.dot(xa, wfa_ref[...], preferred_element_type=jnp.float32)
          + jnp.dot(xb, wfb_ref[...], preferred_element_type=jnp.float32)
          + bf_ref[...])
    gb = (jnp.dot(xa, wba_ref[...], preferred_element_type=jnp.float32)
          + jnp.dot(xb, wbb_ref[...], preferred_element_type=jnp.float32)
          + bb_ref[...])
    gxf_ref[...] = gf.astype(gxf_ref.dtype)
    gxb_ref[...] = gb.astype(gxb_ref.dtype)


def gate_projection_pallas(xa, xb, fused, *, block_rows=512):
    n, h = xa.shape
    h3 = fused["wfa"].shape[1]
    bn = _row_block(n, block_rows)
    out = jax.ShapeDtypeStruct((n, h3), jnp.bfloat16)
    x_spec = pl.BlockSpec((bn, h), lambda i: (i, 0))
    w_spec = pl.BlockSpec((h, h3), lambda i: (0, 0))
    b_spec = pl.BlockSpec((1, h3), lambda i: (0, 0))
    return pl.pallas_call(
        _gate_proj_kernel,
        out_shape=(out, out),
        grid=(pl.cdiv(n, bn),),
        in_specs=[x_spec, x_spec, w_spec, w_spec, w_spec, w_spec,
                  b_spec, b_spec],
        out_specs=(pl.BlockSpec((bn, h3), lambda i: (i, 0)),
                   pl.BlockSpec((bn, h3), lambda i: (i, 0))),
        compiler_params=pltpu.CompilerParams(
            dimension_semantics=("parallel",),
            vmem_limit_bytes=_VMEM_LIMIT),
    )(xa, xb, fused["wfa"], fused["wfb"], fused["wba"], fused["wbb"],
      fused["bif"], fused["bib"])


# ----------------------------------------------------------------------------
# Fused bidirectional GRU recurrence (PyTorch cell equations).
# gx layouts are (S, Bp, 3H) time-major; per-timestep slabs are sublane-aligned
# (Bp padded to a multiple of 8).  One block-diagonal recurrent matmul per step
# serves both directions; outputs are lane-dense per direction.
# ----------------------------------------------------------------------------
def _bigru_rec_kernel(gxf_ref, gxb_ref, whd_ref, bhnf_ref, bhnb_ref,
                      hf_ref, hb_ref, *, seq_len, hidden, unroll):
    h3 = 3 * hidden
    bt = hf_ref.shape[1]
    whd = whd_ref[...]                       # (2H, 6H) bf16 block-diag weight
    bhnf = bhnf_ref[...]                     # (1, H) f32
    bhnb = bhnb_ref[...]

    def cell(pre, gh, bhn, h_prev):
        # pre = x@Wi + bi ; gh = h@Wh ; gate layout [r | z | n]; f32 math.
        r = jax.nn.sigmoid(pre[:, :hidden] + gh[:, :hidden])
        z = jax.nn.sigmoid(pre[:, hidden:2 * hidden] + gh[:, hidden:2 * hidden])
        n = jnp.tanh(pre[:, 2 * hidden:] + r * (gh[:, 2 * hidden:] + bhn))
        return (1.0 - z) * n + z * h_prev

    def step(t, carry):
        h_f, h_b = carry
        tb = seq_len - 1 - t
        # Single fused MXU push per timestep for both directions.
        h_cat = jnp.concatenate([h_f, h_b], axis=1).astype(jnp.bfloat16)
        gh = jnp.dot(h_cat, whd, preferred_element_type=jnp.float32)   # (bt,6H)
        pre_f = gxf_ref[t].astype(jnp.float32)       # (bt, 3H) aligned slab
        pre_b = gxb_ref[tb].astype(jnp.float32)
        h_f = cell(pre_f, gh[:, :h3], bhnf, h_f)
        h_b = cell(pre_b, gh[:, h3:], bhnb, h_b)
        hf_ref[t] = h_f.astype(hf_ref.dtype)         # lane-dense full-width
        hb_ref[tb] = h_b.astype(hb_ref.dtype)
        return (h_f, h_b)

    h0 = jnp.zeros((bt, hidden), jnp.float32)
    lax.fori_loop(0, seq_len, step, (h0, h0), unroll=unroll)


def bigru_recurrence_pallas(gxf, gxb, whd, bhnf, bhnb, *, hidden, block_b,
                            out_dtype, unroll):
    s, b_pad, h3 = gxf.shape
    bt = min(block_b, b_pad)
    kern = functools.partial(_bigru_rec_kernel, seq_len=s, hidden=hidden,
                             unroll=unroll)
    out = jax.ShapeDtypeStruct((s, b_pad, hidden), out_dtype)
    out_bytes = 2 * s * b_pad * hidden * jnp.dtype(out_dtype).itemsize
    cost = pl.CostEstimate(
        flops=2 * s * b_pad * (2 * hidden) * (6 * hidden)
              + 24 * s * b_pad * hidden,
        transcendentals=6 * s * b_pad * hidden,
        bytes_accessed=int(2 * gxf.size + 2 * gxb.size + 2 * whd.size
                           + out_bytes))
    gx_spec = pl.BlockSpec((s, bt, h3), lambda i: (0, i, 0))
    h_spec = pl.BlockSpec((s, bt, hidden), lambda i: (0, i, 0))
    return pl.pallas_call(
        kern,
        out_shape=(out, out),
        grid=(pl.cdiv(b_pad, bt),),
        in_specs=[gx_spec, gx_spec,
                  pl.BlockSpec((2 * hidden, 6 * hidden), lambda i: (0, 0)),
                  pl.BlockSpec((1, hidden), lambda i: (0, 0)),
                  pl.BlockSpec((1, hidden), lambda i: (0, 0))],
        out_specs=(h_spec, h_spec),
        compiler_params=pltpu.CompilerParams(
            dimension_semantics=("parallel",),
            vmem_limit_bytes=_VMEM_LIMIT),
        cost_estimate=cost,
    )(gxf, gxb, whd, bhnf, bhnb)


# ----------------------------------------------------------------------------
# Parameter fusion helpers (wrapper-side, outside the kernels)
# ----------------------------------------------------------------------------
def _fuse_direction(lp):
    wi = jnp.concatenate([lp["w_ir"], lp["w_iz"], lp["w_in"]], axis=1)  # (2H,3H)
    wh = jnp.concatenate([lp["w_hr"], lp["w_hz"], lp["w_hn"]], axis=1)  # (H, 3H)
    bi = jnp.concatenate([lp["b_r"], lp["b_z"], lp["b_in"]], axis=1)    # (1, 3H)
    return wi, wh, bi, lp["b_hn"]


def _fuse_layer(lp, hidden):
    wi_f, wh_f, bi_f, bhn_f = _fuse_direction(lp["fwd"])
    wi_b, wh_b, bi_b, bhn_b = _fuse_direction(lp["bwd"])
    # Block-diagonal recurrent weight: [h_f | h_b] @ whd = [h_f@Wh_f | h_b@Wh_b]
    whd = jnp.zeros((2 * hidden, 6 * hidden), jnp.float32)
    whd = whd.at[:hidden, :3 * hidden].set(wh_f)
    whd = whd.at[hidden:, 3 * hidden:].set(wh_b)
    bf16 = jnp.bfloat16
    return {
        # Input-projection weights split by input half (rows): x = [xa | xb].
        "wfa": wi_f[:hidden].astype(bf16), "wfb": wi_f[hidden:].astype(bf16),
        "wba": wi_b[:hidden].astype(bf16), "wbb": wi_b[hidden:].astype(bf16),
        "bif": bi_f, "bib": bi_b,
        "whd": whd.astype(bf16), "bhnf": bhn_f, "bhnb": bhn_b,
    }


# ----------------------------------------------------------------------------
# Full EncoderBlock forward
# ----------------------------------------------------------------------------
def encoder_block_forward(x, params, *, eps=1e-5, block_rows=512,
                          block_batch=256):
    b, s, f = x.shape
    out_size = params["linear_w"].shape[1]
    hidden = out_size // 2
    b_pad = _round_up(b, 8)              # sublane-aligned rows per timestep
    unroll = True if s <= 8 else 8       # partial unroll at production S

    # Fold BatchNorm1d (eval-mode running stats) into the Linear layer and
    # split its columns into the fwd/bwd input halves (lane-dense per half).
    scale = params["bn_gamma"] * lax.rsqrt(params["bn_var"] + eps)       # (1,F)
    w_fold = params["linear_w"] * jnp.reshape(scale, (f, 1))             # (F,O)
    b_fold = (params["linear_b"]
              + (params["bn_beta"] - params["bn_mean"] * scale)
              @ params["linear_w"])                                      # (1,O)
    wa = w_fold[:, :hidden].astype(jnp.bfloat16)
    wb = w_fold[:, hidden:].astype(jnp.bfloat16)
    ba, bb = b_fold[:, :hidden], b_fold[:, hidden:]

    red_a, red_b = reducer_pallas(x.reshape(b * s, f), wa, wb, ba, bb,
                                  block_rows=block_rows)                 # (B*S,H)

    # Relayout to padded time-major rows (row = t*B_pad + b).  The pad-to-8 and
    # transpose fuse into one XLA pass over the (small, bf16) reducer output.
    # TODO(synk): fold this relayout into the reducer kernel (time-major output
    # blocks via pltpu.einshape) to drop this remaining XLA pass.
    def to_time_major(r2d):
        r = jnp.transpose(r2d.reshape(b, s, hidden), (1, 0, 2))          # (S,B,H)
        if b_pad != b:
            r = jnp.pad(r, ((0, 0), (0, b_pad - b), (0, 0)))
        return r.reshape(s * b_pad, hidden)

    xa, xb = to_time_major(red_a), to_time_major(red_b)

    n_layers = len(params["gru"])
    bt = min(_round_up(min(block_batch, b_pad), 8), b_pad)
    hf = hb = None
    for li, lp in enumerate(params["gru"]):
        fused = _fuse_layer(lp, hidden)
        gxf, gxb = gate_projection_pallas(xa, xb, fused, block_rows=block_rows)
        last = li == n_layers - 1
        out_dtype = jnp.float32 if last else jnp.bfloat16
        # TODO(synk): at production S*B*H, chunk the recurrence over S with the
        # hidden state carried in VMEM scratch across an "arbitrary" time axis.
        hf, hb = bigru_recurrence_pallas(
            gxf.reshape(s, b_pad, 3 * hidden),
            gxb.reshape(s, b_pad, 3 * hidden),
            fused["whd"], fused["bhnf"], fused["bhnb"],
            hidden=hidden, block_b=bt, out_dtype=out_dtype, unroll=unroll)
        if not last:
            # inter-layer GRU dropout: identity in eval mode
            xa = hf.reshape(s * b_pad, hidden)
            xb = hb.reshape(s * b_pad, hidden)

    # Back to PyTorch batch_first (B, S, 2H): concat + transpose + un-pad fuse
    # into a single XLA relayout pass (same HBM traffic a dedicated finalize
    # kernel would need).
    out = jnp.concatenate([hf, hb], axis=-1)                             # (S,Bp,2H)
    return jnp.transpose(out, (1, 0, 2))[:b]


# ----------------------------------------------------------------------------
# Pure-JAX reference (unfused f32 math) for a numerical sanity check
# ----------------------------------------------------------------------------
def _reference_forward(x, params):
    b, s, f = x.shape
    out_size = params["linear_w"].shape[1]
    hidden = out_size // 2

    xr = x.reshape(b * s, f)
    xr = jnp.where(xr >= 0.0, xr, 0.2 * xr)
    xr = ((xr - params["bn_mean"]) * lax.rsqrt(params["bn_var"] + 1e-5)
          * params["bn_gamma"] + params["bn_beta"])
    red = xr @ params["linear_w"] + params["linear_b"]
    seq = red.reshape(b, s, out_size)

    def run_dir(x_bsf, lp, reverse):
        xs = x_bsf[:, ::-1, :] if reverse else x_bsf
        h = jnp.zeros((b, hidden), jnp.float32)

        def cell(h, xt):
            r = jax.nn.sigmoid(xt @ lp["w_ir"] + h @ lp["w_hr"] + lp["b_r"])
            z = jax.nn.sigmoid(xt @ lp["w_iz"] + h @ lp["w_hz"] + lp["b_z"])
            n = jnp.tanh(xt @ lp["w_in"] + lp["b_in"]
                         + r * (h @ lp["w_hn"] + lp["b_hn"]))
            h_new = (1.0 - z) * n + z * h
            return h_new, h_new

        _, ys = lax.scan(cell, h, jnp.transpose(xs, (1, 0, 2)))
        ys = jnp.transpose(ys, (1, 0, 2))
        return ys[:, ::-1, :] if reverse else ys

    layer_in = seq
    for lp in params["gru"]:
        fwd = run_dir(layer_in, lp["fwd"], False)
        bwd = run_dir(layer_in, lp["bwd"], True)
        layer_in = jnp.concatenate([fwd, bwd], axis=-1)
    return layer_in


# ----------------------------------------------------------------------------
# Deterministic parameter construction
# ----------------------------------------------------------------------------
def make_params(key, input_size, output_size):
    hidden = output_size // 2
    keys = iter(jax.random.split(key, 64))

    def rnd(shape, scale=0.2):
        return scale * jax.random.normal(next(keys), shape, jnp.float32)

    params = {
        "bn_gamma": rnd((1, input_size)) + 1.0,
        "bn_beta": rnd((1, input_size)),
        "bn_mean": rnd((1, input_size)),
        "bn_var": jnp.abs(rnd((1, input_size))) + 1.0,
        "linear_w": rnd((input_size, output_size)),   # stored as (F, O) = W^T
        "linear_b": rnd((1, output_size)),
        "gru": [],
    }

    def make_dir(in_size):
        return {
            "w_ir": rnd((in_size, hidden)),
            "w_iz": rnd((in_size, hidden)),
            "w_in": rnd((in_size, hidden)),
            "w_hr": rnd((hidden, hidden)),
            "w_hz": rnd((hidden, hidden)),
            "w_hn": rnd((hidden, hidden)),
            "b_r": rnd((1, hidden)),     # = b_ir + b_hr folded
            "b_z": rnd((1, hidden)),     # = b_iz + b_hz folded
            "b_in": rnd((1, hidden)),
            "b_hn": rnd((1, hidden)),
        }

    # layer 0 input = output_size, layer 1 input = 2*hidden = output_size
    for _ in range(2):
        params["gru"].append({"fwd": make_dir(output_size),
                              "bwd": make_dir(output_size)})
    return params


if __name__ == "__main__":
    batch, seq_len, input_size, output_size = 2, 8, 32, 16

    key = jax.random.PRNGKey(0)
    kx, kp = jax.random.split(key)
    x = jax.random.normal(kx, (batch, seq_len, input_size), jnp.float32)
    params = make_params(kp, input_size, output_size)

    fwd = jax.jit(encoder_block_forward)
    out = jax.block_until_ready(fwd(x, params))
    assert out.shape == (batch, seq_len, output_size), out.shape

    ref = jax.block_until_ready(_reference_forward(x, params))
    max_err = float(jnp.max(jnp.abs(out - ref)))
    # bf16 MXU operands -> slightly looser tolerance than the pure-f32 version.
    assert jnp.allclose(out, ref, rtol=5e-2, atol=5e-2), max_err

    print("KERNEL_OK")
</pallas_src>

<mosaic_0001>
module attributes {stable_mosaic.version = 11 : i64} {
  func.func @_reducer_kernel(%arg0: i32, %arg1: memref<16x32xf32, #tpu.memory_space<vmem>>, %arg2: memref<32x8xbf16, #tpu.memory_space<vmem>>, %arg3: memref<32x8xbf16, #tpu.memory_space<vmem>>, %arg4: memref<1x8xf32, #tpu.memory_space<vmem>>, %arg5: memref<1x8xf32, #tpu.memory_space<vmem>>, %arg6: memref<16x8xbf16, #tpu.memory_space<vmem>>, %arg7: memref<16x8xbf16, #tpu.memory_space<vmem>>) attributes {dimension_semantics = [#tpu.dimension_semantics<parallel>], iteration_bounds = array<i64: 1>, scalar_prefetch = 0 : i64, scratch_operands = 0 : i64, tpu.core_type = #tpu.core_type<tc>, window_params = [{transform_indices = @transform_0, window_bounds = array<i64: 16, 32>}, {pipeline_mode = #tpu.pipeline_mode<synchronous>, transform_indices = @transform_1, window_bounds = array<i64: 32, 8>}, {pipeline_mode = #tpu.pipeline_mode<synchronous>, transform_indices = @transform_2, window_bounds = array<i64: 32, 8>}, {pipeline_mode = #tpu.pipeline_mode<synchronous>, transform_indices = @transform_3, window_bounds = array<i64: 1, 8>}, {pipeline_mode = #tpu.pipeline_mode<synchronous>, transform_indices = @transform_4, window_bounds = array<i64: 1, 8>}, {transform_indices = @transform_5, window_bounds = array<i64: 16, 8>}, {transform_indices = @transform_6, window_bounds = array<i64: 16, 8>}]} {
    %c0 = arith.constant 0 : index
    %c0_0 = arith.constant 0 : index
    %0 = vector.load %arg1[%c0, %c0_0] : memref<16x32xf32, #tpu.memory_space<vmem>>, vector<16x32xf32>
    %cst = arith.constant 0.000000e+00 : f32
    %1 = vector.broadcast %cst : f32 to vector<16x32xf32>
    %2 = arith.cmpf oge, %0, %1 : vector<16x32xf32>
    %cst_1 = arith.constant 2.000000e-01 : f32
    %3 = vector.broadcast %cst_1 : f32 to vector<16x32xf32>
    %4 = arith.mulf %3, %0 : vector<16x32xf32>
    %5 = arith.select %2, %0, %4 : vector<16x32xi1>, vector<16x32xf32>
    %6 = arith.truncf %5 : vector<16x32xf32> to vector<16x32xbf16>
    %c0_2 = arith.constant 0 : index
    %c0_3 = arith.constant 0 : index
    %7 = vector.load %arg2[%c0_2, %c0_3] : memref<32x8xbf16, #tpu.memory_space<vmem>>, vector<32x8xbf16>
    %cst_4 = arith.constant dense<0.000000e+00> : vector<16x8xf32>
    %8 = tpu.matmul %6, %7, %cst_4 {dimension_numbers = #tpu.dot_dimension_numbers<[1], [0], [0], [1], [0, 0, 1, 1], [], []>} : vector<16x32xbf16>, vector<32x8xbf16>, vector<16x8xf32> -> vector<16x8xf32>
    %c0_5 = arith.constant 0 : index
    %c0_6 = arith.constant 0 : index
    %9 = vector.load %arg4[%c0_5, %c0_6] : memref<1x8xf32, #tpu.memory_space<vmem>>, vector<1x8xf32>
    %10 = vector.broadcast %9 : vector<1x8xf32> to vector<16x8xf32>
    %11 = arith.addf %8, %10 : vector<16x8xf32>
    %12 = arith.truncf %11 : vector<16x8xf32> to vector<16x8xbf16>
    %c0_7 = arith.constant 0 : index
    %c0_8 = arith.constant 0 : index
    %13 = vector.load %arg6[%c0_7, %c0_8] : memref<16x8xbf16, #tpu.memory_space<vmem>>, vector<16x8xbf16>
    tpu.vector_store %arg6[%c0_7, %c0_8], %12 {strides = array<i32>} : memref<16x8xbf16, #tpu.memory_space<vmem>>, vector<16x8xbf16>,
    %c0_9 = arith.constant 0 : index
    %c0_10 = arith.constant 0 : index
    %14 = vector.load %arg3[%c0_9, %c0_10] : memref<32x8xbf16, #tpu.memory_space<vmem>>, vector<32x8xbf16>
    %cst_11 = arith.constant dense<0.000000e+00> : vector<16x8xf32>
    %15 = tpu.matmul %6, %14, %cst_11 {dimension_numbers = #tpu.dot_dimension_numbers<[1], [0], [0], [1], [0, 0, 1, 1], [], []>} : vector<16x32xbf16>, vector<32x8xbf16>, vector<16x8xf32> -> vector<16x8xf32>
    %c0_12 = arith.constant 0 : index
    %c0_13 = arith.constant 0 : index
    %16 = vector.load %arg5[%c0_12, %c0_13] : memref<1x8xf32, #tpu.memory_space<vmem>>, vector<1x8xf32>
    %17 = vector.broadcast %16 : vector<1x8xf32> to vector<16x8xf32>
    %18 = arith.addf %15, %17 : vector<16x8xf32>
    %19 = arith.truncf %18 : vector<16x8xf32> to vector<16x8xbf16>
    %c0_14 = arith.constant 0 : index
    %c0_15 = arith.constant 0 : index
    %20 = vector.load %arg7[%c0_14, %c0_15] : memref<16x8xbf16, #tpu.memory_space<vmem>>, vector<16x8xbf16>
    tpu.vector_store %arg7[%c0_14, %c0_15], %19 {strides = array<i32>} : memref<16x8xbf16, #tpu.memory_space<vmem>>, vector<16x8xbf16>,
    return
  }
  func.func @transform_0(%arg0: i32) -> (i32, i32) {
    %c0_i32 = arith.constant 0 : i32
    %c0_i32_0 = arith.constant 0 : i32
    return %arg0, %c0_i32 : i32, i32
  }
  func.func @transform_1(%arg0: i32) -> (i32, i32) {
    %c0_i32 = arith.constant 0 : i32
    %c0_i32_0 = arith.constant 0 : i32
    %c0_i32_1 = arith.constant 0 : i32
    return %c0_i32, %c0_i32_0 : i32, i32
  }
  func.func @transform_2(%arg0: i32) -> (i32, i32) {
    %c0_i32 = arith.constant 0 : i32
    %c0_i32_0 = arith.constant 0 : i32
    %c0_i32_1 = arith.constant 0 : i32
    return %c0_i32, %c0_i32_0 : i32, i32
  }
  func.func @transform_3(%arg0: i32) -> (i32, i32) {
    %c0_i32 = arith.constant 0 : i32
    %c0_i32_0 = arith.constant 0 : i32
    %c0_i32_1 = arith.constant 0 : i32
    return %c0_i32, %c0_i32_0 : i32, i32
  }
  func.func @transform_4(%arg0: i32) -> (i32, i32) {
    %c0_i32 = arith.constant 0 : i32
    %c0_i32_0 = arith.constant 0 : i32
    %c0_i32_1 = arith.constant 0 : i32
    return %c0_i32, %c0_i32_0 : i32, i32
  }
  func.func @transform_5(%arg0: i32) -> (i32, i32) {
    %c0_i32 = arith.constant 0 : i32
    %c0_i32_0 = arith.constant 0 : i32
    return %arg0, %c0_i32 : i32, i32
  }
  func.func @transform_6(%arg0: i32) -> (i32, i32) {
    %c0_i32 = arith.constant 0 : i32
    %c0_i32_0 = arith.constant 0 : i32
    return %arg0, %c0_i32 : i32, i32
  }
}

module attributes {stable_mosaic.version = 11 : i64} {
  func.func @_gate_proj_kernel(%arg0: i32, %arg1: memref<64x8xbf16, #tpu.memory_space<vmem>>, %arg2: memref<64x8xbf16, #tpu.memory_space<vmem>>, %arg3: memref<8x24xbf16, #tpu.memory_space<vmem>>, %arg4: memref<8x24xbf16, #tpu.memory_space<vmem>>, %arg5: memref<8x24xbf16, #tpu.memory_space<vmem>>, %arg6: memref<8x24xbf16, #tpu.memory_space<vmem>>, %arg7: memref<1x24xf32, #tpu.memory_space<vmem>>, %arg8: memref<1x24xf32, #tpu.memory_space<vmem>>, %arg9: memref<64x24xbf16, #tpu.memory_space<vmem>>, %arg10: memref<64x24xbf16, #tpu.memory_space<vmem>>) attributes {dimension_semantics = [#tpu.dimension_semantics<parallel>], iteration_bounds = array<i64: 1>, scalar_prefetch = 0 : i64, scratch_operands = 0 : i64, tpu.core_type = #tpu.core_type<tc>, window_params = [{transform_indices = @transform_0, window_bounds = array<i64: 64, 8>}, {transform_indices = @transform_1, window_bounds = array<i64: 64, 8>}, {pipeline_mode = #tpu.pipeline_mode<synchronous>, transform_indices = @transform_2, window_bounds = array<i64: 8, 24>}, {pipeline_mode = #tpu.pipeline_mode<synchronous>, transform_indices = @transform_3, window_bounds = array<i64: 8, 24>}, {pipeline_mode = #tpu.pipeline_mode<synchronous>, transform_indices = @transform_4, window_bounds = array<i64: 8, 24>}, {pipeline_mode = #tpu.pipeline_mode<synchronous>, transform_indices = @transform_5, window_bounds = array<i64: 8, 24>}, {pipeline_mode = #tpu.pipeline_mode<synchronous>, transform_indices = @transform_6, window_bounds = array<i64: 1, 24>}, {pipeline_mode = #tpu.pipeline_mode<synchronous>, transform_indices = @transform_7, window_bounds = array<i64: 1, 24>}, {transform_indices = @transform_8, window_bounds = array<i64: 64, 24>}, {transform_indices = @transform_9, window_bounds = array<i64: 64, 24>}]} {
    %c0 = arith.constant 0 : index
    %c0_0 = arith.constant 0 : index
    %0 = vector.load %arg1[%c0, %c0_0] : memref<64x8xbf16, #tpu.memory_space<vmem>>, vector<64x8xbf16>
    %c0_1 = arith.constant 0 : index
    %c0_2 = arith.constant 0 : index
    %1 = vector.load %arg2[%c0_1, %c0_2] : memref<64x8xbf16, #tpu.memory_space<vmem>>, vector<64x8xbf16>
    %c0_3 = arith.constant 0 : index
    %c0_4 = arith.constant 0 : index
    %2 = vector.load %arg3[%c0_3, %c0_4] : memref<8x24xbf16, #tpu.memory_space<vmem>>, vector<8x24xbf16>
    %cst = arith.constant dense<0.000000e+00> : vector<64x24xf32>
    %3 = tpu.matmul %0, %2, %cst {dimension_numbers = #tpu.dot_dimension_numbers<[1], [0], [0], [1], [0, 0, 1, 1], [], []>} : vector<64x8xbf16>, vector<8x24xbf16>, vector<64x24xf32> -> vector<64x24xf32>
    %c0_5 = arith.constant 0 : index
    %c0_6 = arith.constant 0 : index
    %4 = vector.load %arg4[%c0_5, %c0_6] : memref<8x24xbf16, #tpu.memory_space<vmem>>, vector<8x24xbf16>
    %cst_7 = arith.constant dense<0.000000e+00> : vector<64x24xf32>
    %5 = tpu.matmul %1, %4, %cst_7 {dimension_numbers = #tpu.dot_dimension_numbers<[1], [0], [0], [1], [0, 0, 1, 1], [], []>} : vector<64x8xbf16>, vector<8x24xbf16>, vector<64x24xf32> -> vector<64x24xf32>
    %6 = arith.addf %3, %5 : vector<64x24xf32>
    %c0_8 = arith.constant 0 : index
    %c0_9 = arith.constant 0 : index
    %7 = vector.load %arg7[%c0_8, %c0_9] : memref<1x24xf32, #tpu.memory_space<vmem>>, vector<1x24xf32>
    %8 = vector.broadcast %7 : vector<1x24xf32> to vector<64x24xf32>
    %9 = arith.addf %6, %8 : vector<64x24xf32>
    %c0_10 = arith.constant 0 : index
    %c0_11 = arith.constant 0 : index
    %10 = vector.load %arg5[%c0_10, %c0_11] : memref<8x24xbf16, #tpu.memory_space<vmem>>, vector<8x24xbf16>
    %cst_12 = arith.constant dense<0.000000e+00> : vector<64x24xf32>
    %11 = tpu.matmul %0, %10, %cst_12 {dimension_numbers = #tpu.dot_dimension_numbers<[1], [0], [0], [1], [0, 0, 1, 1], [], []>} : vector<64x8xbf16>, vector<8x24xbf16>, vector<64x24xf32> -> vector<64x24xf32>
    %c0_13 = arith.constant 0 : index
    %c0_14 = arith.constant 0 : index
    %12 = vector.load %arg6[%c0_13, %c0_14] : memref<8x24xbf16, #tpu.memory_space<vmem>>, vector<8x24xbf16>
    %cst_15 = arith.constant dense<0.000000e+00> : vector<64x24xf32>
    %13 = tpu.matmul %1, %12, %cst_15 {dimension_numbers = #tpu.dot_dimension_numbers<[1], [0], [0], [1], [0, 0, 1, 1], [], []>} : vector<64x8xbf16>, vector<8x24xbf16>, vector<64x24xf32> -> vector<64x24xf32>
    %14 = arith.addf %11, %13 : vector<64x24xf32>
    %c0_16 = arith.constant 0 : index
    %c0_17 = arith.constant 0 : index
    %15 = vector.load %arg8[%c0_16, %c0_17] : memref<1x24xf32, #tpu.memory_space<vmem>>, vector<1x24xf32>
    %16 = vector.broadcast %15 : vector<1x24xf32> to vector<64x24xf32>
    %17 = arith.addf %14, %16 : vector<64x24xf32>
    %18 = arith.truncf %9 : vector<64x24xf32> to vector<64x24xbf16>
    %c0_18 = arith.constant 0 : index
    %c0_19 = arith.constant 0 : index
    %19 = vector.load %arg9[%c0_18, %c0_19] : memref<64x24xbf16, #tpu.memory_space<vmem>>, vector<64x24xbf16>
    tpu.vector_store %arg9[%c0_18, %c0_19], %18 {strides = array<i32>} : memref<64x24xbf16, #tpu.memory_space<vmem>>, vector<64x24xbf16>,
    %20 = arith.truncf %17 : vector<64x24xf32> to vector<64x24xbf16>
    %c0_20 = arith.constant 0 : index
    %c0_21 = arith.constant 0 : index
    %21 = vector.load %arg10[%c0_20, %c0_21] : memref<64x24xbf16, #tpu.memory_space<vmem>>, vector<64x24xbf16>
    tpu.vector_store %arg10[%c0_20, %c0_21], %20 {strides = array<i32>} : memref<64x24xbf16, #tpu.memory_space<vmem>>, vector<64x24xbf16>,
    return
  }
  func.func @transform_0(%arg0: i32) -> (i32, i32) {
    %c0_i32 = arith.constant 0 : i32
    %c0_i32_0 = arith.constant 0 : i32
    return %arg0, %c0_i32 : i32, i32
  }
  func.func @transform_1(%arg0: i32) -> (i32, i32) {
    %c0_i32 = arith.constant 0 : i32
    %c0_i32_0 = arith.constant 0 : i32
    return %arg0, %c0_i32 : i32, i32
  }
  func.func @transform_2(%arg0: i32) -> (i32, i32) {
    %c0_i32 = arith.constant 0 : i32
    %c0_i32_0 = arith.constant 0 : i32
    %c0_i32_1 = arith.constant 0 : i32
    return %c0_i32, %c0_i32_0 : i32, i32
  }
  func.func @transform_3(%arg0: i32) -> (i32, i32) {
    %c0_i32 = arith.constant 0 : i32
    %c0_i32_0 = arith.constant 0 : i32
    %c0_i32_1 = arith.constant 0 : i32
    return %c0_i32, %c0_i32_0 : i32, i32
  }
  func.func @transform_4(%arg0: i32) -> (i32, i32) {
    %c0_i32 = arith.constant 0 : i32
    %c0_i32_0 = arith.constant 0 : i32
    %c0_i32_1 = arith.constant 0 : i32
    return %c0_i32, %c0_i32_0 : i32, i32
  }
  func.func @transform_5(%arg0: i32) -> (i32, i32) {
    %c0_i32 = arith.constant 0 : i32
    %c0_i32_0 = arith.constant 0 : i32
    %c0_i32_1 = arith.constant 0 : i32
    return %c0_i32, %c0_i32_0 : i32, i32
  }
  func.func @transform_6(%arg0: i32) -> (i32, i32) {
    %c0_i32 = arith.constant 0 : i32
    %c0_i32_0 = arith.constant 0 : i32
    %c0_i32_1 = arith.constant 0 : i32
    return %c0_i32, %c0_i32_0 : i32, i32
  }
  func.func @transform_7(%arg0: i32) -> (i32, i32) {
    %c0_i32 = arith.constant 0 : i32
    %c0_i32_0 = arith.constant 0 : i32
    %c0_i32_1 = arith.constant 0 : i32
    return %c0_i32, %c0_i32_0 : i32, i32
  }
  func.func @transform_8(%arg0: i32) -> (i32, i32) {
    %c0_i32 = arith.constant 0 : i32
    %c0_i32_0 = arith.constant 0 : i32
    return %arg0, %c0_i32 : i32, i32
  }
  func.func @transform_9(%arg0: i32) -> (i32, i32) {
    %c0_i32 = arith.constant 0 : i32
    %c0_i32_0 = arith.constant 0 : i32
    return %arg0, %c0_i32 : i32, i32
  }
}

module attributes {stable_mosaic.version = 11 : i64} {
  func.func @_bigru_rec_kernel(%arg0: i32, %arg1: memref<8x8x24xbf16, #tpu.memory_space<vmem>>, %arg2: memref<8x8x24xbf16, #tpu.memory_space<vmem>>, %arg3: memref<16x48xbf16, #tpu.memory_space<vmem>>, %arg4: memref<1x8xf32, #tpu.memory_space<vmem>>, %arg5: memref<1x8xf32, #tpu.memory_space<vmem>>, %arg6: memref<8x8x8xbf16, #tpu.memory_space<vmem>>, %arg7: memref<8x8x8xbf16, #tpu.memory_space<vmem>>) attributes {dimension_semantics = [#tpu.dimension_semantics<parallel>], iteration_bounds = array<i64: 1>, scalar_prefetch = 0 : i64, scratch_operands = 0 : i64, tpu.core_type = #tpu.core_type<tc>, window_params = [{transform_indices = @transform_0, window_bounds = array<i64: 8, 8, 24>}, {transform_indices = @transform_1, window_bounds = array<i64: 8, 8, 24>}, {pipeline_mode = #tpu.pipeline_mode<synchronous>, transform_indices = @transform_2, window_bounds = array<i64: 16, 48>}, {pipeline_mode = #tpu.pipeline_mode<synchronous>, transform_indices = @transform_3, window_bounds = array<i64: 1, 8>}, {pipeline_mode = #tpu.pipeline_mode<synchronous>, transform_indices = @transform_4, window_bounds = array<i64: 1, 8>}, {transform_indices = @transform_5, window_bounds = array<i64: 8, 8, 8>}, {transform_indices = @transform_6, window_bounds = array<i64: 8, 8, 8>}]} {
    %c0 = arith.constant 0 : index
    %c0_0 = arith.constant 0 : index
    %0 = vector.load %arg3[%c0, %c0_0] : memref<16x48xbf16, #tpu.memory_space<vmem>>, vector<16x48xbf16>
    %c0_1 = arith.constant 0 : index
    %c0_2 = arith.constant 0 : index
    %1 = vector.load %arg4[%c0_1, %c0_2] : memref<1x8xf32, #tpu.memory_space<vmem>>, vector<1x8xf32>
    %c0_3 = arith.constant 0 : index
    %c0_4 = arith.constant 0 : index
    %2 = vector.load %arg5[%c0_3, %c0_4] : memref<1x8xf32, #tpu.memory_space<vmem>>, vector<1x8xf32>
    %cst = arith.constant 0.000000e+00 : f32
    %3 = vector.broadcast %cst : f32 to vector<8x8xf32>
    %c0_i32 = arith.constant 0 : i32
    %c7_i32 = arith.constant 7 : i32
    %4 = arith.subi %c7_i32, %c0_i32 : i32
    %5 = tpu.concatenate %3, %3 in 1 : vector<8x8xf32>, vector<8x8xf32> -> vector<8x16xf32>
    %6 = arith.truncf %5 : vector<8x16xf32> to vector<8x16xbf16>
    %cst_5 = arith.constant dense<0.000000e+00> : vector<8x48xf32>
    %7 = tpu.matmul %6, %0, %cst_5 {dimension_numbers = #tpu.dot_dimension_numbers<[1], [0], [0], [1], [0, 0, 1, 1], [], []>} : vector<8x16xbf16>, vector<16x48xbf16>, vector<8x48xf32> -> vector<8x48xf32>
    %8 = arith.index_cast %c0_i32 : i32 to index
    %c0_6 = arith.constant 0 : index
    %c0_7 = arith.constant 0 : index
    %9 = vector.load %arg1[%8, %c0_6, %c0_7] : memref<8x8x24xbf16, #tpu.memory_space<vmem>>, vector<1x8x24xbf16>
    %10 = vector.shape_cast %9 : vector<1x8x24xbf16> to vector<8x24xbf16>
    %11 = arith.extf %10 : vector<8x24xbf16> to vector<8x24xf32>
    %12 = arith.index_cast %4 : i32 to index
    %c0_8 = arith.constant 0 : index
    %c0_9 = arith.constant 0 : index
    %13 = vector.load %arg2[%12, %c0_8, %c0_9] : memref<8x8x24xbf16, #tpu.memory_space<vmem>>, vector<1x8x24xbf16>
    %14 = vector.shape_cast %13 : vector<1x8x24xbf16> to vector<8x24xbf16>
    %15 = arith.extf %14 : vector<8x24xbf16> to vector<8x24xf32>
    %16 = vector.extract_strided_slice %7 {offsets = [0, 0], sizes = [8, 24], strides = [1, 1]} : vector<8x48xf32> to vector<8x24xf32>
    %17 = vector.extract_strided_slice %11 {offsets = [0, 0], sizes = [8, 8], strides = [1, 1]} : vector<8x24xf32> to vector<8x8xf32>
    %18 = vector.extract_strided_slice %16 {offsets = [0, 0], sizes = [8, 8], strides = [1, 1]} : vector<8x24xf32> to vector<8x8xf32>
    %19 = arith.addf %17, %18 : vector<8x8xf32>
    %20 = arith.negf %19 : vector<8x8xf32>
    %21 = math.exp %20 : vector<8x8xf32>
    %cst_10 = arith.constant 1.000000e+00 : f32
    %22 = vector.broadcast %cst_10 : f32 to vector<8x8xf32>
    %23 = arith.addf %22, %21 : vector<8x8xf32>
    %24 = arith.divf %22, %23 : vector<8x8xf32>
    %25 = vector.extract_strided_slice %11 {offsets = [0, 8], sizes = [8, 8], strides = [1, 1]} : vector<8x24xf32> to vector<8x8xf32>
    %26 = vector.extract_strided_slice %16 {offsets = [0, 8], sizes = [8, 8], strides = [1, 1]} : vector<8x24xf32> to vector<8x8xf32>
    %27 = arith.addf %25, %26 : vector<8x8xf32>
    %28 = arith.negf %27 : vector<8x8xf32>
    %29 = math.exp %28 : vector<8x8xf32>
    %cst_11 = arith.constant 1.000000e+00 : f32
    %30 = vector.broadcast %cst_11 : f32 to vector<8x8xf32>
    %31 = arith.addf %30, %29 : vector<8x8xf32>
    %32 = arith.divf %30, %31 : vector<8x8xf32>
    %33 = vector.extract_strided_slice %11 {offsets = [0, 16], sizes = [8, 8], strides = [1, 1]} : vector<8x24xf32> to vector<8x8xf32>
    %34 = vector.extract_strided_slice %16 {offsets = [0, 16], sizes = [8, 8], strides = [1, 1]} : vector<8x24xf32> to vector<8x8xf32>
    %35 = vector.broadcast %1 : vector<1x8xf32> to vector<8x8xf32>
    %36 = arith.addf %34, %35 : vector<8x8xf32>
    %37 = arith.mulf %24, %36 : vector<8x8xf32>
    %38 = arith.addf %33, %37 : vector<8x8xf32>
    %39 = math.tanh %38 : vector<8x8xf32>
    %cst_12 = arith.constant 1.000000e+00 : f32
    %40 = vector.broadcast %cst_12 : f32 to vector<8x8xf32>
    %41 = arith.subf %40, %32 : vector<8x8xf32>
    %42 = arith.mulf %41, %39 : vector<8x8xf32>
    %43 = arith.mulf %32, %3 : vector<8x8xf32>
    %44 = arith.addf %42, %43 : vector<8x8xf32>
    %45 = vector.extract_strided_slice %7 {offsets = [0, 24], sizes = [8, 24], strides = [1, 1]} : vector<8x48xf32> to vector<8x24xf32>
    %46 = vector.extract_strided_slice %15 {offsets = [0, 0], sizes = [8, 8], strides = [1, 1]} : vector<8x24xf32> to vector<8x8xf32>
    %47 = vector.extract_strided_slice %45 {offsets = [0, 0], sizes = [8, 8], strides = [1, 1]} : vector<8x24xf32> to vector<8x8xf32>
    %48 = arith.addf %46, %47 : vector<8x8xf32>
    %49 = arith.negf %48 : vector<8x8xf32>
    %50 = math.exp %49 : vector<8x8xf32>
    %cst_13 = arith.constant 1.000000e+00 : f32
    %51 = vector.broadcast %cst_13 : f32 to vector<8x8xf32>
    %52 = arith.addf %51, %50 : vector<8x8xf32>
    %53 = arith.divf %51, %52 : vector<8x8xf32>
    %54 = vector.extract_strided_slice %15 {offsets = [0, 8], sizes = [8, 8], strides = [1, 1]} : vector<8x24xf32> to vector<8x8xf32>
    %55 = vector.extract_strided_slice %45 {offsets = [0, 8], sizes = [8, 8], strides = [1, 1]} : vector<8x24xf32> to vector<8x8xf32>
    %56 = arith.addf %54, %55 : vector<8x8xf32>
    %57 = arith.negf %56 : vector<8x8xf32>
    %58 = math.exp %57 : vector<8x8xf32>
    %cst_14 = arith.constant 1.000000e+00 : f32
    %59 = vector.broadcast %cst_14 : f32 to vector<8x8xf32>
    %60 = arith.addf %59, %58 : vector<8x8xf32>
    %61 = arith.divf %59, %60 : vector<8x8xf32>
    %62 = vector.extract_strided_slice %15 {offsets = [0, 16], sizes = [8, 8], strides = [1, 1]} : vector<8x24xf32> to vector<8x8xf32>
    %63 = vector.extract_strided_slice %45 {offsets = [0, 16], sizes = [8, 8], strides = [1, 1]} : vector<8x24xf32> to vector<8x8xf32>
    %64 = vector.broadcast %2 : vector<1x8xf32> to vector<8x8xf32>
    %65 = arith.addf %63, %64 : vector<8x8xf32>
    %66 = arith.mulf %53, %65 : vector<8x8xf32>
    %67 = arith.addf %62, %66 : vector<8x8xf32>
    %68 = math.tanh %67 : vector<8x8xf32>
    %cst_15 = arith.constant 1.000000e+00 : f32
    %69 = vector.broadcast %cst_15 : f32 to vector<8x8xf32>
    %70 = arith.subf %69, %61 : vector<8x8xf32>
    %71 = arith.mulf %70, %68 : vector<8x8xf32>
    %72 = arith.mulf %61, %3 : vector<8x8xf32>
    %73 = arith.addf %71, %72 : vector<8x8xf32>
    %74 = arith.truncf %44 : vector<8x8xf32> to vector<8x8xbf16>
    %75 = arith.index_cast %c0_i32 : i32 to index
    %c0_16 = arith.constant 0 : index
    %c0_17 = arith.constant 0 : index
    %76 = vector.load %arg6[%75, %c0_16, %c0_17] : memref<8x8x8xbf16, #tpu.memory_space<vmem>>, vector<1x8x8xbf16>
    %77 = vector.shape_cast %76 : vector<1x8x8xbf16> to vector<8x8xbf16>
    %78 = vector.shape_cast %74 : vector<8x8xbf16> to vector<1x8x8xbf16>
    tpu.vector_store %arg6[%75, %c0_16, %c0_17], %78 {strides = array<i32>} : memref<8x8x8xbf16, #tpu.memory_space<vmem>>, vector<1x8x8xbf16>,
    %79 = arith.truncf %73 : vector<8x8xf32> to vector<8x8xbf16>
    %80 = arith.index_cast %4 : i32 to index
    %c0_18 = arith.constant 0 : index
    %c0_19 = arith.constant 0 : index
    %81 = vector.load %arg7[%80, %c0_18, %c0_19] : memref<8x8x8xbf16, #tpu.memory_space<vmem>>, vector<1x8x8xbf16>
    %82 = vector.shape_cast %81 : vector<1x8x8xbf16> to vector<8x8xbf16>
    %83 = vector.shape_cast %79 : vector<8x8xbf16> to vector<1x8x8xbf16>
    tpu.vector_store %arg7[%80, %c0_18, %c0_19], %83 {strides = array<i32>} : memref<8x8x8xbf16, #tpu.memory_space<vmem>>, vector<1x8x8xbf16>,
    %c1_i32 = arith.constant 1 : i32
    %c7_i32_20 = arith.constant 7 : i32
    %84 = arith.subi %c7_i32_20, %c1_i32 : i32
    %85 = tpu.concatenate %44, %73 in 1 : vector<8x8xf32>, vector<8x8xf32> -> vector<8x16xf32>
    %86 = arith.truncf %85 : vector<8x16xf32> to vector<8x16xbf16>
    %cst_21 = arith.constant dense<0.000000e+00> : vector<8x48xf32>
    %87 = tpu.matmul %86, %0, %cst_21 {dimension_numbers = #tpu.dot_dimension_numbers<[1], [0], [0], [1], [0, 0, 1, 1], [], []>} : vector<8x16xbf16>, vector<16x48xbf16>, vector<8x48xf32> -> vector<8x48xf32>
    %88 = arith.index_cast %c1_i32 : i32 to index
    %c0_22 = arith.constant 0 : index
    %c0_23 = arith.constant 0 : index
    %89 = vector.load %arg1[%88, %c0_22, %c0_23] : memref<8x8x24xbf16, #tpu.memory_space<vmem>>, vector<1x8x24xbf16>
    %90 = vector.shape_cast %89 : vector<1x8x24xbf16> to vector<8x24xbf16>
    %91 = arith.extf %90 : vector<8x24xbf16> to vector<8x24xf32>
    %92 = arith.index_cast %84 : i32 to index
    %c0_24 = arith.constant 0 : index
    %c0_25 = arith.constant 0 : index
    %93 = vector.load %arg2[%92, %c0_24, %c0_25] : memref<8x8x24xbf16, #tpu.memory_space<vmem>>, vector<1x8x24xbf16>
    %94 = vector.shape_cast %93 : vector<1x8x24xbf16> to vector<8x24xbf16>
    %95 = arith.extf %94 : vector<8x24xbf16> to vector<8x24xf32>
    %96 = vector.extract_strided_slice %87 {offsets = [0, 0], sizes = [8, 24], strides = [1, 1]} : vector<8x48xf32> to vector<8x24xf32>
    %97 = vector.extract_strided_slice %91 {offsets = [0, 0], sizes = [8, 8], strides = [1, 1]} : vector<8x24xf32> to vector<8x8xf32>
    %98 = vector.extract_strided_slice %96 {offsets = [0, 0], sizes = [8, 8], strides = [1, 1]} : vector<8x24xf32> to vector<8x8xf32>
    %99 = arith.addf %97, %98 : vector<8x8xf32>
    %100 = arith.negf %99 : vector<8x8xf32>
    %101 = math.exp %100 : vector<8x8xf32>
    %cst_26 = arith.constant 1.000000e+00 : f32
    %102 = vector.broadcast %cst_26 : f32 to vector<8x8xf32>
    %103 = arith.addf %102, %101 : vector<8x8xf32>
    %104 = arith.divf %102, %103 : vector<8x8xf32>
    %105 = vector.extract_strided_slice %91 {offsets = [0, 8], sizes = [8, 8], strides = [1, 1]} : vector<8x24xf32> to vector<8x8xf32>
    %106 = vector.extract_strided_slice %96 {offsets = [0, 8], sizes = [8, 8], strides = [1, 1]} : vector<8x24xf32> to vector<8x8xf32>
    %107 = arith.addf %105, %106 : vector<8x8xf32>
    %108 = arith.negf %107 : vector<8x8xf32>
    %109 = math.exp %108 : vector<8x8xf32>
    %cst_27 = arith.constant 1.000000e+00 : f32
    %110 = vector.broadcast %cst_27 : f32 to vector<8x8xf32>
    %111 = arith.addf %110, %109 : vector<8x8xf32>
    %112 = arith.divf %110, %111 : vector<8x8xf32>
    %113 = vector.extract_strided_slice %91 {offsets = [0, 16], sizes = [8, 8], strides = [1, 1]} : vector<8x24xf32> to vector<8x8xf32>
    %114 = vector.extract_strided_slice %96 {offsets = [0, 16], sizes = [8, 8], strides = [1, 1]} : vector<8x24xf32> to vector<8x8xf32>
    %115 = vector.broadcast %1 : vector<1x8xf32> to vector<8x8xf32>
    %116 = arith.addf %114, %115 : vector<8x8xf32>
    %117 = arith.mulf %104, %116 : vector<8x8xf32>
    %118 = arith.addf %113, %117 : vector<8x8xf32>
    %119 = math.tanh %118 : vector<8x8xf32>
    %cst_28 = arith.constant 1.000000e+00 : f32
    %120 = vector.broadcast %cst_28 : f32 to vector<8x8xf32>
    %121 = arith.subf %120, %112 : vector<8x8xf32>
    %122 = arith.mulf %121, %119 : vector<8x8xf32>
    %123 = arith.mulf %112, %44 : vector<8x8xf32>
    %124 = arith.addf %122, %123 : vector<8x8xf32>
    %125 = vector.extract_strided_slice %87 {offsets = [0, 24], sizes = [8, 24], strides = [1, 1]} : vector<8x48xf32> to vector<8x24xf32>
    %126 = vector.extract_strided_slice %95 {offsets = [0, 0], sizes = [8, 8], strides = [1, 1]} : vector<8x24xf32> to vector<8x8xf32>
    %127 = vector.extract_strided_slice %125 {offsets = [0, 0], sizes = [8, 8], strides = [1, 1]} : vector<8x24xf32> to vector<8x8xf32>
    %128 = arith.addf %126, %127 : vector<8x8xf32>
    %129 = arith.negf %128 : vector<8x8xf32>
    %130 = math.exp %129 : vector<8x8xf32>
    %cst_29 = arith.constant 1.000000e+00 : f32
    %131 = vector.broadcast %cst_29 : f32 to vector<8x8xf32>
    %132 = arith.addf %131, %130 : vector<8x8xf32>
    %133 = arith.divf %131, %132 : vector<8x8xf32>
    %134 = vector.extract_strided_slice %95 {offsets = [0, 8], sizes = [8, 8], strides = [1, 1]} : vector<8x24xf32> to vector<8x8xf32>
    %135 = vector.extract_strided_slice %125 {offsets = [0, 8], sizes = [8, 8], strides = [1, 1]} : vector<8x24xf32> to vector<8x8xf32>
    %136 = arith.addf %134, %135 : vector<8x8xf32>
    %137 = arith.negf %136 : vector<8x8xf32>
    %138 = math.exp %137 : vector<8x8xf32>
    %cst_30 = arith.constant 1.000000e+00 : f32
    %139 = vector.broadcast %cst_30 : f32 to vector<8x8xf32>
    %140 = arith.addf %139, %138 : vector<8x8xf32>
    %141 = arith.divf %139, %140 : vector<8x8xf32>
    %142 = vector.extract_strided_slice %95 {offsets = [0, 16], sizes = [8, 8], strides = [1, 1]} : vector<8x24xf32> to vector<8x8xf32>
    %143 = vector.extract_strided_slice %125 {offsets = [0, 16], sizes = [8, 8], strides = [1, 1]} : vector<8x24xf32> to vector<8x8xf32>
    %144 = vector.broadcast %2 : vector<1x8xf32> to vector<8x8xf32>
    %145 = arith.addf %143, %144 : vector<8x8xf32>
    %146 = arith.mulf %133, %145 : vector<8x8xf32>
    %147 = arith.addf %142, %146 : vector<8x8xf32>
    %148 = math.tanh %147 : vector<8x8xf32>
    %cst_31 = arith.constant 1.000000e+00 : f32
    %149 = vector.broadcast %cst_31 : f32 to vector<8x8xf32>
    %150 = arith.subf %149, %141 : vector<8x8xf32>
    %151 = arith.mulf %150, %148 : vector<8x8xf32>
    %152 = arith.mulf %141, %73 : vector<8x8xf32>
    %153 = arith.addf %151, %152 : vector<8x8xf32>
    %154 = arith.truncf %124 : vector<8x8xf32> to vector<8x8xbf16>
    %155 = arith.index_cast %c1_i32 : i32 to index
    %c0_32 = arith.constant 0 : index
    %c0_33 = arith.constant 0 : index
    %156 = vector.load %arg6[%155, %c0_32, %c0_33] : memref<8x8x8xbf16, #tpu.memory_space<vmem>>, vector<1x8x8xbf16>
    %157 = vector.shape_cast %156 : vector<1x8x8xbf16> to vector<8x8xbf16>
    %158 = vector.shape_cast %154 : vector<8x8xbf16> to vector<1x8x8xbf16>
    tpu.vector_store %arg6[%155, %c0_32, %c0_33], %158 {strides = array<i32>} : memref<8x8x8xbf16, #tpu.memory_space<vmem>>, vector<1x8x8xbf16>,
    %159 = arith.truncf %153 : vector<8x8xf32> to vector<8x8xbf16>
    %160 = arith.index_cast %84 : i32 to index
    %c0_34 = arith.constant 0 : index
    %c0_35 = arith.constant 0 : index
    %161 = vector.load %arg7[%160, %c0_34, %c0_35] : memref<8x8x8xbf16, #tpu.memory_space<vmem>>, vector<1x8x8xbf16>
    %162 = vector.shape_cast %161 : vector<1x8x8xbf16> to vector<8x8xbf16>
    %163 = vector.shape_cast %159 : vector<8x8xbf16> to vector<1x8x8xbf16>
    tpu.vector_store %arg7[%160, %c0_34, %c0_35], %163 {strides = array<i32>} : memref<8x8x8xbf16, #tpu.memory_space<vmem>>, vector<1x8x8xbf16>,
    %c2_i32 = arith.constant 2 : i32
    %c7_i32_36 = arith.constant 7 : i32
    %164 = arith.subi %c7_i32_36, %c2_i32 : i32
    %165 = tpu.concatenate %124, %153 in 1 : vector<8x8xf32>, vector<8x8xf32> -> vector<8x16xf32>
    %166 = arith.truncf %165 : vector<8x16xf32> to vector<8x16xbf16>
    %cst_37 = arith.constant dense<0.000000e+00> : vector<8x48xf32>
    %167 = tpu.matmul %166, %0, %cst_37 {dimension_numbers = #tpu.dot_dimension_numbers<[1], [0], [0], [1], [0, 0, 1, 1], [], []>} : vector<8x16xbf16>, vector<16x48xbf16>, vector<8x48xf32> -> vector<8x48xf32>
    %168 = arith.index_cast %c2_i32 : i32 to index
    %c0_38 = arith.constant 0 : index
    %c0_39 = arith.constant 0 : index
    %169 = vector.load %arg1[%168, %c0_38, %c0_39] : memref<8x8x24xbf16, #tpu.memory_space<vmem>>, vector<1x8x24xbf16>
    %170 = vector.shape_cast %169 : vector<1x8x24xbf16> to vector<8x24xbf16>
    %171 = arith.extf %170 : vector<8x24xbf16> to vector<8x24xf32>
    %172 = arith.index_cast %164 : i32 to index
    %c0_40 = arith.constant 0 : index
    %c0_41 = arith.constant 0 : index
    %173 = vector.load %arg2[%172, %c0_40, %c0_41] : memref<8x8x24xbf16, #tpu.memory_space<vmem>>, vector<1x8x24xbf16>
    %174 = vector.shape_cast %173 : vector<1x8x24xbf16> to vector<8x24xbf16>
    %175 = arith.extf %174 : vector<8x24xbf16> to vector<8x24xf32>
    %176 = vector.extract_strided_slice %167 {offsets = [0, 0], sizes = [8, 24], strides = [1, 1]} : vector<8x48xf32> to vector<8x24xf32>
    %177 = vector.extract_strided_slice %171 {offsets = [0, 0], sizes = [8, 8], strides = [1, 1]} : vector<8x24xf32> to vector<8x8xf32>
    %178 = vector.extract_strided_slice %176 {offsets = [0, 0], sizes = [8, 8], strides = [1, 1]} : vector<8x24xf32> to vector<8x8xf32>
    %179 = arith.addf %177, %178 : vector<8x8xf32>
    %180 = arith.negf %179 : vector<8x8xf32>
    %181 = math.exp %180 : vector<8x8xf32>
    %cst_42 = arith.constant 1.000000e+00 : f32
    %182 = vector.broadcast %cst_42 : f32 to vector<8x8xf32>
    %183 = arith.addf %182, %181 : vector<8x8xf32>
    %184 = arith.divf %182, %183 : vector<8x8xf32>
    %185 = vector.extract_strided_slice %171 {offsets = [0, 8], sizes = [8, 8], strides = [1, 1]} : vector<8x24xf32> to vector<8x8xf32>
    %186 = vector.extract_strided_slice %176 {offsets = [0, 8], sizes = [8, 8], strides = [1, 1]} : vector<8x24xf32> to vector<8x8xf32>
    %187 = arith.addf %185, %186 : vector<8x8xf32>
    %188 = arith.negf %187 : vector<8x8xf32>
    %189 = math.exp %188 : vector<8x8xf32>
    %cst_43 = arith.constant 1.000000e+00 : f32
    %190 = vector.broadcast %cst_43 : f32 to vector<8x8xf32>
    %191 = arith.addf %190, %189 : vector<8x8xf32>
    %192 = arith.divf %190, %191 : vector<8x8xf32>
    %193 = vector.extract_strided_slice %171 {offsets = [0, 16], sizes = [8, 8], strides = [1, 1]} : vector<8x24xf32> to vector<8x8xf32>
    %194 = vector.extract_strided_slice %176 {offsets = [0, 16], sizes = [8, 8], strides = [1, 1]} : vector<8x24xf32> to vector<8x8xf32>
    %195 = vector.broadcast %1 : vector<1x8xf32> to vector<8x8xf32>
    %196 = arith.addf %194, %195 : vector<8x8xf32>
    %197 = arith.mulf %184, %196 : vector<8x8xf32>
    %198 = arith.addf %193, %197 : vector<8x8xf32>
    %199 = math.tanh %198 : vector<8x8xf32>
    %cst_44 = arith.constant 1.000000e+00 : f32
    %200 = vector.broadcast %cst_44 : f32 to vector<8x8xf32>
    %201 = arith.subf %200, %192 : vector<8x8xf32>
    %202 = arith.mulf %201, %199 : vector<8x8xf32>
    %203 = arith.mulf %192, %124 : vector<8x8xf32>
    %204 = arith.addf %202, %203 : vector<8x8xf32>
    %205 = vector.extract_strided_slice %167 {offsets = [0, 24], sizes = [8, 24], strides = [1, 1]} : vector<8x48xf32> to vector<8x24xf32>
    %206 = vector.extract_strided_slice %175 {offsets = [0, 0], sizes = [8, 8], strides = [1, 1]} : vector<8x24xf32> to vector<8x8xf32>
    %207 = vector.extract_strided_slice %205 {offsets = [0, 0], sizes = [8, 8], strides = [1, 1]} : vector<8x24xf32> to vector<8x8xf32>
    %208 = arith.addf %206, %207 : vector<8x8xf32>
    %209 = arith.negf %208 : vector<8x8xf32>
    %210 = math.exp %209 : vector<8x8xf32>
    %cst_45 = arith.constant 1.000000e+00 : f32
    %211 = vector.broadcast %cst_45 : f32 to vector<8x8xf32>
    %212 = arith.addf %211, %210 : vector<8x8xf32>
    %213 = arith.divf %211, %212 : vector<8x8xf32>
    %214 = vector.extract_strided_slice %175 {offsets = [0, 8], sizes = [8, 8], strides = [1, 1]} : vector<8x24xf32> to vector<8x8xf32>
    %215 = vector.extract_strided_slice %205 {offsets = [0, 8], sizes = [8, 8], strides = [1, 1]} : vector<8x24xf32> to vector<8x8xf32>
    %216 = arith.addf %214, %215 : vector<8x8xf32>
    %217 = arith.negf %216 : vector<8x8xf32>
    %218 = math.exp %217 : vector<8x8xf32>
    %cst_46 = arith.constant 1.000000e+00 : f32
    %219 = vector.broadcast %cst_46 : f32 to vector<8x8xf32>
    %220 = arith.addf %219, %218 : vector<8x8xf32>
    %221 = arith.divf %219, %220 : vector<8x8xf32>
    %222 = vector.extract_strided_slice %175 {offsets = [0, 16], sizes = [8, 8], strides = [1, 1]} : vector<8x24xf32> to vector<8x8xf32>
    %223 = vector.extract_strided_slice %205 {offsets = [0, 16], sizes = [8, 8], strides = [1, 1]} : vector<8x24xf32> to vector<8x8xf32>
    %224 = vector.broadcast %2 : vector<1x8xf32> to vector<8x8xf32>
    %225 = arith.addf %223, %224 : vector<8x8xf32>
    %226 = arith.mulf %213, %225 : vector<8x8xf32>
    %227 = arith.addf %222, %226 : vector<8x8xf32>
    %228 = math.tanh %227 : vector<8x8xf32>
    %cst_47 = arith.constant 1.000000e+00 : f32
    %229 = vector.broadcast %cst_47 : f32 to vector<8x8xf32>
    %230 = arith.subf %229, %221 : vector<8x8xf32>
    %231 = arith.mulf %230, %228 : vector<8x8xf32>
    %232 = arith.mulf %221, %153 : vector<8x8xf32>
    %233 = arith.addf %231, %232 : vector<8x8xf32>
    %234 = arith.truncf %204 : vector<8x8xf32> to vector<8x8xbf16>
    %235 = arith.index_cast %c2_i32 : i32 to index
    %c0_48 = arith.constant 0 : index
    %c0_49 = arith.constant 0 : index
    %236 = vector.load %arg6[%235, %c0_48, %c0_49] : memref<8x8x8xbf16, #tpu.memory_space<vmem>>, vector<1x8x8xbf16>
    %237 = vector.shape_cast %236 : vector<1x8x8xbf16> to vector<8x8xbf16>
    %238 = vector.shape_cast %234 : vector<8x8xbf16> to vector<1x8x8xbf16>
    tpu.vector_store %arg6[%235, %c0_48, %c0_49], %238 {strides = array<i32>} : memref<8x8x8xbf16, #tpu.memory_space<vmem>>, vector<1x8x8xbf16>,
    %239 = arith.truncf %233 : vector<8x8xf32> to vector<8x8xbf16>
    %240 = arith.index_cast %164 : i32 to index
    %c0_50 = arith.constant 0 : index
    %c0_51 = arith.constant 0 : index
    %241 = vector.load %arg7[%240, %c0_50, %c0_51] : memref<8x8x8xbf16, #tpu.memory_space<vmem>>, vector<1x8x8xbf16>
    %242 = vector.shape_cast %241 : vector<1x8x8xbf16> to vector<8x8xbf16>
    %243 = vector.shape_cast %239 : vector<8x8xbf16> to vector<1x8x8xbf16>
    tpu.vector_store %arg7[%240, %c0_50, %c0_51], %243 {strides = array<i32>} : memref<8x8x8xbf16, #tpu.memory_space<vmem>>, vector<1x8x8xbf16>,
    %c3_i32 = arith.constant 3 : i32
    %c7_i32_52 = arith.constant 7 : i32
    %244 = arith.subi %c7_i32_52, %c3_i32 : i32
    %245 = tpu.concatenate %204, %233 in 1 : vector<8x8xf32>, vector<8x8xf32> -> vector<8x16xf32>
    %246 = arith.truncf %245 : vector<8x16xf32> to vector<8x16xbf16>
    %cst_53 = arith.constant dense<0.000000e+00> : vector<8x48xf32>
    %247 = tpu.matmul %246, %0, %cst_53 {dimension_numbers = #tpu.dot_dimension_numbers<[1], [0], [0], [1], [0, 0, 1, 1], [], []>} : vector<8x16xbf16>, vector<16x48xbf16>, vector<8x48xf32> -> vector<8x48xf32>
    %248 = arith.index_cast %c3_i32 : i32 to index
    %c0_54 = arith.constant 0 : index
    %c0_55 = arith.constant 0 : index
    %249 = vector.load %arg1[%248, %c0_54, %c0_55] : memref<8x8x24xbf16, #tpu.memory_space<vmem>>, vector<1x8x24xbf16>
    %250 = vector.shape_cast %249 : vector<1x8x24xbf16> to vector<8x24xbf16>
    %251 = arith.extf %250 : vector<8x24xbf16> to vector<8x24xf32>
    %252 = arith.index_cast %244 : i32 to index
    %c0_56 = arith.constant 0 : index
    %c0_57 = arith.constant 0 : index
    %253 = vector.load %arg2[%252, %c0_56, %c0_57] : memref<8x8x24xbf16, #tpu.memory_space<vmem>>, vector<1x8x24xbf16>
    %254 = vector.shape_cast %253 : vector<1x8x24xbf16> to vector<8x24xbf16>
    %255 = arith.extf %254 : vector<8x24xbf16> to vector<8x24xf32>
    %256 = vector.extract_strided_slice %247 {offsets = [0, 0], sizes = [8, 24], strides = [1, 1]} : vector<8x48xf32> to vector<8x24xf32>
    %257 = vector.extract_strided_slice %251 {offsets = [0, 0], sizes = [8, 8], strides = [1, 1]} : vector<8x24xf32> to vector<8x8xf32>
    %258 = vector.extract_strided_slice %256 {offsets = [0, 0], sizes = [8, 8], strides = [1, 1]} : vector<8x24xf32> to vector<8x8xf32>
    %259 = arith.addf %257, %258 : vector<8x8xf32>
    %260 = arith.negf %259 : vector<8x8xf32>
    %261 = math.exp %260 : vector<8x8xf32>
    %cst_58 = arith.constant 1.000000e+00 : f32
    %262 = vector.broadcast %cst_58 : f32 to vector<8x8xf32>
    %263 = arith.addf %262, %261 : vector<8x8xf32>
    %264 = arith.divf %262, %263 : vector<8x8xf32>
    %265 = vector.extract_strided_slice %251 {offsets = [0, 8], sizes = [8, 8], strides = [1, 1]} : vector<8x24xf32> to vector<8x8xf32>
    %266 = vector.extract_strided_slice %256 {offsets = [0, 8], sizes = [8, 8], strides = [1, 1]} : vector<8x24xf32> to vector<8x8xf32>
    %267 = arith.addf %265, %266 : vector<8x8xf32>
    %268 = arith.negf %267 : vector<8x8xf32>
    %269 = math.exp %268 : vector<8x8xf32>
    %cst_59 = arith.constant 1.000000e+00 : f32
    %270 = vector.broadcast %cst_59 : f32 to vector<8x8xf32>
    %271 = arith.addf %270, %269 : vector<8x8xf32>
    %272 = arith.divf %270, %271 : vector<8x8xf32>
    %273 = vector.extract_strided_slice %251 {offsets = [0, 16], sizes = [8, 8], strides = [1, 1]} : vector<8x24xf32> to vector<8x8xf32>
    %274 = vector.extract_strided_slice %256 {offsets = [0, 16], sizes = [8, 8], strides = [1, 1]} : vector<8x24xf32> to vector<8x8xf32>
    %275 = vector.broadcast %1 : vector<1x8xf32> to vector<8x8xf32>
    %276 = arith.addf %274, %275 : vector<8x8xf32>
    %277 = arith.mulf %264, %276 : vector<8x8xf32>
    %278 = arith.addf %273, %277 : vector<8x8xf32>
    %279 = math.tanh %278 : vector<8x8xf32>
    %cst_60 = arith.constant 1.000000e+00 : f32
    %280 = vector.broadcast %cst_60 : f32 to vector<8x8xf32>
    %281 = arith.subf %280, %272 : vector<8x8xf32>
    %282 = arith.mulf %281, %279 : vector<8x8xf32>
    %283 = arith.mulf %272, %204 : vector<8x8xf32>
    %284 = arith.addf %282, %283 : vector<8x8xf32>
    %285 = vector.extract_strided_slice %247 {offsets = [0, 24], sizes = [8, 24], strides = [1, 1]} : vector<8x48xf32> to vector<8x24xf32>
    %286 = vector.extract_strided_slice %255 {offsets = [0, 0], sizes = [8, 8], strides = [1, 1]} : vector<8x24xf32> to vector<8x8xf32>
    %287 = vector.extract_strided_slice %285 {offsets = [0, 0], sizes = [8, 8], strides = [1, 1]} : vector<8x24xf32> to vector<8x8xf32>
    %288 = arith.addf %286, %287 : vector<8x8xf32>
    %289 = arith.negf %288 : vector<8x8xf32>
    %290 = math.exp %289 : vector<8x8xf32>
    %cst_61 = arith.constant 1.000000e+00 : f32
    %291 = vector.broadcast %cst_61 : f32 to vector<8x8xf32>
    %292 = arith.addf %291, %290 : vector<8x8xf32>
    %293 = arith.divf %291, %292 : vector<8x8xf32>
    %294 = vector.extract_strided_slice %255 {offsets = [0, 8], sizes = [8, 8], strides = [1, 1]} : vector<8x24xf32> to vector<8x8xf32>
    %295 = vector.extract_strided_slice %285 {offsets = [0, 8], sizes = [8, 8], strides = [1, 1]} : vector<8x24xf32> to vector<8x8xf32>
    %296 = arith.addf %294, %295 : vector<8x8xf32>
    %297 = arith.negf %296 : vector<8x8xf32>
    %298 = math.exp %297 : vector<8x8xf32>
    %cst_62 = arith.constant 1.000000e+00 : f32
    %299 = vector.broadcast %cst_62 : f32 to vector<8x8xf32>
    %300 = arith.addf %299, %298 : vector<8x8xf32>
    %301 = arith.divf %299, %300 : vector<8x8xf32>
    %302 = vector.extract_strided_slice %255 {offsets = [0, 16], sizes = [8, 8], strides = [1, 1]} : vector<8x24xf32> to vector<8x8xf32>
    %303 = vector.extract_strided_slice %285 {offsets = [0, 16], sizes = [8, 8], strides = [1, 1]} : vector<8x24xf32> to vector<8x8xf32>
    %304 = vector.broadcast %2 : vector<1x8xf32> to vector<8x8xf32>
    %305 = arith.addf %303, %304 : vector<8x8xf32>
    %306 = arith.mulf %293, %305 : vector<8x8xf32>
    %307 = arith.addf %302, %306 : vector<8x8xf32>
    %308 = math.tanh %307 : vector<8x8xf32>
    %cst_63 = arith.constant 1.000000e+00 : f32
    %309 = vector.broadcast %cst_63 : f32 to vector<8x8xf32>
    %310 = arith.subf %309, %301 : vector<8x8xf32>
    %311 = arith.mulf %310, %308 : vector<8x8xf32>
    %312 = arith.mulf %301, %233 : vector<8x8xf32>
    %313 = arith.addf %311, %312 : vector<8x8xf32>
    %314 = arith.truncf %284 : vector<8x8xf32> to vector<8x8xbf16>
    %315 = arith.index_cast %c3_i32 : i32 to index
    %c0_64 = arith.constant 0 : index
    %c0_65 = arith.constant 0 : index
    %316 = vector.load %arg6[%315, %c0_64, %c0_65] : memref<8x8x8xbf16, #tpu.memory_space<vmem>>, vector<1x8x8xbf16>
    %317 = vector.shape_cast %316 : vector<1x8x8xbf16> to vector<8x8xbf16>
    %318 = vector.shape_cast %314 : vector<8x8xbf16> to vector<1x8x8xbf16>
    tpu.vector_store %arg6[%315, %c0_64, %c0_65], %318 {strides = array<i32>} : memref<8x8x8xbf16, #tpu.memory_space<vmem>>, vector<1x8x8xbf16>,
    %319 = arith.truncf %313 : vector<8x8xf32> to vector<8x8xbf16>
    %320 = arith.index_cast %244 : i32 to index
    %c0_66 = arith.constant 0 : index
    %c0_67 = arith.constant 0 : index
    %321 = vector.load %arg7[%320, %c0_66, %c0_67] : memref<8x8x8xbf16, #tpu.memory_space<vmem>>, vector<1x8x8xbf16>
    %322 = vector.shape_cast %321 : vector<1x8x8xbf16> to vector<8x8xbf16>
    %323 = vector.shape_cast %319 : vector<8x8xbf16> to vector<1x8x8xbf16>
    tpu.vector_store %arg7[%320, %c0_66, %c0_67], %323 {strides = array<i32>} : memref<8x8x8xbf16, #tpu.memory_space<vmem>>, vector<1x8x8xbf16>,
    %c4_i32 = arith.constant 4 : i32
    %c7_i32_68 = arith.constant 7 : i32
    %324 = arith.subi %c7_i32_68, %c4_i32 : i32
    %325 = tpu.concatenate %284, %313 in 1 : vector<8x8xf32>, vector<8x8xf32> -> vector<8x16xf32>
    %326 = arith.truncf %325 : vector<8x16xf32> to vector<8x16xbf16>
    %cst_69 = arith.constant dense<0.000000e+00> : vector<8x48xf32>
    %327 = tpu.matmul %326, %0, %cst_69 {dimension_numbers = #tpu.dot_dimension_numbers<[1], [0], [0], [1], [0, 0, 1, 1], [], []>} : vector<8x16xbf16>, vector<16x48xbf16>, vector<8x48xf32> -> vector<8x48xf32>
    %328 = arith.index_cast %c4_i32 : i32 to index
    %c0_70 = arith.constant 0 : index
    %c0_71 = arith.constant 0 : index
    %329 = vector.load %arg1[%328, %c0_70, %c0_71] : memref<8x8x24xbf16, #tpu.memory_space<vmem>>, vector<1x8x24xbf16>
    %330 = vector.shape_cast %329 : vector<1x8x24xbf16> to vector<8x24xbf16>
    %331 = arith.extf %330 : vector<8x24xbf16> to vector<8x24xf32>
    %332 = arith.index_cast %324 : i32 to index
    %c0_72 = arith.constant 0 : index
    %c0_73 = arith.constant 0 : index
    %333 = vector.load %arg2[%332, %c0_72, %c0_73] : memref<8x8x24xbf16, #tpu.memory_space<vmem>>, vector<1x8x24xbf16>
    %334 = vector.shape_cast %333 : vector<1x8x24xbf16> to vector<8x24xbf16>
    %335 = arith.extf %334 : vector<8x24xbf16> to vector<8x24xf32>
    %336 = vector.extract_strided_slice %327 {offsets = [0, 0], sizes = [8, 24], strides = [1, 1]} : vector<8x48xf32> to vector<8x24xf32>
    %337 = vector.extract_strided_slice %331 {offsets = [0, 0], sizes = [8, 8], strides = [1, 1]} : vector<8x24xf32> to vector<8x8xf32>
    %338 = vector.extract_strided_slice %336 {offsets = [0, 0], sizes = [8, 8], strides = [1, 1]} : vector<8x24xf32> to vector<8x8xf32>
    %339 = arith.addf %337, %338 : vector<8x8xf32>
    %340 = arith.negf %339 : vector<8x8xf32>
    %341 = math.exp %340 : vector<8x8xf32>
    %cst_74 = arith.constant 1.000000e+00 : f32
    %342 = vector.broadcast %cst_74 : f32 to vector<8x8xf32>
    %343 = arith.addf %342, %341 : vector<8x8xf32>
    %344 = arith.divf %342, %343 : vector<8x8xf32>
    %345 = vector.extract_strided_slice %331 {offsets = [0, 8], sizes = [8, 8], strides = [1, 1]} : vector<8x24xf32> to vector<8x8xf32>
    %346 = vector.extract_strided_slice %336 {offsets = [0, 8], sizes = [8, 8], strides = [1, 1]} : vector<8x24xf32> to vector<8x8xf32>
    %347 = arith.addf %345, %346 : vector<8x8xf32>
    %348 = arith.negf %347 : vector<8x8xf32>
    %349 = math.exp %348 : vector<8x8xf32>
    %cst_75 = arith.constant 1.000000e+00 : f32
    %350 = vector.broadcast %cst_75 : f32 to vector<8x8xf32>
    %351 = arith.addf %350, %349 : vector<8x8xf32>
    %352 = arith.divf %350, %351 : vector<8x8xf32>
    %353 = vector.extract_strided_slice %331 {offsets = [0, 16], sizes = [8, 8], strides = [1, 1]} : vector<8x24xf32> to vector<8x8xf32>
    %354 = vector.extract_strided_slice %336 {offsets = [0, 16], sizes = [8, 8], strides = [1, 1]} : vector<8x24xf32> to vector<8x8xf32>
    %355 = vector.broadcast %1 : vector<1x8xf32> to vector<8x8xf32>
    %356 = arith.addf %354, %355 : vector<8x8xf32>
    %357 = arith.mulf %344, %356 : vector<8x8xf32>
    %358 = arith.addf %353, %357 : vector<8x8xf32>
    %359 = math.tanh %358 : vector<8x8xf32>
    %cst_76 = arith.constant 1.000000e+00 : f32
    %360 = vector.broadcast %cst_76 : f32 to vector<8x8xf32>
    %361 = arith.subf %360, %352 : vector<8x8xf32>
    %362 = arith.mulf %361, %359 : vector<8x8xf32>
    %363 = arith.mulf %352, %284 : vector<8x8xf32>
    %364 = arith.addf %362, %363 : vector<8x8xf32>
    %365 = vector.extract_strided_slice %327 {offsets = [0, 24], sizes = [8, 24], strides = [1, 1]} : vector<8x48xf32> to vector<8x24xf32>
    %366 = vector.extract_strided_slice %335 {offsets = [0, 0], sizes = [8, 8], strides = [1, 1]} : vector<8x24xf32> to vector<8x8xf32>
    %367 = vector.extract_strided_slice %365 {offsets = [0, 0], sizes = [8, 8], strides = [1, 1]} : vector<8x24xf32> to vector<8x8xf32>
    %368 = arith.addf %366, %367 : vector<8x8xf32>
    %369 = arith.negf %368 : vector<8x8xf32>
    %370 = math.exp %369 : vector<8x8xf32>
    %cst_77 = arith.constant 1.000000e+00 : f32
    %371 = vector.broadcast %cst_77 : f32 to vector<8x8xf32>
    %372 = arith.addf %371, %370 : vector<8x8xf32>
    %373 = arith.divf %371, %372 : vector<8x8xf32>
    %374 = vector.extract_strided_slice %335 {offsets = [0, 8], sizes = [8, 8], strides = [1, 1]} : vector<8x24xf32> to vector<8x8xf32>
    %375 = vector.extract_strided_slice %365 {offsets = [0, 8], sizes = [8, 8], strides = [1, 1]} : vector<8x24xf32> to vector<8x8xf32>
    %376 = arith.addf %374, %375 : vector<8x8xf32>
    %377 = arith.negf %376 : vector<8x8xf32>
    %378 = math.exp %377 : vector<8x8xf32>
    %cst_78 = arith.constant 1.000000e+00 : f32
    %379 = vector.broadcast %cst_78 : f32 to vector<8x8xf32>
    %380 = arith.addf %379, %378 : vector<8x8xf32>
    %381 = arith.divf %379, %380 : vector<8x8xf32>
    %382 = vector.extract_strided_slice %335 {offsets = [0, 16], sizes = [8, 8], strides = [1, 1]} : vector<8x24xf32> to vector<8x8xf32>
    %383 = vector.extract_strided_slice %365 {offsets = [0, 16], sizes = [8, 8], strides = [1, 1]} : vector<8x24xf32> to vector<8x8xf32>
    %384 = vector.broadcast %2 : vector<1x8xf32> to vector<8x8xf32>
    %385 = arith.addf %383, %384 : vector<8x8xf32>
    %386 = arith.mulf %373, %385 : vector<8x8xf32>
    %387 = arith.addf %382, %386 : vector<8x8xf32>
    %388 = math.tanh %387 : vector<8x8xf32>
    %cst_79 = arith.constant 1.000000e+00 : f32
    %389 = vector.broadcast %cst_79 : f32 to vector<8x8xf32>
    %390 = arith.subf %389, %381 : vector<8x8xf32>
    %391 = arith.mulf %390, %388 : vector<8x8xf32>
    %392 = arith.mulf %381, %313 : vector<8x8xf32>
    %393 = arith.addf %391, %392 : vector<8x8xf32>
    %394 = arith.truncf %364 : vector<8x8xf32> to vector<8x8xbf16>
    %395 = arith.index_cast %c4_i32 : i32 to index
    %c0_80 = arith.constant 0 : index
    %c0_81 = arith.constant 0 : index
    %396 = vector.load %arg6[%395, %c0_80, %c0_81] : memref<8x8x8xbf16, #tpu.memory_space<vmem>>, vector<1x8x8xbf16>
    %397 = vector.shape_cast %396 : vector<1x8x8xbf16> to vector<8x8xbf16>
    %398 = vector.shape_cast %394 : vector<8x8xbf16> to vector<1x8x8xbf16>
    tpu.vector_store %arg6[%395, %c0_80, %c0_81], %398 {strides = array<i32>} : memref<8x8x8xbf16, #tpu.memory_space<vmem>>, vector<1x8x8xbf16>,
    %399 = arith.truncf %393 : vector<8x8xf32> to vector<8x8xbf16>
    %400 = arith.index_cast %324 : i32 to index
    %c0_82 = arith.constant 0 : index
    %c0_83 = arith.constant 0 : index
    %401 = vector.load %arg7[%400, %c0_82, %c0_83] : memref<8x8x8xbf16, #tpu.memory_space<vmem>>, vector<1x8x8xbf16>
    %402 = vector.shape_cast %401 : vector<1x8x8xbf16> to vector<8x8xbf16>
    %403 = vector.shape_cast %399 : vector<8x8xbf16> to vector<1x8x8xbf16>
    tpu.vector_store %arg7[%400, %c0_82, %c0_83], %403 {strides = array<i32>} : memref<8x8x8xbf16, #tpu.memory_space<vmem>>, vector<1x8x8xbf16>,
    %c5_i32 = arith.constant 5 : i32
    %c7_i32_84 = arith.constant 7 : i32
    %404 = arith.subi %c7_i32_84, %c5_i32 : i32
    %405 = tpu.concatenate %364, %393 in 1 : vector<8x8xf32>, vector<8x8xf32> -> vector<8x16xf32>
    %406 = arith.truncf %405 : vector<8x16xf32> to vector<8x16xbf16>
    %cst_85 = arith.constant dense<0.000000e+00> : vector<8x48xf32>
    %407 = tpu.matmul %406, %0, %cst_85 {dimension_numbers = #tpu.dot_dimension_numbers<[1], [0], [0], [1], [0, 0, 1, 1], [], []>} : vector<8x16xbf16>, vector<16x48xbf16>, vector<8x48xf32> -> vector<8x48xf32>
    %408 = arith.index_cast %c5_i32 : i32 to index
    %c0_86 = arith.constant 0 : index
    %c0_87 = arith.constant 0 : index
    %409 = vector.load %arg1[%408, %c0_86, %c0_87] : memref<8x8x24xbf16, #tpu.memory_space<vmem>>, vector<1x8x24xbf16>
    %410 = vector.shape_cast %409 : vector<1x8x24xbf16> to vector<8x24xbf16>
    %411 = arith.extf %410 : vector<8x24xbf16> to vector<8x24xf32>
    %412 = arith.index_cast %404 : i32 to index
    %c0_88 = arith.constant 0 : index
    %c0_89 = arith.constant 0 : index
    %413 = vector.load %arg2[%412, %c0_88, %c0_89] : memref<8x8x24xbf16, #tpu.memory_space<vmem>>, vector<1x8x24xbf16>
    %414 = vector.shape_cast %413 : vector<1x8x24xbf16> to vector<8x24xbf16>
    %415 = arith.extf %414 : vector<8x24xbf16> to vector<8x24xf32>
    %416 = vector.extract_strided_slice %407 {offsets = [0, 0], sizes = [8, 24], strides = [1, 1]} : vector<8x48xf32> to vector<8x24xf32>
    %417 = vector.extract_strided_slice %411 {offsets = [0, 0], sizes = [8, 8], strides = [1, 1]} : vector<8x24xf32> to vector<8x8xf32>
    %418 = vector.extract_strided_slice %416 {offsets = [0, 0], sizes = [8, 8], strides = [1, 1]} : vector<8x24xf32> to vector<8x8xf32>
    %419 = arith.addf %417, %418 : vector<8x8xf32>
    %420 = arith.negf %419 : vector<8x8xf32>
    %421 = math.exp %420 : vector<8x8xf32>
    %cst_90 = arith.constant 1.000000e+00 : f32
    %422 = vector.broadcast %cst_90 : f32 to vector<8x8xf32>
    %423 = arith.addf %422, %421 : vector<8x8xf32>
    %424 = arith.divf %422, %423 : vector<8x8xf32>
    %425 = vector.extract_strided_slice %411 {offsets = [0, 8], sizes = [8, 8], strides = [1, 1]} : vector<8x24xf32> to vector<8x8xf32>
    %426 = vector.extract_strided_slice %416 {offsets = [0, 8], sizes = [8, 8], strides = [1, 1]} : vector<8x24xf32> to vector<8x8xf32>
    %427 = arith.addf %425, %426 : vector<8x8xf32>
    %428 = arith.negf %427 : vector<8x8xf32>
    %429 = math.exp %428 : vector<8x8xf32>
    %cst_91 = arith.constant 1.000000e+00 : f32
    %430 = vector.broadcast %cst_91 : f32 to vector<8x8xf32>
    %431 = arith.addf %430, %429 : vector<8x8xf32>
    %432 = arith.divf %430, %431 : vector<8x8xf32>
    %433 = vector.extract_strided_slice %411 {offsets = [0, 16], sizes = [8, 8], strides = [1, 1]} : vector<8x24xf32> to vector<8x8xf32>
    %434 = vector.extract_strided_slice %416 {offsets = [0, 16], sizes = [8, 8], strides = [1, 1]} : vector<8x24xf32> to vector<8x8xf32>
    %435 = vector.broadcast %1 : vector<1x8xf32> to vector<8x8xf32>
    %436 = arith.addf %434, %435 : vector<8x8xf32>
    %437 = arith.mulf %424, %436 : vector<8x8xf32>
    %438 = arith.addf %433, %437 : vector<8x8xf32>
    %439 = math.tanh %438 : vector<8x8xf32>
    %cst_92 = arith.constant 1.000000e+00 : f32
    %440 = vector.broadcast %cst_92 : f32 to vector<8x8xf32>
    %441 = arith.subf %440, %432 : vector<8x8xf32>
    %442 = arith.mulf %441, %439 : vector<8x8xf32>
    %443 = arith.mulf %432, %364 : vector<8x8xf32>
    %444 = arith.addf %442, %443 : vector<8x8xf32>
    %445 = vector.extract_strided_slice %407 {offsets = [0, 24], sizes = [8, 24], strides = [1, 1]} : vector<8x48xf32> to vector<8x24xf32>
    %446 = vector.extract_strided_slice %415 {offsets = [0, 0], sizes = [8, 8], strides = [1, 1]} : vector<8x24xf32> to vector<8x8xf32>
    %447 = vector.extract_strided_slice %445 {offsets = [0, 0], sizes = [8, 8], strides = [1, 1]} : vector<8x24xf32> to vector<8x8xf32>
    %448 = arith.addf %446, %447 : vector<8x8xf32>
    %449 = arith.negf %448 : vector<8x8xf32>
    %450 = math.exp %449 : vector<8x8xf32>
    %cst_93 = arith.constant 1.000000e+00 : f32
    %451 = vector.broadcast %cst_93 : f32 to vector<8x8xf32>
    %452 = arith.addf %451, %450 : vector<8x8xf32>
    %453 = arith.divf %451, %452 : vector<8x8xf32>
    %454 = vector.extract_strided_slice %415 {offsets = [0, 8], sizes = [8, 8], strides = [1, 1]} : vector<8x24xf32> to vector<8x8xf32>
    %455 = vector.extract_strided_slice %445 {offsets = [0, 8], sizes = [8, 8], strides = [1, 1]} : vector<8x24xf32> to vector<8x8xf32>
    %456 = arith.addf %454, %455 : vector<8x8xf32>
    %457 = arith.negf %456 : vector<8x8xf32>
    %458 = math.exp %457 : vector<8x8xf32>
    %cst_94 = arith.constant 1.000000e+00 : f32
    %459 = vector.broadcast %cst_94 : f32 to vector<8x8xf32>
    %460 = arith.addf %459, %458 : vector<8x8xf32>
    %461 = arith.divf %459, %460 : vector<8x8xf32>
    %462 = vector.extract_strided_slice %415 {offsets = [0, 16], sizes = [8, 8], strides = [1, 1]} : vector<8x24xf32> to vector<8x8xf32>
    %463 = vector.extract_strided_slice %445 {offsets = [0, 16], sizes = [8, 8], strides = [1, 1]} : vector<8x24xf32> to vector<8x8xf32>
    %464 = vector.broadcast %2 : vector<1x8xf32> to vector<8x8xf32>
    %465 = arith.addf %463, %464 : vector<8x8xf32>
    %466 = arith.mulf %453, %465 : vector<8x8xf32>
    %467 = arith.addf %462, %466 : vector<8x8xf32>
    %468 = math.tanh %467 : vector<8x8xf32>
    %cst_95 = arith.constant 1.000000e+00 : f32
    %469 = vector.broadcast %cst_95 : f32 to vector<8x8xf32>
    %470 = arith.subf %469, %461 : vector<8x8xf32>
    %471 = arith.mulf %470, %468 : vector<8x8xf32>
    %472 = arith.mulf %461, %393 : vector<8x8xf32>
    %473 = arith.addf %471, %472 : vector<8x8xf32>
    %474 = arith.truncf %444 : vector<8x8xf32> to vector<8x8xbf16>
    %475 = arith.index_cast %c5_i32 : i32 to index
    %c0_96 = arith.constant 0 : index
    %c0_97 = arith.constant 0 : index
    %476 = vector.load %arg6[%475, %c0_96, %c0_97] : memref<8x8x8xbf16, #tpu.memory_space<vmem>>, vector<1x8x8xbf16>
    %477 = vector.shape_cast %476 : vector<1x8x8xbf16> to vector<8x8xbf16>
    %478 = vector.shape_cast %474 : vector<8x8xbf16> to vector<1x8x8xbf16>
    tpu.vector_store %arg6[%475, %c0_96, %c0_97], %478 {strides = array<i32>} : memref<8x8x8xbf16, #tpu.memory_space<vmem>>, vector<1x8x8xbf16>,
    %479 = arith.truncf %473 : vector<8x8xf32> to vector<8x8xbf16>
    %480 = arith.index_cast %404 : i32 to index
    %c0_98 = arith.constant 0 : index
    %c0_99 = arith.constant 0 : index
    %481 = vector.load %arg7[%480, %c0_98, %c0_99] : memref<8x8x8xbf16, #tpu.memory_space<vmem>>, vector<1x8x8xbf16>
    %482 = vector.shape_cast %481 : vector<1x8x8xbf16> to vector<8x8xbf16>
    %483 = vector.shape_cast %479 : vector<8x8xbf16> to vector<1x8x8xbf16>
    tpu.vector_store %arg7[%480, %c0_98, %c0_99], %483 {strides = array<i32>} : memref<8x8x8xbf16, #tpu.memory_space<vmem>>, vector<1x8x8xbf16>,
    %c6_i32 = arith.constant 6 : i32
    %c7_i32_100 = arith.constant 7 : i32
    %484 = arith.subi %c7_i32_100, %c6_i32 : i32
    %485 = tpu.concatenate %444, %473 in 1 : vector<8x8xf32>, vector<8x8xf32> -> vector<8x16xf32>
    %486 = arith.truncf %485 : vector<8x16xf32> to vector<8x16xbf16>
    %cst_101 = arith.constant dense<0.000000e+00> : vector<8x48xf32>
    %487 = tpu.matmul %486, %0, %cst_101 {dimension_numbers = #tpu.dot_dimension_numbers<[1], [0], [0], [1], [0, 0, 1, 1], [], []>} : vector<8x16xbf16>, vector<16x48xbf16>, vector<8x48xf32> -> vector<8x48xf32>
    %488 = arith.index_cast %c6_i32 : i32 to index
    %c0_102 = arith.constant 0 : index
    %c0_103 = arith.constant 0 : index
    %489 = vector.load %arg1[%488, %c0_102, %c0_103] : memref<8x8x24xbf16, #tpu.memory_space<vmem>>, vector<1x8x24xbf16>
    %490 = vector.shape_cast %489 : vector<1x8x24xbf16> to vector<8x24xbf16>
    %491 = arith.extf %490 : vector<8x24xbf16> to vector<8x24xf32>
    %492 = arith.index_cast %484 : i32 to index
    %c0_104 = arith.constant 0 : index
    %c0_105 = arith.constant 0 : index
    %493 = vector.load %arg2[%492, %c0_104, %c0_105] : memref<8x8x24xbf16, #tpu.memory_space<vmem>>, vector<1x8x24xbf16>
    %494 = vector.shape_cast %493 : vector<1x8x24xbf16> to vector<8x24xbf16>
    %495 = arith.extf %494 : vector<8x24xbf16> to vector<8x24xf32>
    %496 = vector.extract_strided_slice %487 {offsets = [0, 0], sizes = [8, 24], strides = [1, 1]} : vector<8x48xf32> to vector<8x24xf32>
    %497 = vector.extract_strided_slice %491 {offsets = [0, 0], sizes = [8, 8], strides = [1, 1]} : vector<8x24xf32> to vector<8x8xf32>
    %498 = vector.extract_strided_slice %496 {offsets = [0, 0], sizes = [8, 8], strides = [1, 1]} : vector<8x24xf32> to vector<8x8xf32>
    %499 = arith.addf %497, %498 : vector<8x8xf32>
    %500 = arith.negf %499 : vector<8x8xf32>
    %501 = math.exp %500 : vector<8x8xf32>
    %cst_106 = arith.constant 1.000000e+00 : f32
    %502 = vector.broadcast %cst_106 : f32 to vector<8x8xf32>
    %503 = arith.addf %502, %501 : vector<8x8xf32>
    %504 = arith.divf %502, %503 : vector<8x8xf32>
    %505 = vector.extract_strided_slice %491 {offsets = [0, 8], sizes = [8, 8], strides = [1, 1]} : vector<8x24xf32> to vector<8x8xf32>
    %506 = vector.extract_strided_slice %496 {offsets = [0, 8], sizes = [8, 8], strides = [1, 1]} : vector<8x24xf32> to vector<8x8xf32>
    %507 = arith.addf %505, %506 : vector<8x8xf32>
    %508 = arith.negf %507 : vector<8x8xf32>
    %509 = math.exp %508 : vector<8x8xf32>
    %cst_107 = arith.constant 1.000000e+00 : f32
    %510 = vector.broadcast %cst_107 : f32 to vector<8x8xf32>
    %511 = arith.addf %510, %509 : vector<8x8xf32>
    %512 = arith.divf %510, %511 : vector<8x8xf32>
    %513 = vector.extract_strided_slice %491 {offsets = [0, 16], sizes = [8, 8], strides = [1, 1]} : vector<8x24xf32> to vector<8x8xf32>
    %514 = vector.extract_strided_slice %496 {offsets = [0, 16], sizes = [8, 8], strides = [1, 1]} : vector<8x24xf32> to vector<8x8xf32>
    %515 = vector.broadcast %1 : vector<1x8xf32> to vector<8x8xf32>
    %516 = arith.addf %514, %515 : vector<8x8xf32>
    %517 = arith.mulf %504, %516 : vector<8x8xf32>
    %518 = arith.addf %513, %517 : vector<8x8xf32>
    %519 = math.tanh %518 : vector<8x8xf32>
    %cst_108 = arith.constant 1.000000e+00 : f32
    %520 = vector.broadcast %cst_108 : f32 to vector<8x8xf32>
    %521 = arith.subf %520, %512 : vector<8x8xf32>
    %522 = arith.mulf %521, %519 : vector<8x8xf32>
    %523 = arith.mulf %512, %444 : vector<8x8xf32>
    %524 = arith.addf %522, %523 : vector<8x8xf32>
    %525 = vector.extract_strided_slice %487 {offsets = [0, 24], sizes = [8, 24], strides = [1, 1]} : vector<8x48xf32> to vector<8x24xf32>
    %526 = vector.extract_strided_slice %495 {offsets = [0, 0], sizes = [8, 8], strides = [1, 1]} : vector<8x24xf32> to vector<8x8xf32>
    %527 = vector.extract_strided_slice %525 {offsets = [0, 0], sizes = [8, 8], strides = [1, 1]} : vector<8x24xf32> to vector<8x8xf32>
    %528 = arith.addf %526, %527 : vector<8x8xf32>
    %529 = arith.negf %528 : vector<8x8xf32>
    %530 = math.exp %529 : vector<8x8xf32>
    %cst_109 = arith.constant 1.000000e+00 : f32
    %531 = vector.broadcast %cst_109 : f32 to vector<8x8xf32>
    %532 = arith.addf %531, %530 : vector<8x8xf32>
    %533 = arith.divf %531, %532 : vector<8x8xf32>
    %534 = vector.extract_strided_slice %495 {offsets = [0, 8], sizes = [8, 8], strides = [1, 1]} : vector<8x24xf32> to vector<8x8xf32>
    %535 = vector.extract_strided_slice %525 {offsets = [0, 8], sizes = [8, 8], strides = [1, 1]} : vector<8x24xf32> to vector<8x8xf32>
    %536 = arith.addf %534, %535 : vector<8x8xf32>
    %537 = arith.negf %536 : vector<8x8xf32>
    %538 = math.exp %537 : vector<8x8xf32>
    %cst_110 = arith.constant 1.000000e+00 : f32
    %539 = vector.broadcast %cst_110 : f32 to vector<8x8xf32>
    %540 = arith.addf %539, %538 : vector<8x8xf32>
    %541 = arith.divf %539, %540 : vector<8x8xf32>
    %542 = vector.extract_strided_slice %495 {offsets = [0, 16], sizes = [8, 8], strides = [1, 1]} : vector<8x24xf32> to vector<8x8xf32>
    %543 = vector.extract_strided_slice %525 {offsets = [0, 16], sizes = [8, 8], strides = [1, 1]} : vector<8x24xf32> to vector<8x8xf32>
    %544 = vector.broadcast %2 : vector<1x8xf32> to vector<8x8xf32>
    %545 = arith.addf %543, %544 : vector<8x8xf32>
    %546 = arith.mulf %533, %545 : vector<8x8xf32>
    %547 = arith.addf %542, %546 : vector<8x8xf32>
    %548 = math.tanh %547 : vector<8x8xf32>
    %cst_111 = arith.constant 1.000000e+00 : f32
    %549 = vector.broadcast %cst_111 : f32 to vector<8x8xf32>
    %550 = arith.subf %549, %541 : vector<8x8xf32>
    %551 = arith.mulf %550, %548 : vector<8x8xf32>
    %552 = arith.mulf %541, %473 : vector<8x8xf32>
    %553 = arith.addf %551, %552 : vector<8x8xf32>
    %554 = arith.truncf %524 : vector<8x8xf32> to vector<8x8xbf16>
    %555 = arith.index_cast %c6_i32 : i32 to index
    %c0_112 = arith.constant 0 : index
    %c0_113 = arith.constant 0 : index
    %556 = vector.load %arg6[%555, %c0_112, %c0_113] : memref<8x8x8xbf16, #tpu.memory_space<vmem>>, vector<1x8x8xbf16>
    %557 = vector.shape_cast %556 : vector<1x8x8xbf16> to vector<8x8xbf16>
    %558 = vector.shape_cast %554 : vector<8x8xbf16> to vector<1x8x8xbf16>
    tpu.vector_store %arg6[%555, %c0_112, %c0_113], %558 {strides = array<i32>} : memref<8x8x8xbf16, #tpu.memory_space<vmem>>, vector<1x8x8xbf16>,
    %559 = arith.truncf %553 : vector<8x8xf32> to vector<8x8xbf16>
    %560 = arith.index_cast %484 : i32 to index
    %c0_114 = arith.constant 0 : index
    %c0_115 = arith.constant 0 : index
    %561 = vector.load %arg7[%560, %c0_114, %c0_115] : memref<8x8x8xbf16, #tpu.memory_space<vmem>>, vector<1x8x8xbf16>
    %562 = vector.shape_cast %561 : vector<1x8x8xbf16> to vector<8x8xbf16>
    %563 = vector.shape_cast %559 : vector<8x8xbf16> to vector<1x8x8xbf16>
    tpu.vector_store %arg7[%560, %c0_114, %c0_115], %563 {strides = array<i32>} : memref<8x8x8xbf16, #tpu.memory_space<vmem>>, vector<1x8x8xbf16>,
    %c7_i32_116 = arith.constant 7 : i32
    %c7_i32_117 = arith.constant 7 : i32
    %564 = arith.subi %c7_i32_117, %c7_i32_116 : i32
    %565 = tpu.concatenate %524, %553 in 1 : vector<8x8xf32>, vector<8x8xf32> -> vector<8x16xf32>
    %566 = arith.truncf %565 : vector<8x16xf32> to vector<8x16xbf16>
    %cst_118 = arith.constant dense<0.000000e+00> : vector<8x48xf32>
    %567 = tpu.matmul %566, %0, %cst_118 {dimension_numbers = #tpu.dot_dimension_numbers<[1], [0], [0], [1], [0, 0, 1, 1], [], []>} : vector<8x16xbf16>, vector<16x48xbf16>, vector<8x48xf32> -> vector<8x48xf32>
    %568 = arith.index_cast %c7_i32_116 : i32 to index
    %c0_119 = arith.constant 0 : index
    %c0_120 = arith.constant 0 : index
    %569 = vector.load %arg1[%568, %c0_119, %c0_120] : memref<8x8x24xbf16, #tpu.memory_space<vmem>>, vector<1x8x24xbf16>
    %570 = vector.shape_cast %569 : vector<1x8x24xbf16> to vector<8x24xbf16>
    %571 = arith.extf %570 : vector<8x24xbf16> to vector<8x24xf32>
    %572 = arith.index_cast %564 : i32 to index
    %c0_121 = arith.constant 0 : index
    %c0_122 = arith.constant 0 : index
    %573 = vector.load %arg2[%572, %c0_121, %c0_122] : memref<8x8x24xbf16, #tpu.memory_space<vmem>>, vector<1x8x24xbf16>
    %574 = vector.shape_cast %573 : vector<1x8x24xbf16> to vector<8x24xbf16>
    %575 = arith.extf %574 : vector<8x24xbf16> to vector<8x24xf32>
    %576 = vector.extract_strided_slice %567 {offsets = [0, 0], sizes = [8, 24], strides = [1, 1]} : vector<8x48xf32> to vector<8x24xf32>
    %577 = vector.extract_strided_slice %571 {offsets = [0, 0], sizes = [8, 8], strides = [1, 1]} : vector<8x24xf32> to vector<8x8xf32>
    %578 = vector.extract_strided_slice %576 {offsets = [0, 0], sizes = [8, 8], strides = [1, 1]} : vector<8x24xf32> to vector<8x8xf32>
    %579 = arith.addf %577, %578 : vector<8x8xf32>
    %580 = arith.negf %579 : vector<8x8xf32>
    %581 = math.exp %580 : vector<8x8xf32>
    %cst_123 = arith.constant 1.000000e+00 : f32
    %582 = vector.broadcast %cst_123 : f32 to vector<8x8xf32>
    %583 = arith.addf %582, %581 : vector<8x8xf32>
    %584 = arith.divf %582, %583 : vector<8x8xf32>
    %585 = vector.extract_strided_slice %571 {offsets = [0, 8], sizes = [8, 8], strides = [1, 1]} : vector<8x24xf32> to vector<8x8xf32>
    %586 = vector.extract_strided_slice %576 {offsets = [0, 8], sizes = [8, 8], strides = [1, 1]} : vector<8x24xf32> to vector<8x8xf32>
    %587 = arith.addf %585, %586 : vector<8x8xf32>
    %588 = arith.negf %587 : vector<8x8xf32>
    %589 = math.exp %588 : vector<8x8xf32>
    %cst_124 = arith.constant 1.000000e+00 : f32
    %590 = vector.broadcast %cst_124 : f32 to vector<8x8xf32>
    %591 = arith.addf %590, %589 : vector<8x8xf32>
    %592 = arith.divf %590, %591 : vector<8x8xf32>
    %593 = vector.extract_strided_slice %571 {offsets = [0, 16], sizes = [8, 8], strides = [1, 1]} : vector<8x24xf32> to vector<8x8xf32>
    %594 = vector.extract_strided_slice %576 {offsets = [0, 16], sizes = [8, 8], strides = [1, 1]} : vector<8x24xf32> to vector<8x8xf32>
    %595 = vector.broadcast %1 : vector<1x8xf32> to vector<8x8xf32>
    %596 = arith.addf %594, %595 : vector<8x8xf32>
    %597 = arith.mulf %584, %596 : vector<8x8xf32>
    %598 = arith.addf %593, %597 : vector<8x8xf32>
    %599 = math.tanh %598 : vector<8x8xf32>
    %cst_125 = arith.constant 1.000000e+00 : f32
    %600 = vector.broadcast %cst_125 : f32 to vector<8x8xf32>
    %601 = arith.subf %600, %592 : vector<8x8xf32>
    %602 = arith.mulf %601, %599 : vector<8x8xf32>
    %603 = arith.mulf %592, %524 : vector<8x8xf32>
    %604 = arith.addf %602, %603 : vector<8x8xf32>
    %605 = vector.extract_strided_slice %567 {offsets = [0, 24], sizes = [8, 24], strides = [1, 1]} : vector<8x48xf32> to vector<8x24xf32>
    %606 = vector.extract_strided_slice %575 {offsets = [0, 0], sizes = [8, 8], strides = [1, 1]} : vector<8x24xf32> to vector<8x8xf32>
    %607 = vector.extract_strided_slice %605 {offsets = [0, 0], sizes = [8, 8], strides = [1, 1]} : vector<8x24xf32> to vector<8x8xf32>
    %608 = arith.addf %606, %607 : vector<8x8xf32>
    %609 = arith.negf %608 : vector<8x8xf32>
    %610 = math.exp %609 : vector<8x8xf32>
    %cst_126 = arith.constant 1.000000e+00 : f32
    %611 = vector.broadcast %cst_126 : f32 to vector<8x8xf32>
    %612 = arith.addf %611, %610 : vector<8x8xf32>
    %613 = arith.divf %611, %612 : vector<8x8xf32>
    %614 = vector.extract_strided_slice %575 {offsets = [0, 8], sizes = [8, 8], strides = [1, 1]} : vector<8x24xf32> to vector<8x8xf32>
    %615 = vector.extract_strided_slice %605 {offsets = [0, 8], sizes = [8, 8], strides = [1, 1]} : vector<8x24xf32> to vector<8x8xf32>
    %616 = arith.addf %614, %615 : vector<8x8xf32>
    %617 = arith.negf %616 : vector<8x8xf32>
    %618 = math.exp %617 : vector<8x8xf32>
    %cst_127 = arith.constant 1.000000e+00 : f32
    %619 = vector.broadcast %cst_127 : f32 to vector<8x8xf32>
    %620 = arith.addf %619, %618 : vector<8x8xf32>
    %621 = arith.divf %619, %620 : vector<8x8xf32>
    %622 = vector.extract_strided_slice %575 {offsets = [0, 16], sizes = [8, 8], strides = [1, 1]} : vector<8x24xf32> to vector<8x8xf32>
    %623 = vector.extract_strided_slice %605 {offsets = [0, 16], sizes = [8, 8], strides = [1, 1]} : vector<8x24xf32> to vector<8x8xf32>
    %624 = vector.broadcast %2 : vector<1x8xf32> to vector<8x8xf32>
    %625 = arith.addf %623, %624 : vector<8x8xf32>
    %626 = arith.mulf %613, %625 : vector<8x8xf32>
    %627 = arith.addf %622, %626 : vector<8x8xf32>
    %628 = math.tanh %627 : vector<8x8xf32>
    %cst_128 = arith.constant 1.000000e+00 : f32
    %629 = vector.broadcast %cst_128 : f32 to vector<8x8xf32>
    %630 = arith.subf %629, %621 : vector<8x8xf32>
    %631 = arith.mulf %630, %628 : vector<8x8xf32>
    %632 = arith.mulf %621, %553 : vector<8x8xf32>
    %633 = arith.addf %631, %632 : vector<8x8xf32>
    %634 = arith.truncf %604 : vector<8x8xf32> to vector<8x8xbf16>
    %635 = arith.index_cast %c7_i32_116 : i32 to index
    %c0_129 = arith.constant 0 : index
    %c0_130 = arith.constant 0 : index
    %636 = vector.load %arg6[%635, %c0_129, %c0_130] : memref<8x8x8xbf16, #tpu.memory_space<vmem>>, vector<1x8x8xbf16>
    %637 = vector.shape_cast %636 : vector<1x8x8xbf16> to vector<8x8xbf16>
    %638 = vector.shape_cast %634 : vector<8x8xbf16> to vector<1x8x8xbf16>
    tpu.vector_store %arg6[%635, %c0_129, %c0_130], %638 {strides = array<i32>} : memref<8x8x8xbf16, #tpu.memory_space<vmem>>, vector<1x8x8xbf16>,
    %639 = arith.truncf %633 : vector<8x8xf32> to vector<8x8xbf16>
    %640 = arith.index_cast %564 : i32 to index
    %c0_131 = arith.constant 0 : index
    %c0_132 = arith.constant 0 : index
    %641 = vector.load %arg7[%640, %c0_131, %c0_132] : memref<8x8x8xbf16, #tpu.memory_space<vmem>>, vector<1x8x8xbf16>
    %642 = vector.shape_cast %641 : vector<1x8x8xbf16> to vector<8x8xbf16>
    %643 = vector.shape_cast %639 : vector<8x8xbf16> to vector<1x8x8xbf16>
    tpu.vector_store %arg7[%640, %c0_131, %c0_132], %643 {strides = array<i32>} : memref<8x8x8xbf16, #tpu.memory_space<vmem>>, vector<1x8x8xbf16>,
    %c8_i32 = arith.constant 8 : i32
    return
  }
  func.func @transform_0(%arg0: i32) -> (i32, i32, i32) {
    %c0_i32 = arith.constant 0 : i32
    %c0_i32_0 = arith.constant 0 : i32
    %c0_i32_1 = arith.constant 0 : i32
    return %c0_i32, %arg0, %c0_i32_0 : i32, i32, i32
  }
  func.func @transform_1(%arg0: i32) -> (i32, i32, i32) {
    %c0_i32 = arith.constant 0 : i32
    %c0_i32_0 = arith.constant 0 : i32
    %c0_i32_1 = arith.constant 0 : i32
    return %c0_i32, %arg0, %c0_i32_0 : i32, i32, i32
  }
  func.func @transform_2(%arg0: i32) -> (i32, i32) {
    %c0_i32 = arith.constant 0 : i32
    %c0_i32_0 = arith.constant 0 : i32
    %c0_i32_1 = arith.constant 0 : i32
    return %c0_i32, %c0_i32_0 : i32, i32
  }
  func.func @transform_3(%arg0: i32) -> (i32, i32) {
    %c0_i32 = arith.constant 0 : i32
    %c0_i32_0 = arith.constant 0 : i32
    %c0_i32_1 = arith.constant 0 : i32
    return %c0_i32, %c0_i32_0 : i32, i32
  }
  func.func @transform_4(%arg0: i32) -> (i32, i32) {
    %c0_i32 = arith.constant 0 : i32
    %c0_i32_0 = arith.constant 0 : i32
    %c0_i32_1 = arith.constant 0 : i32
    return %c0_i32, %c0_i32_0 : i32, i32
  }
  func.func @transform_5(%arg0: i32) -> (i32, i32, i32) {
    %c0_i32 = arith.constant 0 : i32
    %c0_i32_0 = arith.constant 0 : i32
    %c0_i32_1 = arith.constant 0 : i32
    return %c0_i32, %arg0, %c0_i32_0 : i32, i32, i32
  }
  func.func @transform_6(%arg0: i32) -> (i32, i32, i32) {
    %c0_i32 = arith.constant 0 : i32
    %c0_i32_0 = arith.constant 0 : i32
    %c0_i32_1 = arith.constant 0 : i32
    return %c0_i32, %arg0, %c0_i32_0 : i32, i32, i32
  }
}

module attributes {stable_mosaic.version = 11 : i64} {
  func.func @_bigru_rec_kernel(%arg0: i32, %arg1: memref<8x8x24xbf16, #tpu.memory_space<vmem>>, %arg2: memref<8x8x24xbf16, #tpu.memory_space<vmem>>, %arg3: memref<16x48xbf16, #tpu.memory_space<vmem>>, %arg4: memref<1x8xf32, #tpu.memory_space<vmem>>, %arg5: memref<1x8xf32, #tpu.memory_space<vmem>>, %arg6: memref<8x8x8xf32, #tpu.memory_space<vmem>>, %arg7: memref<8x8x8xf32, #tpu.memory_space<vmem>>) attributes {dimension_semantics = [#tpu.dimension_semantics<parallel>], iteration_bounds = array<i64: 1>, scalar_prefetch = 0 : i64, scratch_operands = 0 : i64, tpu.core_type = #tpu.core_type<tc>, window_params = [{transform_indices = @transform_0, window_bounds = array<i64: 8, 8, 24>}, {transform_indices = @transform_1, window_bounds = array<i64: 8, 8, 24>}, {pipeline_mode = #tpu.pipeline_mode<synchronous>, transform_indices = @transform_2, window_bounds = array<i64: 16, 48>}, {pipeline_mode = #tpu.pipeline_mode<synchronous>, transform_indices = @transform_3, window_bounds = array<i64: 1, 8>}, {pipeline_mode = #tpu.pipeline_mode<synchronous>, transform_indices = @transform_4, window_bounds = array<i64: 1, 8>}, {transform_indices = @transform_5, window_bounds = array<i64: 8, 8, 8>}, {transform_indices = @transform_6, window_bounds = array<i64: 8, 8, 8>}]} {
    %c0 = arith.constant 0 : index
    %c0_0 = arith.constant 0 : index
    %0 = vector.load %arg3[%c0, %c0_0] : memref<16x48xbf16, #tpu.memory_space<vmem>>, vector<16x48xbf16>
    %c0_1 = arith.constant 0 : index
    %c0_2 = arith.constant 0 : index
    %1 = vector.load %arg4[%c0_1, %c0_2] : memref<1x8xf32, #tpu.memory_space<vmem>>, vector<1x8xf32>
    %c0_3 = arith.constant 0 : index
    %c0_4 = arith.constant 0 : index
    %2 = vector.load %arg5[%c0_3, %c0_4] : memref<1x8xf32, #tpu.memory_space<vmem>>, vector<1x8xf32>
    %cst = arith.constant 0.000000e+00 : f32
    %3 = vector.broadcast %cst : f32 to vector<8x8xf32>
    %c0_i32 = arith.constant 0 : i32
    %c7_i32 = arith.constant 7 : i32
    %4 = arith.subi %c7_i32, %c0_i32 : i32
    %5 = tpu.concatenate %3, %3 in 1 : vector<8x8xf32>, vector<8x8xf32> -> vector<8x16xf32>
    %6 = arith.truncf %5 : vector<8x16xf32> to vector<8x16xbf16>
    %cst_5 = arith.constant dense<0.000000e+00> : vector<8x48xf32>
    %7 = tpu.matmul %6, %0, %cst_5 {dimension_numbers = #tpu.dot_dimension_numbers<[1], [0], [0], [1], [0, 0, 1, 1], [], []>} : vector<8x16xbf16>, vector<16x48xbf16>, vector<8x48xf32> -> vector<8x48xf32>
    %8 = arith.index_cast %c0_i32 : i32 to index
    %c0_6 = arith.constant 0 : index
    %c0_7 = arith.constant 0 : index
    %9 = vector.load %arg1[%8, %c0_6, %c0_7] : memref<8x8x24xbf16, #tpu.memory_space<vmem>>, vector<1x8x24xbf16>
    %10 = vector.shape_cast %9 : vector<1x8x24xbf16> to vector<8x24xbf16>
    %11 = arith.extf %10 : vector<8x24xbf16> to vector<8x24xf32>
    %12 = arith.index_cast %4 : i32 to index
    %c0_8 = arith.constant 0 : index
    %c0_9 = arith.constant 0 : index
    %13 = vector.load %arg2[%12, %c0_8, %c0_9] : memref<8x8x24xbf16, #tpu.memory_space<vmem>>, vector<1x8x24xbf16>
    %14 = vector.shape_cast %13 : vector<1x8x24xbf16> to vector<8x24xbf16>
    %15 = arith.extf %14 : vector<8x24xbf16> to vector<8x24xf32>
    %16 = vector.extract_strided_slice %7 {offsets = [0, 0], sizes = [8, 24], strides = [1, 1]} : vector<8x48xf32> to vector<8x24xf32>
    %17 = vector.extract_strided_slice %11 {offsets = [0, 0], sizes = [8, 8], strides = [1, 1]} : vector<8x24xf32> to vector<8x8xf32>
    %18 = vector.extract_strided_slice %16 {offsets = [0, 0], sizes = [8, 8], strides = [1, 1]} : vector<8x24xf32> to vector<8x8xf32>
    %19 = arith.addf %17, %18 : vector<8x8xf32>
    %20 = arith.negf %19 : vector<8x8xf32>
    %21 = math.exp %20 : vector<8x8xf32>
    %cst_10 = arith.constant 1.000000e+00 : f32
    %22 = vector.broadcast %cst_10 : f32 to vector<8x8xf32>
    %23 = arith.addf %22, %21 : vector<8x8xf32>
    %24 = arith.divf %22, %23 : vector<8x8xf32>
    %25 = vector.extract_strided_slice %11 {offsets = [0, 8], sizes = [8, 8], strides = [1, 1]} : vector<8x24xf32> to vector<8x8xf32>
    %26 = vector.extract_strided_slice %16 {offsets = [0, 8], sizes = [8, 8], strides = [1, 1]} : vector<8x24xf32> to vector<8x8xf32>
    %27 = arith.addf %25, %26 : vector<8x8xf32>
    %28 = arith.negf %27 : vector<8x8xf32>
    %29 = math.exp %28 : vector<8x8xf32>
    %cst_11 = arith.constant 1.000000e+00 : f32
    %30 = vector.broadcast %cst_11 : f32 to vector<8x8xf32>
    %31 = arith.addf %30, %29 : vector<8x8xf32>
    %32 = arith.divf %30, %31 : vector<8x8xf32>
    %33 = vector.extract_strided_slice %11 {offsets = [0, 16], sizes = [8, 8], strides = [1, 1]} : vector<8x24xf32> to vector<8x8xf32>
    %34 = vector.extract_strided_slice %16 {offsets = [0, 16], sizes = [8, 8], strides = [1, 1]} : vector<8x24xf32> to vector<8x8xf32>
    %35 = vector.broadcast %1 : vector<1x8xf32> to vector<8x8xf32>
    %36 = arith.addf %34, %35 : vector<8x8xf32>
    %37 = arith.mulf %24, %36 : vector<8x8xf32>
    %38 = arith.addf %33, %37 : vector<8x8xf32>
    %39 = math.tanh %38 : vector<8x8xf32>
    %cst_12 = arith.constant 1.000000e+00 : f32
    %40 = vector.broadcast %cst_12 : f32 to vector<8x8xf32>
    %41 = arith.subf %40, %32 : vector<8x8xf32>
    %42 = arith.mulf %41, %39 : vector<8x8xf32>
    %43 = arith.mulf %32, %3 : vector<8x8xf32>
    %44 = arith.addf %42, %43 : vector<8x8xf32>
    %45 = vector.extract_strided_slice %7 {offsets = [0, 24], sizes = [8, 24], strides = [1, 1]} : vector<8x48xf32> to vector<8x24xf32>
    %46 = vector.extract_strided_slice %15 {offsets = [0, 0], sizes = [8, 8], strides = [1, 1]} : vector<8x24xf32> to vector<8x8xf32>
    %47 = vector.extract_strided_slice %45 {offsets = [0, 0], sizes = [8, 8], strides = [1, 1]} : vector<8x24xf32> to vector<8x8xf32>
    %48 = arith.addf %46, %47 : vector<8x8xf32>
    %49 = arith.negf %48 : vector<8x8xf32>
    %50 = math.exp %49 : vector<8x8xf32>
    %cst_13 = arith.constant 1.000000e+00 : f32
    %51 = vector.broadcast %cst_13 : f32 to vector<8x8xf32>
    %52 = arith.addf %51, %50 : vector<8x8xf32>
    %53 = arith.divf %51, %52 : vector<8x8xf32>
    %54 = vector.extract_strided_slice %15 {offsets = [0, 8], sizes = [8, 8], strides = [1, 1]} : vector<8x24xf32> to vector<8x8xf32>
    %55 = vector.extract_strided_slice %45 {offsets = [0, 8], sizes = [8, 8], strides = [1, 1]} : vector<8x24xf32> to vector<8x8xf32>
    %56 = arith.addf %54, %55 : vector<8x8xf32>
    %57 = arith.negf %56 : vector<8x8xf32>
    %58 = math.exp %57 : vector<8x8xf32>
    %cst_14 = arith.constant 1.000000e+00 : f32
    %59 = vector.broadcast %cst_14 : f32 to vector<8x8xf32>
    %60 = arith.addf %59, %58 : vector<8x8xf32>
    %61 = arith.divf %59, %60 : vector<8x8xf32>
    %62 = vector.extract_strided_slice %15 {offsets = [0, 16], sizes = [8, 8], strides = [1, 1]} : vector<8x24xf32> to vector<8x8xf32>
    %63 = vector.extract_strided_slice %45 {offsets = [0, 16], sizes = [8, 8], strides = [1, 1]} : vector<8x24xf32> to vector<8x8xf32>
    %64 = vector.broadcast %2 : vector<1x8xf32> to vector<8x8xf32>
    %65 = arith.addf %63, %64 : vector<8x8xf32>
    %66 = arith.mulf %53, %65 : vector<8x8xf32>
    %67 = arith.addf %62, %66 : vector<8x8xf32>
    %68 = math.tanh %67 : vector<8x8xf32>
    %cst_15 = arith.constant 1.000000e+00 : f32
    %69 = vector.broadcast %cst_15 : f32 to vector<8x8xf32>
    %70 = arith.subf %69, %61 : vector<8x8xf32>
    %71 = arith.mulf %70, %68 : vector<8x8xf32>
    %72 = arith.mulf %61, %3 : vector<8x8xf32>
    %73 = arith.addf %71, %72 : vector<8x8xf32>
    %74 = arith.index_cast %c0_i32 : i32 to index
    %c0_16 = arith.constant 0 : index
    %c0_17 = arith.constant 0 : index
    %75 = vector.load %arg6[%74, %c0_16, %c0_17] : memref<8x8x8xf32, #tpu.memory_space<vmem>>, vector<1x8x8xf32>
    %76 = vector.shape_cast %75 : vector<1x8x8xf32> to vector<8x8xf32>
    %77 = vector.shape_cast %44 : vector<8x8xf32> to vector<1x8x8xf32>
    tpu.vector_store %arg6[%74, %c0_16, %c0_17], %77 {strides = array<i32>} : memref<8x8x8xf32, #tpu.memory_space<vmem>>, vector<1x8x8xf32>,
    %78 = arith.index_cast %4 : i32 to index
    %c0_18 = arith.constant 0 : index
    %c0_19 = arith.constant 0 : index
    %79 = vector.load %arg7[%78, %c0_18, %c0_19] : memref<8x8x8xf32, #tpu.memory_space<vmem>>, vector<1x8x8xf32>
    %80 = vector.shape_cast %79 : vector<1x8x8xf32> to vector<8x8xf32>
    %81 = vector.shape_cast %73 : vector<8x8xf32> to vector<1x8x8xf32>
    tpu.vector_store %arg7[%78, %c0_18, %c0_19], %81 {strides = array<i32>} : memref<8x8x8xf32, #tpu.memory_space<vmem>>, vector<1x8x8xf32>,
    %c1_i32 = arith.constant 1 : i32
    %c7_i32_20 = arith.constant 7 : i32
    %82 = arith.subi %c7_i32_20, %c1_i32 : i32
    %83 = tpu.concatenate %44, %73 in 1 : vector<8x8xf32>, vector<8x8xf32> -> vector<8x16xf32>
    %84 = arith.truncf %83 : vector<8x16xf32> to vector<8x16xbf16>
    %cst_21 = arith.constant dense<0.000000e+00> : vector<8x48xf32>
    %85 = tpu.matmul %84, %0, %cst_21 {dimension_numbers = #tpu.dot_dimension_numbers<[1], [0], [0], [1], [0, 0, 1, 1], [], []>} : vector<8x16xbf16>, vector<16x48xbf16>, vector<8x48xf32> -> vector<8x48xf32>
    %86 = arith.index_cast %c1_i32 : i32 to index
    %c0_22 = arith.constant 0 : index
    %c0_23 = arith.constant 0 : index
    %87 = vector.load %arg1[%86, %c0_22, %c0_23] : memref<8x8x24xbf16, #tpu.memory_space<vmem>>, vector<1x8x24xbf16>
    %88 = vector.shape_cast %87 : vector<1x8x24xbf16> to vector<8x24xbf16>
    %89 = arith.extf %88 : vector<8x24xbf16> to vector<8x24xf32>
    %90 = arith.index_cast %82 : i32 to index
    %c0_24 = arith.constant 0 : index
    %c0_25 = arith.constant 0 : index
    %91 = vector.load %arg2[%90, %c0_24, %c0_25] : memref<8x8x24xbf16, #tpu.memory_space<vmem>>, vector<1x8x24xbf16>
    %92 = vector.shape_cast %91 : vector<1x8x24xbf16> to vector<8x24xbf16>
    %93 = arith.extf %92 : vector<8x24xbf16> to vector<8x24xf32>
    %94 = vector.extract_strided_slice %85 {offsets = [0, 0], sizes = [8, 24], strides = [1, 1]} : vector<8x48xf32> to vector<8x24xf32>
    %95 = vector.extract_strided_slice %89 {offsets = [0, 0], sizes = [8, 8], strides = [1, 1]} : vector<8x24xf32> to vector<8x8xf32>
    %96 = vector.extract_strided_slice %94 {offsets = [0, 0], sizes = [8, 8], strides = [1, 1]} : vector<8x24xf32> to vector<8x8xf32>
    %97 = arith.addf %95, %96 : vector<8x8xf32>
    %98 = arith.negf %97 : vector<8x8xf32>
    %99 = math.exp %98 : vector<8x8xf32>
    %cst_26 = arith.constant 1.000000e+00 : f32
    %100 = vector.broadcast %cst_26 : f32 to vector<8x8xf32>
    %101 = arith.addf %100, %99 : vector<8x8xf32>
    %102 = arith.divf %100, %101 : vector<8x8xf32>
    %103 = vector.extract_strided_slice %89 {offsets = [0, 8], sizes = [8, 8], strides = [1, 1]} : vector<8x24xf32> to vector<8x8xf32>
    %104 = vector.extract_strided_slice %94 {offsets = [0, 8], sizes = [8, 8], strides = [1, 1]} : vector<8x24xf32> to vector<8x8xf32>
    %105 = arith.addf %103, %104 : vector<8x8xf32>
    %106 = arith.negf %105 : vector<8x8xf32>
    %107 = math.exp %106 : vector<8x8xf32>
    %cst_27 = arith.constant 1.000000e+00 : f32
    %108 = vector.broadcast %cst_27 : f32 to vector<8x8xf32>
    %109 = arith.addf %108, %107 : vector<8x8xf32>
    %110 = arith.divf %108, %109 : vector<8x8xf32>
    %111 = vector.extract_strided_slice %89 {offsets = [0, 16], sizes = [8, 8], strides = [1, 1]} : vector<8x24xf32> to vector<8x8xf32>
    %112 = vector.extract_strided_slice %94 {offsets = [0, 16], sizes = [8, 8], strides = [1, 1]} : vector<8x24xf32> to vector<8x8xf32>
    %113 = vector.broadcast %1 : vector<1x8xf32> to vector<8x8xf32>
    %114 = arith.addf %112, %113 : vector<8x8xf32>
    %115 = arith.mulf %102, %114 : vector<8x8xf32>
    %116 = arith.addf %111, %115 : vector<8x8xf32>
    %117 = math.tanh %116 : vector<8x8xf32>
    %cst_28 = arith.constant 1.000000e+00 : f32
    %118 = vector.broadcast %cst_28 : f32 to vector<8x8xf32>
    %119 = arith.subf %118, %110 : vector<8x8xf32>
    %120 = arith.mulf %119, %117 : vector<8x8xf32>
    %121 = arith.mulf %110, %44 : vector<8x8xf32>
    %122 = arith.addf %120, %121 : vector<8x8xf32>
    %123 = vector.extract_strided_slice %85 {offsets = [0, 24], sizes = [8, 24], strides = [1, 1]} : vector<8x48xf32> to vector<8x24xf32>
    %124 = vector.extract_strided_slice %93 {offsets = [0, 0], sizes = [8, 8], strides = [1, 1]} : vector<8x24xf32> to vector<8x8xf32>
    %125 = vector.extract_strided_slice %123 {offsets = [0, 0], sizes = [8, 8], strides = [1, 1]} : vector<8x24xf32> to vector<8x8xf32>
    %126 = arith.addf %124, %125 : vector<8x8xf32>
    %127 = arith.negf %126 : vector<8x8xf32>
    %128 = math.exp %127 : vector<8x8xf32>
    %cst_29 = arith.constant 1.000000e+00 : f32
    %129 = vector.broadcast %cst_29 : f32 to vector<8x8xf32>
    %130 = arith.addf %129, %128 : vector<8x8xf32>
    %131 = arith.divf %129, %130 : vector<8x8xf32>
    %132 = vector.extract_strided_slice %93 {offsets = [0, 8], sizes = [8, 8], strides = [1, 1]} : vector<8x24xf32> to vector<8x8xf32>
    %133 = vector.extract_strided_slice %123 {offsets = [0, 8], sizes = [8, 8], strides = [1, 1]} : vector<8x24xf32> to vector<8x8xf32>
    %134 = arith.addf %132, %133 : vector<8x8xf32>
    %135 = arith.negf %134 : vector<8x8xf32>
    %136 = math.exp %135 : vector<8x8xf32>
    %cst_30 = arith.constant 1.000000e+00 : f32
    %137 = vector.broadcast %cst_30 : f32 to vector<8x8xf32>
    %138 = arith.addf %137, %136 : vector<8x8xf32>
    %139 = arith.divf %137, %138 : vector<8x8xf32>
    %140 = vector.extract_strided_slice %93 {offsets = [0, 16], sizes = [8, 8], strides = [1, 1]} : vector<8x24xf32> to vector<8x8xf32>
    %141 = vector.extract_strided_slice %123 {offsets = [0, 16], sizes = [8, 8], strides = [1, 1]} : vector<8x24xf32> to vector<8x8xf32>
    %142 = vector.broadcast %2 : vector<1x8xf32> to vector<8x8xf32>
    %143 = arith.addf %141, %142 : vector<8x8xf32>
    %144 = arith.mulf %131, %143 : vector<8x8xf32>
    %145 = arith.addf %140, %144 : vector<8x8xf32>
    %146 = math.tanh %145 : vector<8x8xf32>
    %cst_31 = arith.constant 1.000000e+00 : f32
    %147 = vector.broadcast %cst_31 : f32 to vector<8x8xf32>
    %148 = arith.subf %147, %139 : vector<8x8xf32>
    %149 = arith.mulf %148, %146 : vector<8x8xf32>
    %150 = arith.mulf %139, %73 : vector<8x8xf32>
    %151 = arith.addf %149, %150 : vector<8x8xf32>
    %152 = arith.index_cast %c1_i32 : i32 to index
    %c0_32 = arith.constant 0 : index
    %c0_33 = arith.constant 0 : index
    %153 = vector.load %arg6[%152, %c0_32, %c0_33] : memref<8x8x8xf32, #tpu.memory_space<vmem>>, vector<1x8x8xf32>
    %154 = vector.shape_cast %153 : vector<1x8x8xf32> to vector<8x8xf32>
    %155 = vector.shape_cast %122 : vector<8x8xf32> to vector<1x8x8xf32>
    tpu.vector_store %arg6[%152, %c0_32, %c0_33], %155 {strides = array<i32>} : memref<8x8x8xf32, #tpu.memory_space<vmem>>, vector<1x8x8xf32>,
    %156 = arith.index_cast %82 : i32 to index
    %c0_34 = arith.constant 0 : index
    %c0_35 = arith.constant 0 : index
    %157 = vector.load %arg7[%156, %c0_34, %c0_35] : memref<8x8x8xf32, #tpu.memory_space<vmem>>, vector<1x8x8xf32>
    %158 = vector.shape_cast %157 : vector<1x8x8xf32> to vector<8x8xf32>
    %159 = vector.shape_cast %151 : vector<8x8xf32> to vector<1x8x8xf32>
    tpu.vector_store %arg7[%156, %c0_34, %c0_35], %159 {strides = array<i32>} : memref<8x8x8xf32, #tpu.memory_space<vmem>>, vector<1x8x8xf32>,
    %c2_i32 = arith.constant 2 : i32
    %c7_i32_36 = arith.constant 7 : i32
    %160 = arith.subi %c7_i32_36, %c2_i32 : i32
    %161 = tpu.concatenate %122, %151 in 1 : vector<8x8xf32>, vector<8x8xf32> -> vector<8x16xf32>
    %162 = arith.truncf %161 : vector<8x16xf32> to vector<8x16xbf16>
    %cst_37 = arith.constant dense<0.000000e+00> : vector<8x48xf32>
    %163 = tpu.matmul %162, %0, %cst_37 {dimension_numbers = #tpu.dot_dimension_numbers<[1], [0], [0], [1], [0, 0, 1, 1], [], []>} : vector<8x16xbf16>, vector<16x48xbf16>, vector<8x48xf32> -> vector<8x48xf32>
    %164 = arith.index_cast %c2_i32 : i32 to index
    %c0_38 = arith.constant 0 : index
    %c0_39 = arith.constant 0 : index
    %165 = vector.load %arg1[%164, %c0_38, %c0_39] : memref<8x8x24xbf16, #tpu.memory_space<vmem>>, vector<1x8x24xbf16>
    %166 = vector.shape_cast %165 : vector<1x8x24xbf16> to vector<8x24xbf16>
    %167 = arith.extf %166 : vector<8x24xbf16> to vector<8x24xf32>
    %168 = arith.index_cast %160 : i32 to index
    %c0_40 = arith.constant 0 : index
    %c0_41 = arith.constant 0 : index
    %169 = vector.load %arg2[%168, %c0_40, %c0_41] : memref<8x8x24xbf16, #tpu.memory_space<vmem>>, vector<1x8x24xbf16>
    %170 = vector.shape_cast %169 : vector<1x8x24xbf16> to vector<8x24xbf16>
    %171 = arith.extf %170 : vector<8x24xbf16> to vector<8x24xf32>
    %172 = vector.extract_strided_slice %163 {offsets = [0, 0], sizes = [8, 24], strides = [1, 1]} : vector<8x48xf32> to vector<8x24xf32>
    %173 = vector.extract_strided_slice %167 {offsets = [0, 0], sizes = [8, 8], strides = [1, 1]} : vector<8x24xf32> to vector<8x8xf32>
    %174 = vector.extract_strided_slice %172 {offsets = [0, 0], sizes = [8, 8], strides = [1, 1]} : vector<8x24xf32> to vector<8x8xf32>
    %175 = arith.addf %173, %174 : vector<8x8xf32>
    %176 = arith.negf %175 : vector<8x8xf32>
    %177 = math.exp %176 : vector<8x8xf32>
    %cst_42 = arith.constant 1.000000e+00 : f32
    %178 = vector.broadcast %cst_42 : f32 to vector<8x8xf32>
    %179 = arith.addf %178, %177 : vector<8x8xf32>
    %180 = arith.divf %178, %179 : vector<8x8xf32>
    %181 = vector.extract_strided_slice %167 {offsets = [0, 8], sizes = [8, 8], strides = [1, 1]} : vector<8x24xf32> to vector<8x8xf32>
    %182 = vector.extract_strided_slice %172 {offsets = [0, 8], sizes = [8, 8], strides = [1, 1]} : vector<8x24xf32> to vector<8x8xf32>
    %183 = arith.addf %181, %182 : vector<8x8xf32>
    %184 = arith.negf %183 : vector<8x8xf32>
    %185 = math.exp %184 : vector<8x8xf32>
    %cst_43 = arith.constant 1.000000e+00 : f32
    %186 = vector.broadcast %cst_43 : f32 to vector<8x8xf32>
    %187 = arith.addf %186, %185 : vector<8x8xf32>
    %188 = arith.divf %186, %187 : vector<8x8xf32>
    %189 = vector.extract_strided_slice %167 {offsets = [0, 16], sizes = [8, 8], strides = [1, 1]} : vector<8x24xf32> to vector<8x8xf32>
    %190 = vector.extract_strided_slice %172 {offsets = [0, 16], sizes = [8, 8], strides = [1, 1]} : vector<8x24xf32> to vector<8x8xf32>
    %191 = vector.broadcast %1 : vector<1x8xf32> to vector<8x8xf32>
    %192 = arith.addf %190, %191 : vector<8x8xf32>
    %193 = arith.mulf %180, %192 : vector<8x8xf32>
    %194 = arith.addf %189, %193 : vector<8x8xf32>
    %195 = math.tanh %194 : vector<8x8xf32>
    %cst_44 = arith.constant 1.000000e+00 : f32
    %196 = vector.broadcast %cst_44 : f32 to vector<8x8xf32>
    %197 = arith.subf %196, %188 : vector<8x8xf32>
    %198 = arith.mulf %197, %195 : vector<8x8xf32>
    %199 = arith.mulf %188, %122 : vector<8x8xf32>
    %200 = arith.addf %198, %199 : vector<8x8xf32>
    %201 = vector.extract_strided_slice %163 {offsets = [0, 24], sizes = [8, 24], strides = [1, 1]} : vector<8x48xf32> to vector<8x24xf32>
    %202 = vector.extract_strided_slice %171 {offsets = [0, 0], sizes = [8, 8], strides = [1, 1]} : vector<8x24xf32> to vector<8x8xf32>
    %203 = vector.extract_strided_slice %201 {offsets = [0, 0], sizes = [8, 8], strides = [1, 1]} : vector<8x24xf32> to vector<8x8xf32>
    %204 = arith.addf %202, %203 : vector<8x8xf32>
    %205 = arith.negf %204 : vector<8x8xf32>
    %206 = math.exp %205 : vector<8x8xf32>
    %cst_45 = arith.constant 1.000000e+00 : f32
    %207 = vector.broadcast %cst_45 : f32 to vector<8x8xf32>
    %208 = arith.addf %207, %206 : vector<8x8xf32>
    %209 = arith.divf %207, %208 : vector<8x8xf32>
    %210 = vector.extract_strided_slice %171 {offsets = [0, 8], sizes = [8, 8], strides = [1, 1]} : vector<8x24xf32> to vector<8x8xf32>
    %211 = vector.extract_strided_slice %201 {offsets = [0, 8], sizes = [8, 8], strides = [1, 1]} : vector<8x24xf32> to vector<8x8xf32>
    %212 = arith.addf %210, %211 : vector<8x8xf32>
    %213 = arith.negf %212 : vector<8x8xf32>
    %214 = math.exp %213 : vector<8x8xf32>
    %cst_46 = arith.constant 1.000000e+00 : f32
    %215 = vector.broadcast %cst_46 : f32 to vector<8x8xf32>
    %216 = arith.addf %215, %214 : vector<8x8xf32>
    %217 = arith.divf %215, %216 : vector<8x8xf32>
    %218 = vector.extract_strided_slice %171 {offsets = [0, 16], sizes = [8, 8], strides = [1, 1]} : vector<8x24xf32> to vector<8x8xf32>
    %219 = vector.extract_strided_slice %201 {offsets = [0, 16], sizes = [8, 8], strides = [1, 1]} : vector<8x24xf32> to vector<8x8xf32>
    %220 = vector.broadcast %2 : vector<1x8xf32> to vector<8x8xf32>
    %221 = arith.addf %219, %220 : vector<8x8xf32>
    %222 = arith.mulf %209, %221 : vector<8x8xf32>
    %223 = arith.addf %218, %222 : vector<8x8xf32>
    %224 = math.tanh %223 : vector<8x8xf32>
    %cst_47 = arith.constant 1.000000e+00 : f32
    %225 = vector.broadcast %cst_47 : f32 to vector<8x8xf32>
    %226 = arith.subf %225, %217 : vector<8x8xf32>
    %227 = arith.mulf %226, %224 : vector<8x8xf32>
    %228 = arith.mulf %217, %151 : vector<8x8xf32>
    %229 = arith.addf %227, %228 : vector<8x8xf32>
    %230 = arith.index_cast %c2_i32 : i32 to index
    %c0_48 = arith.constant 0 : index
    %c0_49 = arith.constant 0 : index
    %231 = vector.load %arg6[%230, %c0_48, %c0_49] : memref<8x8x8xf32, #tpu.memory_space<vmem>>, vector<1x8x8xf32>
    %232 = vector.shape_cast %231 : vector<1x8x8xf32> to vector<8x8xf32>
    %233 = vector.shape_cast %200 : vector<8x8xf32> to vector<1x8x8xf32>
    tpu.vector_store %arg6[%230, %c0_48, %c0_49], %233 {strides = array<i32>} : memref<8x8x8xf32, #tpu.memory_space<vmem>>, vector<1x8x8xf32>,
    %234 = arith.index_cast %160 : i32 to index
    %c0_50 = arith.constant 0 : index
    %c0_51 = arith.constant 0 : index
    %235 = vector.load %arg7[%234, %c0_50, %c0_51] : memref<8x8x8xf32, #tpu.memory_space<vmem>>, vector<1x8x8xf32>
    %236 = vector.shape_cast %235 : vector<1x8x8xf32> to vector<8x8xf32>
    %237 = vector.shape_cast %229 : vector<8x8xf32> to vector<1x8x8xf32>
    tpu.vector_store %arg7[%234, %c0_50, %c0_51], %237 {strides = array<i32>} : memref<8x8x8xf32, #tpu.memory_space<vmem>>, vector<1x8x8xf32>,
    %c3_i32 = arith.constant 3 : i32
    %c7_i32_52 = arith.constant 7 : i32
    %238 = arith.subi %c7_i32_52, %c3_i32 : i32
    %239 = tpu.concatenate %200, %229 in 1 : vector<8x8xf32>, vector<8x8xf32> -> vector<8x16xf32>
    %240 = arith.truncf %239 : vector<8x16xf32> to vector<8x16xbf16>
    %cst_53 = arith.constant dense<0.000000e+00> : vector<8x48xf32>
    %241 = tpu.matmul %240, %0, %cst_53 {dimension_numbers = #tpu.dot_dimension_numbers<[1], [0], [0], [1], [0, 0, 1, 1], [], []>} : vector<8x16xbf16>, vector<16x48xbf16>, vector<8x48xf32> -> vector<8x48xf32>
    %242 = arith.index_cast %c3_i32 : i32 to index
    %c0_54 = arith.constant 0 : index
    %c0_55 = arith.constant 0 : index
    %243 = vector.load %arg1[%242, %c0_54, %c0_55] : memref<8x8x24xbf16, #tpu.memory_space<vmem>>, vector<1x8x24xbf16>
    %244 = vector.shape_cast %243 : vector<1x8x24xbf16> to vector<8x24xbf16>
    %245 = arith.extf %244 : vector<8x24xbf16> to vector<8x24xf32>
    %246 = arith.index_cast %238 : i32 to index
    %c0_56 = arith.constant 0 : index
    %c0_57 = arith.constant 0 : index
    %247 = vector.load %arg2[%246, %c0_56, %c0_57] : memref<8x8x24xbf16, #tpu.memory_space<vmem>>, vector<1x8x24xbf16>
    %248 = vector.shape_cast %247 : vector<1x8x24xbf16> to vector<8x24xbf16>
    %249 = arith.extf %248 : vector<8x24xbf16> to vector<8x24xf32>
    %250 = vector.extract_strided_slice %241 {offsets = [0, 0], sizes = [8, 24], strides = [1, 1]} : vector<8x48xf32> to vector<8x24xf32>
    %251 = vector.extract_strided_slice %245 {offsets = [0, 0], sizes = [8, 8], strides = [1, 1]} : vector<8x24xf32> to vector<8x8xf32>
    %252 = vector.extract_strided_slice %250 {offsets = [0, 0], sizes = [8, 8], strides = [1, 1]} : vector<8x24xf32> to vector<8x8xf32>
    %253 = arith.addf %251, %252 : vector<8x8xf32>
    %254 = arith.negf %253 : vector<8x8xf32>
    %255 = math.exp %254 : vector<8x8xf32>
    %cst_58 = arith.constant 1.000000e+00 : f32
    %256 = vector.broadcast %cst_58 : f32 to vector<8x8xf32>
    %257 = arith.addf %256, %255 : vector<8x8xf32>
    %258 = arith.divf %256, %257 : vector<8x8xf32>
    %259 = vector.extract_strided_slice %245 {offsets = [0, 8], sizes = [8, 8], strides = [1, 1]} : vector<8x24xf32> to vector<8x8xf32>
    %260 = vector.extract_strided_slice %250 {offsets = [0, 8], sizes = [8, 8], strides = [1, 1]} : vector<8x24xf32> to vector<8x8xf32>
    %261 = arith.addf %259, %260 : vector<8x8xf32>
    %262 = arith.negf %261 : vector<8x8xf32>
    %263 = math.exp %262 : vector<8x8xf32>
    %cst_59 = arith.constant 1.000000e+00 : f32
    %264 = vector.broadcast %cst_59 : f32 to vector<8x8xf32>
    %265 = arith.addf %264, %263 : vector<8x8xf32>
    %266 = arith.divf %264, %265 : vector<8x8xf32>
    %267 = vector.extract_strided_slice %245 {offsets = [0, 16], sizes = [8, 8], strides = [1, 1]} : vector<8x24xf32> to vector<8x8xf32>
    %268 = vector.extract_strided_slice %250 {offsets = [0, 16], sizes = [8, 8], strides = [1, 1]} : vector<8x24xf32> to vector<8x8xf32>
    %269 = vector.broadcast %1 : vector<1x8xf32> to vector<8x8xf32>
    %270 = arith.addf %268, %269 : vector<8x8xf32>
    %271 = arith.mulf %258, %270 : vector<8x8xf32>
    %272 = arith.addf %267, %271 : vector<8x8xf32>
    %273 = math.tanh %272 : vector<8x8xf32>
    %cst_60 = arith.constant 1.000000e+00 : f32
    %274 = vector.broadcast %cst_60 : f32 to vector<8x8xf32>
    %275 = arith.subf %274, %266 : vector<8x8xf32>
    %276 = arith.mulf %275, %273 : vector<8x8xf32>
    %277 = arith.mulf %266, %200 : vector<8x8xf32>
    %278 = arith.addf %276, %277 : vector<8x8xf32>
    %279 = vector.extract_strided_slice %241 {offsets = [0, 24], sizes = [8, 24], strides = [1, 1]} : vector<8x48xf32> to vector<8x24xf32>
    %280 = vector.extract_strided_slice %249 {offsets = [0, 0], sizes = [8, 8], strides = [1, 1]} : vector<8x24xf32> to vector<8x8xf32>
    %281 = vector.extract_strided_slice %279 {offsets = [0, 0], sizes = [8, 8], strides = [1, 1]} : vector<8x24xf32> to vector<8x8xf32>
    %282 = arith.addf %280, %281 : vector<8x8xf32>
    %283 = arith.negf %282 : vector<8x8xf32>
    %284 = math.exp %283 : vector<8x8xf32>
    %cst_61 = arith.constant 1.000000e+00 : f32
    %285 = vector.broadcast %cst_61 : f32 to vector<8x8xf32>
    %286 = arith.addf %285, %284 : vector<8x8xf32>
    %287 = arith.divf %285, %286 : vector<8x8xf32>
    %288 = vector.extract_strided_slice %249 {offsets = [0, 8], sizes = [8, 8], strides = [1, 1]} : vector<8x24xf32> to vector<8x8xf32>
    %289 = vector.extract_strided_slice %279 {offsets = [0, 8], sizes = [8, 8], strides = [1, 1]} : vector<8x24xf32> to vector<8x8xf32>
    %290 = arith.addf %288, %289 : vector<8x8xf32>
    %291 = arith.negf %290 : vector<8x8xf32>
    %292 = math.exp %291 : vector<8x8xf32>
    %cst_62 = arith.constant 1.000000e+00 : f32
    %293 = vector.broadcast %cst_62 : f32 to vector<8x8xf32>
    %294 = arith.addf %293, %292 : vector<8x8xf32>
    %295 = arith.divf %293, %294 : vector<8x8xf32>
    %296 = vector.extract_strided_slice %249 {offsets = [0, 16], sizes = [8, 8], strides = [1, 1]} : vector<8x24xf32> to vector<8x8xf32>
    %297 = vector.extract_strided_slice %279 {offsets = [0, 16], sizes = [8, 8], strides = [1, 1]} : vector<8x24xf32> to vector<8x8xf32>
    %298 = vector.broadcast %2 : vector<1x8xf32> to vector<8x8xf32>
    %299 = arith.addf %297, %298 : vector<8x8xf32>
    %300 = arith.mulf %287, %299 : vector<8x8xf32>
    %301 = arith.addf %296, %300 : vector<8x8xf32>
    %302 = math.tanh %301 : vector<8x8xf32>
    %cst_63 = arith.constant 1.000000e+00 : f32
    %303 = vector.broadcast %cst_63 : f32 to vector<8x8xf32>
    %304 = arith.subf %303, %295 : vector<8x8xf32>
    %305 = arith.mulf %304, %302 : vector<8x8xf32>
    %306 = arith.mulf %295, %229 : vector<8x8xf32>
    %307 = arith.addf %305, %306 : vector<8x8xf32>
    %308 = arith.index_cast %c3_i32 : i32 to index
    %c0_64 = arith.constant 0 : index
    %c0_65 = arith.constant 0 : index
    %309 = vector.load %arg6[%308, %c0_64, %c0_65] : memref<8x8x8xf32, #tpu.memory_space<vmem>>, vector<1x8x8xf32>
    %310 = vector.shape_cast %309 : vector<1x8x8xf32> to vector<8x8xf32>
    %311 = vector.shape_cast %278 : vector<8x8xf32> to vector<1x8x8xf32>
    tpu.vector_store %arg6[%308, %c0_64, %c0_65], %311 {strides = array<i32>} : memref<8x8x8xf32, #tpu.memory_space<vmem>>, vector<1x8x8xf32>,
    %312 = arith.index_cast %238 : i32 to index
    %c0_66 = arith.constant 0 : index
    %c0_67 = arith.constant 0 : index
    %313 = vector.load %arg7[%312, %c0_66, %c0_67] : memref<8x8x8xf32, #tpu.memory_space<vmem>>, vector<1x8x8xf32>
    %314 = vector.shape_cast %313 : vector<1x8x8xf32> to vector<8x8xf32>
    %315 = vector.shape_cast %307 : vector<8x8xf32> to vector<1x8x8xf32>
    tpu.vector_store %arg7[%312, %c0_66, %c0_67], %315 {strides = array<i32>} : memref<8x8x8xf32, #tpu.memory_space<vmem>>, vector<1x8x8xf32>,
    %c4_i32 = arith.constant 4 : i32
    %c7_i32_68 = arith.constant 7 : i32
    %316 = arith.subi %c7_i32_68, %c4_i32 : i32
    %317 = tpu.concatenate %278, %307 in 1 : vector<8x8xf32>, vector<8x8xf32> -> vector<8x16xf32>
    %318 = arith.truncf %317 : vector<8x16xf32> to vector<8x16xbf16>
    %cst_69 = arith.constant dense<0.000000e+00> : vector<8x48xf32>
    %319 = tpu.matmul %318, %0, %cst_69 {dimension_numbers = #tpu.dot_dimension_numbers<[1], [0], [0], [1], [0, 0, 1, 1], [], []>} : vector<8x16xbf16>, vector<16x48xbf16>, vector<8x48xf32> -> vector<8x48xf32>
    %320 = arith.index_cast %c4_i32 : i32 to index
    %c0_70 = arith.constant 0 : index
    %c0_71 = arith.constant 0 : index
    %321 = vector.load %arg1[%320, %c0_70, %c0_71] : memref<8x8x24xbf16, #tpu.memory_space<vmem>>, vector<1x8x24xbf16>
    %322 = vector.shape_cast %321 : vector<1x8x24xbf16> to vector<8x24xbf16>
    %323 = arith.extf %322 : vector<8x24xbf16> to vector<8x24xf32>
    %324 = arith.index_cast %316 : i32 to index
    %c0_72 = arith.constant 0 : index
    %c0_73 = arith.constant 0 : index
    %325 = vector.load %arg2[%324, %c0_72, %c0_73] : memref<8x8x24xbf16, #tpu.memory_space<vmem>>, vector<1x8x24xbf16>
    %326 = vector.shape_cast %325 : vector<1x8x24xbf16> to vector<8x24xbf16>
    %327 = arith.extf %326 : vector<8x24xbf16> to vector<8x24xf32>
    %328 = vector.extract_strided_slice %319 {offsets = [0, 0], sizes = [8, 24], strides = [1, 1]} : vector<8x48xf32> to vector<8x24xf32>
    %329 = vector.extract_strided_slice %323 {offsets = [0, 0], sizes = [8, 8], strides = [1, 1]} : vector<8x24xf32> to vector<8x8xf32>
    %330 = vector.extract_strided_slice %328 {offsets = [0, 0], sizes = [8, 8], strides = [1, 1]} : vector<8x24xf32> to vector<8x8xf32>
    %331 = arith.addf %329, %330 : vector<8x8xf32>
    %332 = arith.negf %331 : vector<8x8xf32>
    %333 = math.exp %332 : vector<8x8xf32>
    %cst_74 = arith.constant 1.000000e+00 : f32
    %334 = vector.broadcast %cst_74 : f32 to vector<8x8xf32>
    %335 = arith.addf %334, %333 : vector<8x8xf32>
    %336 = arith.divf %334, %335 : vector<8x8xf32>
    %337 = vector.extract_strided_slice %323 {offsets = [0, 8], sizes = [8, 8], strides = [1, 1]} : vector<8x24xf32> to vector<8x8xf32>
    %338 = vector.extract_strided_slice %328 {offsets = [0, 8], sizes = [8, 8], strides = [1, 1]} : vector<8x24xf32> to vector<8x8xf32>
    %339 = arith.addf %337, %338 : vector<8x8xf32>
    %340 = arith.negf %339 : vector<8x8xf32>
    %341 = math.exp %340 : vector<8x8xf32>
    %cst_75 = arith.constant 1.000000e+00 : f32
    %342 = vector.broadcast %cst_75 : f32 to vector<8x8xf32>
    %343 = arith.addf %342, %341 : vector<8x8xf32>
    %344 = arith.divf %342, %343 : vector<8x8xf32>
    %345 = vector.extract_strided_slice %323 {offsets = [0, 16], sizes = [8, 8], strides = [1, 1]} : vector<8x24xf32> to vector<8x8xf32>
    %346 = vector.extract_strided_slice %328 {offsets = [0, 16], sizes = [8, 8], strides = [1, 1]} : vector<8x24xf32> to vector<8x8xf32>
    %347 = vector.broadcast %1 : vector<1x8xf32> to vector<8x8xf32>
    %348 = arith.addf %346, %347 : vector<8x8xf32>
    %349 = arith.mulf %336, %348 : vector<8x8xf32>
    %350 = arith.addf %345, %349 : vector<8x8xf32>
    %351 = math.tanh %350 : vector<8x8xf32>
    %cst_76 = arith.constant 1.000000e+00 : f32
    %352 = vector.broadcast %cst_76 : f32 to vector<8x8xf32>
    %353 = arith.subf %352, %344 : vector<8x8xf32>
    %354 = arith.mulf %353, %351 : vector<8x8xf32>
    %355 = arith.mulf %344, %278 : vector<8x8xf32>
    %356 = arith.addf %354, %355 : vector<8x8xf32>
    %357 = vector.extract_strided_slice %319 {offsets = [0, 24], sizes = [8, 24], strides = [1, 1]} : vector<8x48xf32> to vector<8x24xf32>
    %358 = vector.extract_strided_slice %327 {offsets = [0, 0], sizes = [8, 8], strides = [1, 1]} : vector<8x24xf32> to vector<8x8xf32>
    %359 = vector.extract_strided_slice %357 {offsets = [0, 0], sizes = [8, 8], strides = [1, 1]} : vector<8x24xf32> to vector<8x8xf32>
    %360 = arith.addf %358, %359 : vector<8x8xf32>
    %361 = arith.negf %360 : vector<8x8xf32>
    %362 = math.exp %361 : vector<8x8xf32>
    %cst_77 = arith.constant 1.000000e+00 : f32
    %363 = vector.broadcast %cst_77 : f32 to vector<8x8xf32>
    %364 = arith.addf %363, %362 : vector<8x8xf32>
    %365 = arith.divf %363, %364 : vector<8x8xf32>
    %366 = vector.extract_strided_slice %327 {offsets = [0, 8], sizes = [8, 8], strides = [1, 1]} : vector<8x24xf32> to vector<8x8xf32>
    %367 = vector.extract_strided_slice %357 {offsets = [0, 8], sizes = [8, 8], strides = [1, 1]} : vector<8x24xf32> to vector<8x8xf32>
    %368 = arith.addf %366, %367 : vector<8x8xf32>
    %369 = arith.negf %368 : vector<8x8xf32>
    %370 = math.exp %369 : vector<8x8xf32>
    %cst_78 = arith.constant 1.000000e+00 : f32
    %371 = vector.broadcast %cst_78 : f32 to vector<8x8xf32>
    %372 = arith.addf %371, %370 : vector<8x8xf32>
    %373 = arith.divf %371, %372 : vector<8x8xf32>
    %374 = vector.extract_strided_slice %327 {offsets = [0, 16], sizes = [8, 8], strides = [1, 1]} : vector<8x24xf32> to vector<8x8xf32>
    %375 = vector.extract_strided_slice %357 {offsets = [0, 16], sizes = [8, 8], strides = [1, 1]} : vector<8x24xf32> to vector<8x8xf32>
    %376 = vector.broadcast %2 : vector<1x8xf32> to vector<8x8xf32>
    %377 = arith.addf %375, %376 : vector<8x8xf32>
    %378 = arith.mulf %365, %377 : vector<8x8xf32>
    %379 = arith.addf %374, %378 : vector<8x8xf32>
    %380 = math.tanh %379 : vector<8x8xf32>
    %cst_79 = arith.constant 1.000000e+00 : f32
    %381 = vector.broadcast %cst_79 : f32 to vector<8x8xf32>
    %382 = arith.subf %381, %373 : vector<8x8xf32>
    %383 = arith.mulf %382, %380 : vector<8x8xf32>
    %384 = arith.mulf %373, %307 : vector<8x8xf32>
    %385 = arith.addf %383, %384 : vector<8x8xf32>
    %386 = arith.index_cast %c4_i32 : i32 to index
    %c0_80 = arith.constant 0 : index
    %c0_81 = arith.constant 0 : index
    %387 = vector.load %arg6[%386, %c0_80, %c0_81] : memref<8x8x8xf32, #tpu.memory_space<vmem>>, vector<1x8x8xf32>
    %388 = vector.shape_cast %387 : vector<1x8x8xf32> to vector<8x8xf32>
    %389 = vector.shape_cast %356 : vector<8x8xf32> to vector<1x8x8xf32>
    tpu.vector_store %arg6[%386, %c0_80, %c0_81], %389 {strides = array<i32>} : memref<8x8x8xf32, #tpu.memory_space<vmem>>, vector<1x8x8xf32>,
    %390 = arith.index_cast %316 : i32 to index
    %c0_82 = arith.constant 0 : index
    %c0_83 = arith.constant 0 : index
    %391 = vector.load %arg7[%390, %c0_82, %c0_83] : memref<8x8x8xf32, #tpu.memory_space<vmem>>, vector<1x8x8xf32>
    %392 = vector.shape_cast %391 : vector<1x8x8xf32> to vector<8x8xf32>
    %393 = vector.shape_cast %385 : vector<8x8xf32> to vector<1x8x8xf32>
    tpu.vector_store %arg7[%390, %c0_82, %c0_83], %393 {strides = array<i32>} : memref<8x8x8xf32, #tpu.memory_space<vmem>>, vector<1x8x8xf32>,
    %c5_i32 = arith.constant 5 : i32
    %c7_i32_84 = arith.constant 7 : i32
    %394 = arith.subi %c7_i32_84, %c5_i32 : i32
    %395 = tpu.concatenate %356, %385 in 1 : vector<8x8xf32>, vector<8x8xf32> -> vector<8x16xf32>
    %396 = arith.truncf %395 : vector<8x16xf32> to vector<8x16xbf16>
    %cst_85 = arith.constant dense<0.000000e+00> : vector<8x48xf32>
    %397 = tpu.matmul %396, %0, %cst_85 {dimension_numbers = #tpu.dot_dimension_numbers<[1], [0], [0], [1], [0, 0, 1, 1], [], []>} : vector<8x16xbf16>, vector<16x48xbf16>, vector<8x48xf32> -> vector<8x48xf32>
    %398 = arith.index_cast %c5_i32 : i32 to index
    %c0_86 = arith.constant 0 : index
    %c0_87 = arith.constant 0 : index
    %399 = vector.load %arg1[%398, %c0_86, %c0_87] : memref<8x8x24xbf16, #tpu.memory_space<vmem>>, vector<1x8x24xbf16>
    %400 = vector.shape_cast %399 : vector<1x8x24xbf16> to vector<8x24xbf16>
    %401 = arith.extf %400 : vector<8x24xbf16> to vector<8x24xf32>
    %402 = arith.index_cast %394 : i32 to index
    %c0_88 = arith.constant 0 : index
    %c0_89 = arith.constant 0 : index
    %403 = vector.load %arg2[%402, %c0_88, %c0_89] : memref<8x8x24xbf16, #tpu.memory_space<vmem>>, vector<1x8x24xbf16>
    %404 = vector.shape_cast %403 : vector<1x8x24xbf16> to vector<8x24xbf16>
    %405 = arith.extf %404 : vector<8x24xbf16> to vector<8x24xf32>
    %406 = vector.extract_strided_slice %397 {offsets = [0, 0], sizes = [8, 24], strides = [1, 1]} : vector<8x48xf32> to vector<8x24xf32>
    %407 = vector.extract_strided_slice %401 {offsets = [0, 0], sizes = [8, 8], strides = [1, 1]} : vector<8x24xf32> to vector<8x8xf32>
    %408 = vector.extract_strided_slice %406 {offsets = [0, 0], sizes = [8, 8], strides = [1, 1]} : vector<8x24xf32> to vector<8x8xf32>
    %409 = arith.addf %407, %408 : vector<8x8xf32>
    %410 = arith.negf %409 : vector<8x8xf32>
    %411 = math.exp %410 : vector<8x8xf32>
    %cst_90 = arith.constant 1.000000e+00 : f32
    %412 = vector.broadcast %cst_90 : f32 to vector<8x8xf32>
    %413 = arith.addf %412, %411 : vector<8x8xf32>
    %414 = arith.divf %412, %413 : vector<8x8xf32>
    %415 = vector.extract_strided_slice %401 {offsets = [0, 8], sizes = [8, 8], strides = [1, 1]} : vector<8x24xf32> to vector<8x8xf32>
    %416 = vector.extract_strided_slice %406 {offsets = [0, 8], sizes = [8, 8], strides = [1, 1]} : vector<8x24xf32> to vector<8x8xf32>
    %417 = arith.addf %415, %416 : vector<8x8xf32>
    %418 = arith.negf %417 : vector<8x8xf32>
    %419 = math.exp %418 : vector<8x8xf32>
    %cst_91 = arith.constant 1.000000e+00 : f32
    %420 = vector.broadcast %cst_91 : f32 to vector<8x8xf32>
    %421 = arith.addf %420, %419 : vector<8x8xf32>
    %422 = arith.divf %420, %421 : vector<8x8xf32>
    %423 = vector.extract_strided_slice %401 {offsets = [0, 16], sizes = [8, 8], strides = [1, 1]} : vector<8x24xf32> to vector<8x8xf32>
    %424 = vector.extract_strided_slice %406 {offsets = [0, 16], sizes = [8, 8], strides = [1, 1]} : vector<8x24xf32> to vector<8x8xf32>
    %425 = vector.broadcast %1 : vector<1x8xf32> to vector<8x8xf32>
    %426 = arith.addf %424, %425 : vector<8x8xf32>
    %427 = arith.mulf %414, %426 : vector<8x8xf32>
    %428 = arith.addf %423, %427 : vector<8x8xf32>
    %429 = math.tanh %428 : vector<8x8xf32>
    %cst_92 = arith.constant 1.000000e+00 : f32
    %430 = vector.broadcast %cst_92 : f32 to vector<8x8xf32>
    %431 = arith.subf %430, %422 : vector<8x8xf32>
    %432 = arith.mulf %431, %429 : vector<8x8xf32>
    %433 = arith.mulf %422, %356 : vector<8x8xf32>
    %434 = arith.addf %432, %433 : vector<8x8xf32>
    %435 = vector.extract_strided_slice %397 {offsets = [0, 24], sizes = [8, 24], strides = [1, 1]} : vector<8x48xf32> to vector<8x24xf32>
    %436 = vector.extract_strided_slice %405 {offsets = [0, 0], sizes = [8, 8], strides = [1, 1]} : vector<8x24xf32> to vector<8x8xf32>
    %437 = vector.extract_strided_slice %435 {offsets = [0, 0], sizes = [8, 8], strides = [1, 1]} : vector<8x24xf32> to vector<8x8xf32>
    %438 = arith.addf %436, %437 : vector<8x8xf32>
    %439 = arith.negf %438 : vector<8x8xf32>
    %440 = math.exp %439 : vector<8x8xf32>
    %cst_93 = arith.constant 1.000000e+00 : f32
    %441 = vector.broadcast %cst_93 : f32 to vector<8x8xf32>
    %442 = arith.addf %441, %440 : vector<8x8xf32>
    %443 = arith.divf %441, %442 : vector<8x8xf32>
    %444 = vector.extract_strided_slice %405 {offsets = [0, 8], sizes = [8, 8], strides = [1, 1]} : vector<8x24xf32> to vector<8x8xf32>
    %445 = vector.extract_strided_slice %435 {offsets = [0, 8], sizes = [8, 8], strides = [1, 1]} : vector<8x24xf32> to vector<8x8xf32>
    %446 = arith.addf %444, %445 : vector<8x8xf32>
    %447 = arith.negf %446 : vector<8x8xf32>
    %448 = math.exp %447 : vector<8x8xf32>
    %cst_94 = arith.constant 1.000000e+00 : f32
    %449 = vector.broadcast %cst_94 : f32 to vector<8x8xf32>
    %450 = arith.addf %449, %448 : vector<8x8xf32>
    %451 = arith.divf %449, %450 : vector<8x8xf32>
    %452 = vector.extract_strided_slice %405 {offsets = [0, 16], sizes = [8, 8], strides = [1, 1]} : vector<8x24xf32> to vector<8x8xf32>
    %453 = vector.extract_strided_slice %435 {offsets = [0, 16], sizes = [8, 8], strides = [1, 1]} : vector<8x24xf32> to vector<8x8xf32>
    %454 = vector.broadcast %2 : vector<1x8xf32> to vector<8x8xf32>
    %455 = arith.addf %453, %454 : vector<8x8xf32>
    %456 = arith.mulf %443, %455 : vector<8x8xf32>
    %457 = arith.addf %452, %456 : vector<8x8xf32>
    %458 = math.tanh %457 : vector<8x8xf32>
    %cst_95 = arith.constant 1.000000e+00 : f32
    %459 = vector.broadcast %cst_95 : f32 to vector<8x8xf32>
    %460 = arith.subf %459, %451 : vector<8x8xf32>
    %461 = arith.mulf %460, %458 : vector<8x8xf32>
    %462 = arith.mulf %451, %385 : vector<8x8xf32>
    %463 = arith.addf %461, %462 : vector<8x8xf32>
    %464 = arith.index_cast %c5_i32 : i32 to index
    %c0_96 = arith.constant 0 : index
    %c0_97 = arith.constant 0 : index
    %465 = vector.load %arg6[%464, %c0_96, %c0_97] : memref<8x8x8xf32, #tpu.memory_space<vmem>>, vector<1x8x8xf32>
    %466 = vector.shape_cast %465 : vector<1x8x8xf32> to vector<8x8xf32>
    %467 = vector.shape_cast %434 : vector<8x8xf32> to vector<1x8x8xf32>
    tpu.vector_store %arg6[%464, %c0_96, %c0_97], %467 {strides = array<i32>} : memref<8x8x8xf32, #tpu.memory_space<vmem>>, vector<1x8x8xf32>,
    %468 = arith.index_cast %394 : i32 to index
    %c0_98 = arith.constant 0 : index
    %c0_99 = arith.constant 0 : index
    %469 = vector.load %arg7[%468, %c0_98, %c0_99] : memref<8x8x8xf32, #tpu.memory_space<vmem>>, vector<1x8x8xf32>
    %470 = vector.shape_cast %469 : vector<1x8x8xf32> to vector<8x8xf32>
    %471 = vector.shape_cast %463 : vector<8x8xf32> to vector<1x8x8xf32>
    tpu.vector_store %arg7[%468, %c0_98, %c0_99], %471 {strides = array<i32>} : memref<8x8x8xf32, #tpu.memory_space<vmem>>, vector<1x8x8xf32>,
    %c6_i32 = arith.constant 6 : i32
    %c7_i32_100 = arith.constant 7 : i32
    %472 = arith.subi %c7_i32_100, %c6_i32 : i32
    %473 = tpu.concatenate %434, %463 in 1 : vector<8x8xf32>, vector<8x8xf32> -> vector<8x16xf32>
    %474 = arith.truncf %473 : vector<8x16xf32> to vector<8x16xbf16>
    %cst_101 = arith.constant dense<0.000000e+00> : vector<8x48xf32>
    %475 = tpu.matmul %474, %0, %cst_101 {dimension_numbers = #tpu.dot_dimension_numbers<[1], [0], [0], [1], [0, 0, 1, 1], [], []>} : vector<8x16xbf16>, vector<16x48xbf16>, vector<8x48xf32> -> vector<8x48xf32>
    %476 = arith.index_cast %c6_i32 : i32 to index
    %c0_102 = arith.constant 0 : index
    %c0_103 = arith.constant 0 : index
    %477 = vector.load %arg1[%476, %c0_102, %c0_103] : memref<8x8x24xbf16, #tpu.memory_space<vmem>>, vector<1x8x24xbf16>
    %478 = vector.shape_cast %477 : vector<1x8x24xbf16> to vector<8x24xbf16>
    %479 = arith.extf %478 : vector<8x24xbf16> to vector<8x24xf32>
    %480 = arith.index_cast %472 : i32 to index
    %c0_104 = arith.constant 0 : index
    %c0_105 = arith.constant 0 : index
    %481 = vector.load %arg2[%480, %c0_104, %c0_105] : memref<8x8x24xbf16, #tpu.memory_space<vmem>>, vector<1x8x24xbf16>
    %482 = vector.shape_cast %481 : vector<1x8x24xbf16> to vector<8x24xbf16>
    %483 = arith.extf %482 : vector<8x24xbf16> to vector<8x24xf32>
    %484 = vector.extract_strided_slice %475 {offsets = [0, 0], sizes = [8, 24], strides = [1, 1]} : vector<8x48xf32> to vector<8x24xf32>
    %485 = vector.extract_strided_slice %479 {offsets = [0, 0], sizes = [8, 8], strides = [1, 1]} : vector<8x24xf32> to vector<8x8xf32>
    %486 = vector.extract_strided_slice %484 {offsets = [0, 0], sizes = [8, 8], strides = [1, 1]} : vector<8x24xf32> to vector<8x8xf32>
    %487 = arith.addf %485, %486 : vector<8x8xf32>
    %488 = arith.negf %487 : vector<8x8xf32>
    %489 = math.exp %488 : vector<8x8xf32>
    %cst_106 = arith.constant 1.000000e+00 : f32
    %490 = vector.broadcast %cst_106 : f32 to vector<8x8xf32>
    %491 = arith.addf %490, %489 : vector<8x8xf32>
    %492 = arith.divf %490, %491 : vector<8x8xf32>
    %493 = vector.extract_strided_slice %479 {offsets = [0, 8], sizes = [8, 8], strides = [1, 1]} : vector<8x24xf32> to vector<8x8xf32>
    %494 = vector.extract_strided_slice %484 {offsets = [0, 8], sizes = [8, 8], strides = [1, 1]} : vector<8x24xf32> to vector<8x8xf32>
    %495 = arith.addf %493, %494 : vector<8x8xf32>
    %496 = arith.negf %495 : vector<8x8xf32>
    %497 = math.exp %496 : vector<8x8xf32>
    %cst_107 = arith.constant 1.000000e+00 : f32
    %498 = vector.broadcast %cst_107 : f32 to vector<8x8xf32>
    %499 = arith.addf %498, %497 : vector<8x8xf32>
    %500 = arith.divf %498, %499 : vector<8x8xf32>
    %501 = vector.extract_strided_slice %479 {offsets = [0, 16], sizes = [8, 8], strides = [1, 1]} : vector<8x24xf32> to vector<8x8xf32>
    %502 = vector.extract_strided_slice %484 {offsets = [0, 16], sizes = [8, 8], strides = [1, 1]} : vector<8x24xf32> to vector<8x8xf32>
    %503 = vector.broadcast %1 : vector<1x8xf32> to vector<8x8xf32>
    %504 = arith.addf %502, %503 : vector<8x8xf32>
    %505 = arith.mulf %492, %504 : vector<8x8xf32>
    %506 = arith.addf %501, %505 : vector<8x8xf32>
    %507 = math.tanh %506 : vector<8x8xf32>
    %cst_108 = arith.constant 1.000000e+00 : f32
    %508 = vector.broadcast %cst_108 : f32 to vector<8x8xf32>
    %509 = arith.subf %508, %500 : vector<8x8xf32>
    %510 = arith.mulf %509, %507 : vector<8x8xf32>
    %511 = arith.mulf %500, %434 : vector<8x8xf32>
    %512 = arith.addf %510, %511 : vector<8x8xf32>
    %513 = vector.extract_strided_slice %475 {offsets = [0, 24], sizes = [8, 24], strides = [1, 1]} : vector<8x48xf32> to vector<8x24xf32>
    %514 = vector.extract_strided_slice %483 {offsets = [0, 0], sizes = [8, 8], strides = [1, 1]} : vector<8x24xf32> to vector<8x8xf32>
    %515 = vector.extract_strided_slice %513 {offsets = [0, 0], sizes = [8, 8], strides = [1, 1]} : vector<8x24xf32> to vector<8x8xf32>
    %516 = arith.addf %514, %515 : vector<8x8xf32>
    %517 = arith.negf %516 : vector<8x8xf32>
    %518 = math.exp %517 : vector<8x8xf32>
    %cst_109 = arith.constant 1.000000e+00 : f32
    %519 = vector.broadcast %cst_109 : f32 to vector<8x8xf32>
    %520 = arith.addf %519, %518 : vector<8x8xf32>
    %521 = arith.divf %519, %520 : vector<8x8xf32>
    %522 = vector.extract_strided_slice %483 {offsets = [0, 8], sizes = [8, 8], strides = [1, 1]} : vector<8x24xf32> to vector<8x8xf32>
    %523 = vector.extract_strided_slice %513 {offsets = [0, 8], sizes = [8, 8], strides = [1, 1]} : vector<8x24xf32> to vector<8x8xf32>
    %524 = arith.addf %522, %523 : vector<8x8xf32>
    %525 = arith.negf %524 : vector<8x8xf32>
    %526 = math.exp %525 : vector<8x8xf32>
    %cst_110 = arith.constant 1.000000e+00 : f32
    %527 = vector.broadcast %cst_110 : f32 to vector<8x8xf32>
    %528 = arith.addf %527, %526 : vector<8x8xf32>
    %529 = arith.divf %527, %528 : vector<8x8xf32>
    %530 = vector.extract_strided_slice %483 {offsets = [0, 16], sizes = [8, 8], strides = [1, 1]} : vector<8x24xf32> to vector<8x8xf32>
    %531 = vector.extract_strided_slice %513 {offsets = [0, 16], sizes = [8, 8], strides = [1, 1]} : vector<8x24xf32> to vector<8x8xf32>
    %532 = vector.broadcast %2 : vector<1x8xf32> to vector<8x8xf32>
    %533 = arith.addf %531, %532 : vector<8x8xf32>
    %534 = arith.mulf %521, %533 : vector<8x8xf32>
    %535 = arith.addf %530, %534 : vector<8x8xf32>
    %536 = math.tanh %535 : vector<8x8xf32>
    %cst_111 = arith.constant 1.000000e+00 : f32
    %537 = vector.broadcast %cst_111 : f32 to vector<8x8xf32>
    %538 = arith.subf %537, %529 : vector<8x8xf32>
    %539 = arith.mulf %538, %536 : vector<8x8xf32>
    %540 = arith.mulf %529, %463 : vector<8x8xf32>
    %541 = arith.addf %539, %540 : vector<8x8xf32>
    %542 = arith.index_cast %c6_i32 : i32 to index
    %c0_112 = arith.constant 0 : index
    %c0_113 = arith.constant 0 : index
    %543 = vector.load %arg6[%542, %c0_112, %c0_113] : memref<8x8x8xf32, #tpu.memory_space<vmem>>, vector<1x8x8xf32>
    %544 = vector.shape_cast %543 : vector<1x8x8xf32> to vector<8x8xf32>
    %545 = vector.shape_cast %512 : vector<8x8xf32> to vector<1x8x8xf32>
    tpu.vector_store %arg6[%542, %c0_112, %c0_113], %545 {strides = array<i32>} : memref<8x8x8xf32, #tpu.memory_space<vmem>>, vector<1x8x8xf32>,
    %546 = arith.index_cast %472 : i32 to index
    %c0_114 = arith.constant 0 : index
    %c0_115 = arith.constant 0 : index
    %547 = vector.load %arg7[%546, %c0_114, %c0_115] : memref<8x8x8xf32, #tpu.memory_space<vmem>>, vector<1x8x8xf32>
    %548 = vector.shape_cast %547 : vector<1x8x8xf32> to vector<8x8xf32>
    %549 = vector.shape_cast %541 : vector<8x8xf32> to vector<1x8x8xf32>
    tpu.vector_store %arg7[%546, %c0_114, %c0_115], %549 {strides = array<i32>} : memref<8x8x8xf32, #tpu.memory_space<vmem>>, vector<1x8x8xf32>,
    %c7_i32_116 = arith.constant 7 : i32
    %c7_i32_117 = arith.constant 7 : i32
    %550 = arith.subi %c7_i32_117, %c7_i32_116 : i32
    %551 = tpu.concatenate %512, %541 in 1 : vector<8x8xf32>, vector<8x8xf32> -> vector<8x16xf32>
    %552 = arith.truncf %551 : vector<8x16xf32> to vector<8x16xbf16>
    %cst_118 = arith.constant dense<0.000000e+00> : vector<8x48xf32>
    %553 = tpu.matmul %552, %0, %cst_118 {dimension_numbers = #tpu.dot_dimension_numbers<[1], [0], [0], [1], [0, 0, 1, 1], [], []>} : vector<8x16xbf16>, vector<16x48xbf16>, vector<8x48xf32> -> vector<8x48xf32>
    %554 = arith.index_cast %c7_i32_116 : i32 to index
    %c0_119 = arith.constant 0 : index
    %c0_120 = arith.constant 0 : index
    %555 = vector.load %arg1[%554, %c0_119, %c0_120] : memref<8x8x24xbf16, #tpu.memory_space<vmem>>, vector<1x8x24xbf16>
    %556 = vector.shape_cast %555 : vector<1x8x24xbf16> to vector<8x24xbf16>
    %557 = arith.extf %556 : vector<8x24xbf16> to vector<8x24xf32>
    %558 = arith.index_cast %550 : i32 to index
    %c0_121 = arith.constant 0 : index
    %c0_122 = arith.constant 0 : index
    %559 = vector.load %arg2[%558, %c0_121, %c0_122] : memref<8x8x24xbf16, #tpu.memory_space<vmem>>, vector<1x8x24xbf16>
    %560 = vector.shape_cast %559 : vector<1x8x24xbf16> to vector<8x24xbf16>
    %561 = arith.extf %560 : vector<8x24xbf16> to vector<8x24xf32>
    %562 = vector.extract_strided_slice %553 {offsets = [0, 0], sizes = [8, 24], strides = [1, 1]} : vector<8x48xf32> to vector<8x24xf32>
    %563 = vector.extract_strided_slice %557 {offsets = [0, 0], sizes = [8, 8], strides = [1, 1]} : vector<8x24xf32> to vector<8x8xf32>
    %564 = vector.extract_strided_slice %562 {offsets = [0, 0], sizes = [8, 8], strides = [1, 1]} : vector<8x24xf32> to vector<8x8xf32>
    %565 = arith.addf %563, %564 : vector<8x8xf32>
    %566 = arith.negf %565 : vector<8x8xf32>
    %567 = math.exp %566 : vector<8x8xf32>
    %cst_123 = arith.constant 1.000000e+00 : f32
    %568 = vector.broadcast %cst_123 : f32 to vector<8x8xf32>
    %569 = arith.addf %568, %567 : vector<8x8xf32>
    %570 = arith.divf %568, %569 : vector<8x8xf32>
    %571 = vector.extract_strided_slice %557 {offsets = [0, 8], sizes = [8, 8], strides = [1, 1]} : vector<8x24xf32> to vector<8x8xf32>
    %572 = vector.extract_strided_slice %562 {offsets = [0, 8], sizes = [8, 8], strides = [1, 1]} : vector<8x24xf32> to vector<8x8xf32>
    %573 = arith.addf %571, %572 : vector<8x8xf32>
    %574 = arith.negf %573 : vector<8x8xf32>
    %575 = math.exp %574 : vector<8x8xf32>
    %cst_124 = arith.constant 1.000000e+00 : f32
    %576 = vector.broadcast %cst_124 : f32 to vector<8x8xf32>
    %577 = arith.addf %576, %575 : vector<8x8xf32>
    %578 = arith.divf %576, %577 : vector<8x8xf32>
    %579 = vector.extract_strided_slice %557 {offsets = [0, 16], sizes = [8, 8], strides = [1, 1]} : vector<8x24xf32> to vector<8x8xf32>
    %580 = vector.extract_strided_slice %562 {offsets = [0, 16], sizes = [8, 8], strides = [1, 1]} : vector<8x24xf32> to vector<8x8xf32>
    %581 = vector.broadcast %1 : vector<1x8xf32> to vector<8x8xf32>
    %582 = arith.addf %580, %581 : vector<8x8xf32>
    %583 = arith.mulf %570, %582 : vector<8x8xf32>
    %584 = arith.addf %579, %583 : vector<8x8xf32>
    %585 = math.tanh %584 : vector<8x8xf32>
    %cst_125 = arith.constant 1.000000e+00 : f32
    %586 = vector.broadcast %cst_125 : f32 to vector<8x8xf32>
    %587 = arith.subf %586, %578 : vector<8x8xf32>
    %588 = arith.mulf %587, %585 : vector<8x8xf32>
    %589 = arith.mulf %578, %512 : vector<8x8xf32>
    %590 = arith.addf %588, %589 : vector<8x8xf32>
    %591 = vector.extract_strided_slice %553 {offsets = [0, 24], sizes = [8, 24], strides = [1, 1]} : vector<8x48xf32> to vector<8x24xf32>
    %592 = vector.extract_strided_slice %561 {offsets = [0, 0], sizes = [8, 8], strides = [1, 1]} : vector<8x24xf32> to vector<8x8xf32>
    %593 = vector.extract_strided_slice %591 {offsets = [0, 0], sizes = [8, 8], strides = [1, 1]} : vector<8x24xf32> to vector<8x8xf32>
    %594 = arith.addf %592, %593 : vector<8x8xf32>
    %595 = arith.negf %594 : vector<8x8xf32>
    %596 = math.exp %595 : vector<8x8xf32>
    %cst_126 = arith.constant 1.000000e+00 : f32
    %597 = vector.broadcast %cst_126 : f32 to vector<8x8xf32>
    %598 = arith.addf %597, %596 : vector<8x8xf32>
    %599 = arith.divf %597, %598 : vector<8x8xf32>
    %600 = vector.extract_strided_slice %561 {offsets = [0, 8], sizes = [8, 8], strides = [1, 1]} : vector<8x24xf32> to vector<8x8xf32>
    %601 = vector.extract_strided_slice %591 {offsets = [0, 8], sizes = [8, 8], strides = [1, 1]} : vector<8x24xf32> to vector<8x8xf32>
    %602 = arith.addf %600, %601 : vector<8x8xf32>
    %603 = arith.negf %602 : vector<8x8xf32>
    %604 = math.exp %603 : vector<8x8xf32>
    %cst_127 = arith.constant 1.000000e+00 : f32
    %605 = vector.broadcast %cst_127 : f32 to vector<8x8xf32>
    %606 = arith.addf %605, %604 : vector<8x8xf32>
    %607 = arith.divf %605, %606 : vector<8x8xf32>
    %608 = vector.extract_strided_slice %561 {offsets = [0, 16], sizes = [8, 8], strides = [1, 1]} : vector<8x24xf32> to vector<8x8xf32>
    %609 = vector.extract_strided_slice %591 {offsets = [0, 16], sizes = [8, 8], strides = [1, 1]} : vector<8x24xf32> to vector<8x8xf32>
    %610 = vector.broadcast %2 : vector<1x8xf32> to vector<8x8xf32>
    %611 = arith.addf %609, %610 : vector<8x8xf32>
    %612 = arith.mulf %599, %611 : vector<8x8xf32>
    %613 = arith.addf %608, %612 : vector<8x8xf32>
    %614 = math.tanh %613 : vector<8x8xf32>
    %cst_128 = arith.constant 1.000000e+00 : f32
    %615 = vector.broadcast %cst_128 : f32 to vector<8x8xf32>
    %616 = arith.subf %615, %607 : vector<8x8xf32>
    %617 = arith.mulf %616, %614 : vector<8x8xf32>
    %618 = arith.mulf %607, %541 : vector<8x8xf32>
    %619 = arith.addf %617, %618 : vector<8x8xf32>
    %620 = arith.index_cast %c7_i32_116 : i32 to index
    %c0_129 = arith.constant 0 : index
    %c0_130 = arith.constant 0 : index
    %621 = vector.load %arg6[%620, %c0_129, %c0_130] : memref<8x8x8xf32, #tpu.memory_space<vmem>>, vector<1x8x8xf32>
    %622 = vector.shape_cast %621 : vector<1x8x8xf32> to vector<8x8xf32>
    %623 = vector.shape_cast %590 : vector<8x8xf32> to vector<1x8x8xf32>
    tpu.vector_store %arg6[%620, %c0_129, %c0_130], %623 {strides = array<i32>} : memref<8x8x8xf32, #tpu.memory_space<vmem>>, vector<1x8x8xf32>,
    %624 = arith.index_cast %550 : i32 to index
    %c0_131 = arith.constant 0 : index
    %c0_132 = arith.constant 0 : index
    %625 = vector.load %arg7[%624, %c0_131, %c0_132] : memref<8x8x8xf32, #tpu.memory_space<vmem>>, vector<1x8x8xf32>
    %626 = vector.shape_cast %625 : vector<1x8x8xf32> to vector<8x8xf32>
    %627 = vector.shape_cast %619 : vector<8x8xf32> to vector<1x8x8xf32>
    tpu.vector_store %arg7[%624, %c0_131, %c0_132], %627 {strides = array<i32>} : memref<8x8x8xf32, #tpu.memory_space<vmem>>, vector<1x8x8xf32>,
    %c8_i32 = arith.constant 8 : i32
    return
  }
  func.func @transform_0(%arg0: i32) -> (i32, i32, i32) {
    %c0_i32 = arith.constant 0 : i32
    %c0_i32_0 = arith.constant 0 : i32
    %c0_i32_1 = arith.constant 0 : i32
    return %c0_i32, %arg0, %c0_i32_0 : i32, i32, i32
  }
  func.func @transform_1(%arg0: i32) -> (i32, i32, i32) {
    %c0_i32 = arith.constant 0 : i32
    %c0_i32_0 = arith.constant 0 : i32
    %c0_i32_1 = arith.constant 0 : i32
    return %c0_i32, %arg0, %c0_i32_0 : i32, i32, i32
  }
  func.func @transform_2(%arg0: i32) -> (i32, i32) {
    %c0_i32 = arith.constant 0 : i32
    %c0_i32_0 = arith.constant 0 : i32
    %c0_i32_1 = arith.constant 0 : i32
    return %c0_i32, %c0_i32_0 : i32, i32
  }
  func.func @transform_3(%arg0: i32) -> (i32, i32) {
    %c0_i32 = arith.constant 0 : i32
    %c0_i32_0 = arith.constant 0 : i32
    %c0_i32_1 = arith.constant 0 : i32
    return %c0_i32, %c0_i32_0 : i32, i32
  }
  func.func @transform_4(%arg0: i32) -> (i32, i32) {
    %c0_i32 = arith.constant 0 : i32
    %c0_i32_0 = arith.constant 0 : i32
    %c0_i32_1 = arith.constant 0 : i32
    return %c0_i32, %c0_i32_0 : i32, i32
  }
  func.func @transform_5(%arg0: i32) -> (i32, i32, i32) {
    %c0_i32 = arith.constant 0 : i32
    %c0_i32_0 = arith.constant 0 : i32
    %c0_i32_1 = arith.constant 0 : i32
    return %c0_i32, %arg0, %c0_i32_0 : i32, i32, i32
  }
  func.func @transform_6(%arg0: i32) -> (i32, i32, i32) {
    %c0_i32 = arith.constant 0 : i32
    %c0_i32_0 = arith.constant 0 : i32
    %c0_i32_1 = arith.constant 0 : i32
    return %c0_i32, %arg0, %c0_i32_0 : i32, i32, i32
  }
}

</mosaic_0001>

<bundles_post_ra>
// kernel: encoder_block_forward.5
= control target key start
LH: loop header
LB: loop body
LE: loop exit
PB: predicated region body
PF: predicated region fallthrough
CT: control target
= control target key end

     0   :  { %v237_v0 = vmov 0.0   ;;  %vm238_vm0 = vmmov 0   ;;  %vm55_vm3 = vcmask 261120   ;;  %vm108_vm4 = vcmask 60416   ;;  %s314_s1 = inlined_call_operand.vmem [shape: bf16[32,8], index: 1, kind: input, shape index: {}]   ;;  %s315_s2 = inlined_call_operand.vmem [shape: bf16[32,8], index: 2, kind: input, shape index: {}]   ;;  %s316_s0 = inlined_call_operand.vmem [shape: f32[16,32], index: 0, kind: input, shape index: {}]   ;;  %s317_s3 = inlined_call_operand.vmem [shape: f32[1,8], index: 3, kind: input, shape index: {}]   ;;  %s318_s4 = inlined_call_operand.vmem [shape: f32[1,8], index: 4, kind: input, shape index: {}]   ;;  %s319_s5 = inlined_call_operand.vmem [shape: bf16[16,8], index: 5, kind: output, shape index: {0}]   ;;  %s320_s6 = inlined_call_operand.vmem [shape: bf16[16,8], index: 6, kind: output, shape index: {1}]  }
   0x1   :  { %215 = vmatprep.subr.bf16.mxu0 %v237_v0  ;;  %223 = vmatprep.subr.bf16.mxu1 %v237_v0  ;;  %v233_v1 = vld [vmem:[%s314_s1 + $0x8] sm:$0xff]   ;;  %v235_v3 = vld [vmem:[%s314_s1] sm:$0xff]  }
   0x2   :  { %v234_v2 = vld [vmem:[%s315_s2 + $0x8] sm:$0xff]   ;;  %219 = vmatprep.mubr.msk.bf16.mxu0 %vm238_vm0, %v237_v0  ;;  %227 = vmatprep.mubr.msk.bf16.mxu1 %vm238_vm0, %v237_v0  ;;  %v236_v4 = vld [vmem:[%s315_s2] sm:$0xff]  }
   0x3   :  { %216 = vmatpush3.bf16.msra.mxu0 %v233_v1  ;;  %224 = vmatpush3.bf16.msra.mxu1 %v234_v2  ;;  %v23_v5 = vld [vmem:[%s316_s0] sm:$0xff]  ;;  %v24_v6 = vld [vmem:[%s316_s0 + $0x8] sm:$0xff] }
   0x4   :  { %217 = vmatprep.subr.bf16.mxu0 %v237_v0  ;;  %225 = vmatprep.subr.bf16.mxu1 %v237_v0  ;;  %vm25_vm1 = vcmp.ge.f32.partialorder %v23_v5, 0.0  ;;  %vm26_vm2 = vcmp.ge.f32.partialorder %v24_v6, 0.0  ;;  %v27_v7 = vmul.f32 0.2, %v23_v5  ;;  %v28_v8 = vmul.f32 0.2, %v24_v6 }
   0x5   :  { %v193_v12 = vld [vmem:[%s317_s3] ss:$0 sm:$0xff] }
   0x6   :  { %v29_v9 = vsel %vm25_vm1, %v23_v5, %v27_v7  ;;  %v30_v10 = vsel %vm26_vm2, %v24_v6, %v28_v8  ;;  %v199_v13 = vld [vmem:[%s318_s4] ss:$0 sm:$0xff] }
   0x7   :  { %218 = vmatpush3.bf16.msra.mxu0 %v235_v3  ;;  %226 = vmatpush3.bf16.msra.mxu1 %v236_v4  ;;  %v31_v11 = vpack.c.bf16 %v30_v10, %v29_v9 }
   0xa   :  { %220 = vmatmul.mubr.msk.bf16.vlgmr.msra.gmra.mxu0 %vm55_vm3, %v31_v11  ;;  %228 = vmatmul.mubr.msk.bf16.vlgmr.msra.gmra.mxu1 %vm55_vm3, %v31_v11 }
  0xca   :  { %v93_v14 = vpop.f32.mrf.mxu0  ;;  %v168_v15 = vpop.f32.mrf.mxu1 }
  0xcb   :  { %v94_v16 = vadd.f32 %v193_v12, %v93_v14  ;;  %v169_v17 = vadd.f32 %v199_v13, %v168_v15 }
  0xcc   :  { %v221_v18 = vpop.f32.mrf.mxu0  ;;  %v229_v19 = vpop.f32.mrf.mxu1 }
  0xcd   :  { %v205_v20 = vpack.c.bf16 %v94_v16, %v94_v16  ;;  %v207_v21 = vpack.c.bf16 %v169_v17, %v169_v17 }
  0xce   :  { %v96_v22 = vpop.f32.mrf.mxu0  ;;  %v171_v23 = vpop.f32.mrf.mxu1 }
  0xcf   :  { %109 = vst.msk [vmem:[%s319_s5] sm:$0xf] %vm108_vm4, %v205_v20  ;;  %183 = vst.msk [vmem:[%s320_s6] sm:$0xf] %vm108_vm4, %v207_v21  ;;  %v97_v24 = vadd.f32 %v193_v12, %v96_v22  ;;  %v172_v25 = vadd.f32 %v199_v13, %v171_v23 }
  0xd0   :  { %v222_v26 = vpop.f32.mrf.mxu0  ;;  %v230_v27 = vpop.f32.mrf.mxu1 }
  0xd1   :  { %v206_v28 = vpack.c.bf16 %v97_v24, %v97_v24  ;;  %v208_v29 = vpack.c.bf16 %v172_v25, %v172_v25 }
  0xd3   :  { %110 = vst.msk [vmem:[%s319_s5 + $0x4] sm:$0xf] %vm108_vm4, %v206_v28  ;;  %184 = vst.msk [vmem:[%s320_s6 + $0x4] sm:$0xf] %vm108_vm4, %v208_v29 }

// kernel: encoder_block_forward.6
= control target key start
LH: loop header
LB: loop body
LE: loop exit
PB: predicated region body
PF: predicated region fallthrough
CT: control target
= control target key end

     0   :  { %vm83_vm0 = vcmask 1043456   ;;  %vm70_vm1 = vcmask 64512   ;;  %vm452_vm2 = vcmask 191488   ;;  %s819_s3 = inlined_call_operand.vmem [shape: bf16[8,24], index: 3, kind: input, shape index: {}]   ;;  %s820_s2 = inlined_call_operand.vmem [shape: bf16[8,24], index: 2, kind: input, shape index: {}]   ;;  %s821_s1 = inlined_call_operand.vmem [shape: bf16[64,8], index: 1, kind: input, shape index: {}]   ;;  %s822_s0 = inlined_call_operand.vmem [shape: bf16[64,8], index: 0, kind: input, shape index: {}]   ;;  %s823_s5 = inlined_call_operand.vmem [shape: bf16[8,24], index: 5, kind: input, shape index: {}]   ;;  %s824_s4 = inlined_call_operand.vmem [shape: bf16[8,24], index: 4, kind: input, shape index: {}]   ;;  %s825_s6 = inlined_call_operand.vmem [shape: f32[1,24], index: 6, kind: input, shape index: {}]   ;;  %s826_s8 = inlined_call_operand.vmem [shape: bf16[64,24], index: 8, kind: output, shape index: {0}]   ;;  %s827_s7 = inlined_call_operand.vmem [shape: f32[1,24], index: 7, kind: input, shape index: {}]   ;;  %s828_s9 = inlined_call_operand.vmem [shape: bf16[64,24], index: 9, kind: output, shape index: {1}]  }
   0x1   :  { %v49_v0 = vld [vmem:[%s819_s3] sm:$0xf]  ;;  %v633_v6 = vld [vmem:[%s821_s1 + $0x8] sm:$0xff]   ;;  %v635_v11 = vld [vmem:[%s821_s1 + $0x10] sm:$0xff]  }
   0x2   :  { %v48_v1 = vld [vmem:[%s820_s2] sm:$0xf]  ;;  %627 = vmatprep.subr.msk.bf16.mxu0 %vm83_vm0, %v49_v0  ;;  %v85_v2 = vsel %vm83_vm0, %v49_v0, 0  ;;  %v634_v7 = vld [vmem:[%s822_s0 + $0x8] sm:$0xff]   ;;  %v636_v13 = vld [vmem:[%s822_s0 + $0x10] sm:$0xff]  }
   0x3   :  { %628 = vmatprep.subr.msk.bf16.mxu1 %vm83_vm0, %v48_v1  ;;  %v185_v3 = vsel %vm83_vm0, %v48_v1, 0  ;;  %v631_v4 = vld [vmem:[%s821_s1] sm:$0xff]   ;;  %588 = vmatpush3.bf16.msra.mxu0 %v85_v2  ;;  %v637_v14 = vld [vmem:[%s821_s1 + $0x18] sm:$0xff]  }
   0x4   :  { %v632_v5 = vld [vmem:[%s822_s0] sm:$0xff]   ;;  %598 = vmatpush3.bf16.msra.mxu1 %v185_v3  ;;  %589 = vmatprep.mubr.msk.bf16.mxu0 %vm70_vm1, %v631_v4  ;;  %v638_v15 = vld [vmem:[%s822_s0 + $0x18] sm:$0xff]  }
   0x5   :  { %599 = vmatprep.mubr.msk.bf16.mxu1 %vm70_vm1, %v632_v5  ;;  %v268_v8 = vld [vmem:[%s823_s5] sm:$0xf] }
   0x6   :  { %590 = vmatmul.mubr.msk.bf16.vlgmr.msra.gmra.mxu0 %vm70_vm1, %v633_v6  ;;  %629 = vmatprep.subr.msk.bf16.mxu0 %vm83_vm0, %v268_v8  ;;  %v267_v9 = vld [vmem:[%s824_s4] sm:$0xf]  ;;  %v270_v10 = vsel %vm83_vm0, %v268_v8, 0 }
   0x7   :  { %600 = vmatmul.mubr.msk.bf16.vlgmr.msra.gmra.mxu1 %vm70_vm1, %v634_v7  ;;  %630 = vmatprep.subr.msk.bf16.mxu1 %vm83_vm0, %v267_v9  ;;  %v338_v12 = vsel %vm83_vm0, %v267_v9, 0  ;;  %v525_v18 = vld [vmem:[%s825_s6] ss:$0 sm:$0xff] }
   0x8   :  { %608 = vmatpush3.bf16.msra.mxu0 %v270_v10  ;;  %618 = vmatpush3.bf16.msra.mxu1 %v338_v12  ;;  %v534_v56 = vld [vmem:[%s827_s7] ss:$0 sm:$0xff] }
   0x9   :  { %593 = vmatprep.mubr.msk.bf16.mxu0 %vm70_vm1, %v635_v11  ;;  %603 = vmatprep.mubr.msk.bf16.mxu1 %vm70_vm1, %v636_v13 }
   0xe   :  { %594 = vmatmul.mubr.msk.bf16.gmra.mxu0 %vm70_vm1, %v637_v14 }
   0xf   :  { %604 = vmatmul.mubr.msk.bf16.gmra.mxu1 %vm70_vm1, %v638_v15  ;;  %609 = vmatprep.mubr.msk.bf16.mxu0 %vm70_vm1, %v631_v4 }
  0x10   :  { %619 = vmatprep.mubr.msk.bf16.mxu1 %vm70_vm1, %v632_v5 }
  0x16   :  { %610 = vmatmul.mubr.msk.bf16.vlgmr.msra.gmra.mxu0 %vm70_vm1, %v633_v6 }
  0x17   :  { %620 = vmatmul.mubr.msk.bf16.vlgmr.msra.gmra.mxu1 %vm70_vm1, %v634_v7  ;;  %613 = vmatprep.mubr.msk.bf16.mxu0 %vm70_vm1, %v635_v11 }
  0x18   :  { %623 = vmatprep.mubr.msk.bf16.mxu1 %vm70_vm1, %v636_v13 }
  0x1e   :  { %614 = vmatmul.mubr.msk.bf16.gmra.mxu0 %vm70_vm1, %v637_v14 }
  0x1f   :  { %624 = vmatmul.mubr.msk.bf16.gmra.mxu1 %vm70_vm1, %v638_v15 }
  0xc6   :  { %v591_v16 = vpop.f32.mrf.mxu0 }
  0xc7   :  { %v601_v17 = vpop.f32.mrf.mxu1 }
  0xc8   :  { %v230_v19 = vadd.f32 %v601_v17, %v591_v16  ;;  %v121_v20 = vpop.f32.mrf.mxu0 }
  0xc9   :  { %v221_v21 = vpop.f32.mrf.mxu1 }
  0xca   :  { %v261_v22 = vadd.f32 %v525_v18, %v230_v19  ;;  %v222_v23 = vadd.f32 %v221_v21, %v121_v20  ;;  %v592_v24 = vpop.f32.mrf.mxu0 }
  0xcb   :  { %v602_v25 = vpop.f32.mrf.mxu1 }
  0xcc   :  { %v553_v26 = vpack.c.bf16 %v261_v22, %v261_v22  ;;  %v259_v27 = vadd.f32 %v525_v18, %v222_v23  ;;  %v233_v28 = vadd.f32 %v602_v25, %v592_v24  ;;  %v124_v29 = vpop.f32.mrf.mxu0 }
  0xcd   :  { %v224_v30 = vpop.f32.mrf.mxu1 }
  0xce   :  { %455 = vst.msk [vmem:[%s826_s8 + $0x8] sm:$0xf] %vm452_vm2, %v553_v26  ;;  %v551_v31 = vpack.c.bf16 %v259_v27, %v259_v27  ;;  %v262_v32 = vadd.f32 %v525_v18, %v233_v28  ;;  %v225_v33 = vadd.f32 %v224_v30, %v124_v29  ;;  %v595_v34 = vpop.f32.mrf.mxu0 }
  0xcf   :  { %v605_v35 = vpop.f32.mrf.mxu1 }
  0xd0   :  { %453 = vst.msk [vmem:[%s826_s8] sm:$0xf] %vm452_vm2, %v551_v31  ;;  %v554_v36 = vpack.c.bf16 %v262_v32, %v262_v32  ;;  %v260_v37 = vadd.f32 %v525_v18, %v225_v33  ;;  %v246_v38 = vadd.f32 %v605_v35, %v595_v34  ;;  %v137_v39 = vpop.f32.mrf.mxu0 }
  0xd1   :  { %v237_v40 = vpop.f32.mrf.mxu1 }
  0xd2   :  { %456 = vst.msk [vmem:[%s826_s8 + $0xc] sm:$0xf] %vm452_vm2, %v554_v36  ;;  %v552_v41 = vpack.c.bf16 %v260_v37, %v260_v37  ;;  %v265_v42 = vadd.f32 %v525_v18, %v246_v38  ;;  %v238_v43 = vadd.f32 %v237_v40, %v137_v39  ;;  %v596_v44 = vpop.f32.mrf.mxu0 }
  0xd3   :  { %v606_v45 = vpop.f32.mrf.mxu1 }
  0xd4   :  { %454 = vst.msk [vmem:[%s826_s8 + $0x4] sm:$0xf] %vm452_vm2, %v552_v41  ;;  %v557_v46 = vpack.c.bf16 %v265_v42, %v265_v42  ;;  %v263_v47 = vadd.f32 %v525_v18, %v238_v43  ;;  %v249_v48 = vadd.f32 %v606_v45, %v596_v44  ;;  %v140_v49 = vpop.f32.mrf.mxu0 }
  0xd5   :  { %v240_v50 = vpop.f32.mrf.mxu1 }
  0xd6   :  { %459 = vst.msk [vmem:[%s826_s8 + $0x18] sm:$0xf] %vm452_vm2, %v557_v46  ;;  %v555_v51 = vpack.c.bf16 %v263_v47, %v263_v47  ;;  %v266_v52 = vadd.f32 %v525_v18, %v249_v48  ;;  %v241_v53 = vadd.f32 %v240_v50, %v140_v49  ;;  %v611_v54 = vpop.f32.mrf.mxu0 }
  0xd7   :  { %v621_v55 = vpop.f32.mrf.mxu1 }
  0xd8   :  { %457 = vst.msk [vmem:[%s826_s8 + $0x10] sm:$0xf] %vm452_vm2, %v555_v51  ;;  %v558_v57 = vpack.c.bf16 %v266_v52, %v266_v52  ;;  %v264_v58 = vadd.f32 %v525_v18, %v241_v53  ;;  %v383_v59 = vadd.f32 %v621_v55, %v611_v54  ;;  %v306_v60 = vpop.f32.mrf.mxu0 }
  0xd9   :  { %v374_v61 = vpop.f32.mrf.mxu1 }
  0xda   :  { %460 = vst.msk [vmem:[%s826_s8 + $0x1c] sm:$0xf] %vm452_vm2, %v558_v57  ;;  %v556_v62 = vpack.c.bf16 %v264_v58, %v264_v58  ;;  %v414_v63 = vadd.f32 %v534_v56, %v383_v59  ;;  %v375_v0 = vadd.f32 %v374_v61, %v306_v60  ;;  %v612_v1 = vpop.f32.mrf.mxu0 }
  0xdb   :  { %v622_v2 = vpop.f32.mrf.mxu1 }
  0xdc   :  { %458 = vst.msk [vmem:[%s826_s8 + $0x14] sm:$0xf] %vm452_vm2, %v556_v62  ;;  %v561_v3 = vpack.c.bf16 %v414_v63, %v414_v63  ;;  %v412_v4 = vadd.f32 %v534_v56, %v375_v0  ;;  %v386_v5 = vadd.f32 %v622_v2, %v612_v1  ;;  %v309_v6 = vpop.f32.mrf.mxu0 }
  0xdd   :  { %v377_v7 = vpop.f32.mrf.mxu1 }
  0xde   :  { %495 = vst.msk [vmem:[%s828_s9 + $0x8] sm:$0xf] %vm452_vm2, %v561_v3  ;;  %v559_v8 = vpack.c.bf16 %v412_v4, %v412_v4  ;;  %v415_v9 = vadd.f32 %v534_v56, %v386_v5  ;;  %v378_v10 = vadd.f32 %v377_v7, %v309_v6  ;;  %v615_v11 = vpop.f32.mrf.mxu0 }
  0xdf   :  { %v625_v12 = vpop.f32.mrf.mxu1 }
  0xe0   :  { %493 = vst.msk [vmem:[%s828_s9] sm:$0xf] %vm452_vm2, %v559_v8  ;;  %v562_v13 = vpack.c.bf16 %v415_v9, %v415_v9  ;;  %v413_v14 = vadd.f32 %v534_v56, %v378_v10  ;;  %v399_v15 = vadd.f32 %v625_v12, %v615_v11  ;;  %v322_v16 = vpop.f32.mrf.mxu0 }
  0xe1   :  { %v390_v17 = vpop.f32.mrf.mxu1 }
  0xe2   :  { %496 = vst.msk [vmem:[%s828_s9 + $0xc] sm:$0xf] %vm452_vm2, %v562_v13  ;;  %v560_v18 = vpack.c.bf16 %v413_v14, %v413_v14  ;;  %v418_v19 = vadd.f32 %v534_v56, %v399_v15  ;;  %v391_v20 = vadd.f32 %v390_v17, %v322_v16  ;;  %v616_v21 = vpop.f32.mrf.mxu0 }
  0xe3   :  { %v626_v22 = vpop.f32.mrf.mxu1 }
  0xe4   :  { %494 = vst.msk [vmem:[%s828_s9 + $0x4] sm:$0xf] %vm452_vm2, %v560_v18  ;;  %v565_v23 = vpack.c.bf16 %v418_v19, %v418_v19  ;;  %v416_v24 = vadd.f32 %v534_v56, %v391_v20  ;;  %v402_v25 = vadd.f32 %v626_v22, %v616_v21  ;;  %v325_v26 = vpop.f32.mrf.mxu0 }
  0xe5   :  { %v393_v27 = vpop.f32.mrf.mxu1 }
  0xe6   :  { %499 = vst.msk [vmem:[%s828_s9 + $0x18] sm:$0xf] %vm452_vm2, %v565_v23  ;;  %v563_v28 = vpack.c.bf16 %v416_v24, %v416_v24  ;;  %v419_v29 = vadd.f32 %v534_v56, %v402_v25  ;;  %v394_v30 = vadd.f32 %v393_v27, %v325_v26 }
  0xe8   :  { %497 = vst.msk [vmem:[%s828_s9 + $0x10] sm:$0xf] %vm452_vm2, %v563_v28  ;;  %v566_v31 = vpack.c.bf16 %v419_v29, %v419_v29  ;;  %v417_v32 = vadd.f32 %v534_v56, %v394_v30 }
  0xea   :  { %500 = vst.msk [vmem:[%s828_s9 + $0x1c] sm:$0xf] %vm452_vm2, %v566_v31  ;;  %v564_v33 = vpack.c.bf16 %v417_v32, %v417_v32 }
  0xec   :  { %498 = vst.msk [vmem:[%s828_s9 + $0x14] sm:$0xf] %vm452_vm2, %v564_v33 }

// kernel: encoder_block_forward.9
= control target key start
LH: loop header
LB: loop body
LE: loop exit
PB: predicated region body
PF: predicated region fallthrough
CT: control target
= control target key end

     0   :  { %v1246_v0 = vmov 0.0   ;;  %vm1247_vm0 = vmmov 0   ;;  %s1248_s25 = smov 16   ;;  %v1249_v4 = vmov 0.0|0.0   ;;  %s1252_s27 = smov 112   ;;  %vm161_vm1 = vcmask 64512   ;;  %s1601_s2 = inlined_call_operand.vmem [shape: bf16[16,48], index: 2, kind: input, shape index: {}]   ;;  %s1602_s3 = inlined_call_operand.vmem [shape: f32[1,8], index: 3, kind: input, shape index: {}]   ;;  %s1603_s4 = inlined_call_operand.vmem [shape: f32[1,8], index: 4, kind: input, shape index: {}]   ;;  %s1604_s0 = inlined_call_operand.vmem [shape: bf16[8,8,24], index: 0, kind: input, shape index: {}]   ;;  %s1605_s1 = inlined_call_operand.vmem [shape: bf16[8,8,24], index: 1, kind: input, shape index: {}]   ;;  %s1606_s5 = inlined_call_operand.vmem [shape: f32[8,8,8], index: 5, kind: output, shape index: {0}]   ;;  %s1607_s6 = inlined_call_operand.vmem [shape: f32[8,8,8], index: 6, kind: output, shape index: {1}]  }
   0x1   :  { %1092 = vmatprep.subr.bf16.mxu0 %v1246_v0  ;;  %v1294_v1 = vld [vmem:[%s1601_s2] sm:$0xff]   ;;  %1094 = vmatprep.mubr.msk.bf16.mxu0 %vm1247_vm0, %v1246_v0  ;;  %s1253_s28 = smov 104   ;;  %v1023_v19 = vld [vmem:[%s1605_s1 + $0x1c] sm:$0xf]  ;;  %s1254_s9 = smov 120   ;;  %vm34_vm2 = vcmask 130048  }
   0x2   :  { %v1025_v2 = vld [vmem:[%s1602_s3] ss:$0 sm:$0xff]  ;;  %1098 = vmatprep.subr.bf16.mxu1 %v1246_v0  ;;  %1100 = vmatprep.mubr.msk.bf16.mxu1 %vm1247_vm0, %v1246_v0  ;;  %s1250_s3 = smov 40   ;;  %v82_v23 = vunpack.c.l.bf16 %v1023_v19  ;;  %v1360_v57 = vld [vmem:[%s1604_s0 + $0x4] sm:$0xff]   ;;  %v1366_v63 = vld [vmem:[%s1605_s1 + $0x14] sm:$0xff]  }
   0x3   :  { %1093 = vmatpush3.bf16.msra.mxu0 %v1294_v1  ;;  %95 = vrot.lane.b32.xlu0 %v1025_v2, %s1248_s25  ;;  %v1027_v3 = vld [vmem:[%s1603_s4] ss:$0 sm:$0xff]  ;;  %s1251_s4 = smov 88   ;;  %v216_v58 = vunpack.c.l.bf16 %v1360_v57  ;;  %v219_v2 = vunpack.c.h.bf16 %v1366_v63 }
   0x4   :  { %1099 = vmatpush3.bf16.msra.mxu1 %v1294_v1  ;;  %1104 = vmatprep.subr.bf16.mxu0 %v1246_v0  ;;  %v78_v13 = vld [vmem:[%s1604_s0] sm:$0xf] }
   0x5   :  { %1110 = vmatprep.subr.bf16.mxu1 %v1246_v0  ;;  %v79_v14 = vunpack.c.l.bf16 %v78_v13 }
   0x6   :  { %1095 = vmatmul.mubr.bf16.vlgmr.msra.gmra.mxu0 %v1249_v4 }
   0x7   :  { %134 = vrot.lane.b32.xlu0 %v1027_v3, %s1250_s3  ;;  %1105 = vmatpush3.bf16.msra.mxu0 %v1294_v1 }
   0x8   :  { %1106 = vmatprep.mubr.msk.bf16.mxu0 %vm1247_vm0, %v1246_v0  ;;  %1116 = vmatprep.subr.bf16.mxu0 %v1246_v0 }
  0x75   :  { %v1316_v5 = vpop.permute.xlu0 %95 }
  0x79   :  { %v1318_v6 = vpop.permute.xlu0 %134 }
  0xc6   :  { %v72_v7 = vpop.f32.mrf.mxu0 }
  0xc7   :  { %v137_v8 = vadd.f32 %v1318_v6, %v72_v7  ;;  %v98_v9 = vadd.f32 %v1316_v5, %v72_v7  ;;  %v83_v15 = vadd.f32 %v79_v14, %v72_v7 }
  0xc8   :  { %v1096_v10 = vpop.f32.mrf.mxu0 }
  0xc9   :  { %139 = vrot.lane.b32.xlu0 %v137_v8, %s1251_s4  ;;  %100 = vrot.lane.b32.xlu1 %v98_v9, %s1252_s27  ;;  %v1024_v16 = vmul.f32 -1.442695, %v83_v15 }
  0xca   :  { %v75_v11 = vpop.f32.mrf.mxu0 }
  0xcb   :  { %1150 = vpow2.f32 %v1024_v16 }
  0xcc   :  { %v1097_v12 = vpop.f32.mrf.mxu0 }
  0xcd   :  { %119 = vrot.lane.b32.xlu1 %v72_v7, %s1253_s28 }
  0xd8   :  { %v1151_v17 = vpop.eup %1150 }
  0xd9   :  { %v87_v18 = vadd.f32 1.0, %v1151_v17 }
  0xdb   :  { %1152 = vrcp.f32 %v87_v18 }
  0xe8   :  { %v1153_v20 = vpop.eup %1152 }
  0xe9   :  { %v110_v38 = vsub.f32 1.0, %v1153_v20  ;;  %v116_v40 = vmul.f32 0.0, %v1153_v20 }
 0x13b   :  { %v101_v21 = vpop.permute.xlu1 %100  ;;  %v140_v30 = vpop.permute.xlu0 %139 }
 0x13c   :  { %v103_v22 = vmul.f32 %v1153_v20, %v101_v21 }
 0x13e   :  { %105 = vrot.lane.b32.xlu1 %v103_v22, %s1248_s25 }
 0x13f   :  { %v120_v24 = vpop.permute.xlu1 %119 }
 0x140   :  { %v122_v25 = vadd.f32 %v120_v24, %v82_v23 }
 0x142   :  { %v1026_v26 = vmul.f32 -1.442695, %v122_v25 }
 0x144   :  { %1154 = vpow2.f32 %v1026_v26 }
 0x151   :  { %v1155_v27 = vpop.eup %1154 }
 0x152   :  { %v126_v28 = vadd.f32 1.0, %v1155_v27 }
 0x154   :  { %1156 = vrcp.f32 %v126_v28 }
 0x161   :  { %v1157_v29 = vpop.eup %1156 }
 0x162   :  { %v142_v31 = vmul.f32 %v1157_v29, %v140_v30  ;;  %v149_v44 = vsub.f32 1.0, %v1157_v29  ;;  %v155_v46 = vmul.f32 0.0, %v1157_v29 }
 0x164   :  { %144 = vrot.lane.b32.xlu0 %v142_v31, %s1248_s25 }
 0x1b0   :  { %v106_v32 = vpop.permute.xlu1 %105 }
 0x1b1   :  { %v108_v33 = vadd.f32 %v106_v32, %v79_v14 }
 0x1b3   :  { %1158 = vtanh.f32 %v108_v33 }
 0x1c0   :  { %v1159_v34 = vpop.eup %1158 }
 0x1c1   :  { %112 = vrot.lane.b32.xlu1 %v1159_v34, %s1254_s9 }
 0x1d6   :  { %v145_v35 = vpop.permute.xlu0 %144 }
 0x1d7   :  { %v147_v36 = vadd.f32 %v145_v35, %v82_v23 }
 0x1d9   :  { %1160 = vtanh.f32 %v147_v36 }
 0x1e6   :  { %v1161_v37 = vpop.eup %1160 }
 0x1e7   :  { %151 = vrot.lane.b32.xlu0 %v1161_v37, %s1254_s9 }
 0x233   :  { %v113_v39 = vpop.permute.xlu1 %112 }
 0x234   :  { %v115_v41 = vmul.f32 %v113_v39, %v110_v38 }
 0x236   :  { %v1335_v42 = vadd.f32 %v116_v40, %v115_v41  ;;  %v337_v41 = vunpack.c.h.bf16 %v1360_v57 }
 0x238   :  { %158 = vrot.lane.b32.xlu1 %v1335_v42, %s1254_s9 }
 0x259   :  { %v152_v43 = vpop.permute.xlu0 %151 }
 0x25a   :  { %v154_v45 = vmul.f32 %v152_v43, %v149_v44 }
 0x25c   :  { %v1339_v47 = vadd.f32 %v155_v46, %v154_v45  ;;  %v340_v46 = vunpack.c.l.bf16 %v1366_v63 }
 0x2aa   :  { %v159_v48 = vpop.permute.xlu1 %158 }
 0x2ab   :  { %162 = vst.msk [vmem:[%s1606_s5] sm:$0xff] %vm161_vm1, %v159_v48  ;;  %v169_v49 = vsel %vm161_vm1, %v159_v48, %v1339_v47 }
 0x2ac   :  { %v170_v50 = vpack.c.bf16 %v169_v49, %v169_v49 }
 0x2ae   :  { %1101 = vmatmul.mubr.msk.bf16.vlgmr.msra.gmra.mxu1 %vm34_vm2, %v170_v50 }
 0x2af   :  { %1111 = vmatpush3.bf16.msra.mxu1 %v1294_v1  ;;  %1112 = vmatprep.mubr.msk.bf16.mxu1 %vm1247_vm0, %v1246_v0 }
 0x2b0   :  { %1122 = vmatprep.subr.bf16.mxu1 %v1246_v0 }
 0x36e   :  { %v208_v51 = vpop.f32.mrf.mxu1 }
 0x36f   :  { %248 = vrot.lane.b32.xlu1 %v208_v51, %s1253_s28  ;;  %v227_v52 = vadd.f32 %v208_v51, %v1316_v5  ;;  %v258_v55 = vadd.f32 %v208_v51, %v1318_v6  ;;  %v220_v59 = vadd.f32 %v216_v58, %v208_v51 }
 0x370   :  { %v1102_v53 = vpop.f32.mrf.mxu1 }
 0x371   :  { %229 = vrot.lane.b32.xlu0 %v227_v52, %s1252_s27  ;;  %v1032_v60 = vmul.f32 -1.442695, %v220_v59 }
 0x372   :  { %v211_v54 = vpop.f32.mrf.mxu1 }
 0x373   :  { %1162 = vpow2.f32 %v1032_v60 }
 0x374   :  { %v1103_v56 = vpop.f32.mrf.mxu1 }
 0x375   :  { %260 = vrot.lane.b32.xlu0 %v258_v55, %s1251_s4 }
 0x380   :  { %v1163_v61 = vpop.eup %1162 }
 0x381   :  { %v224_v62 = vadd.f32 1.0, %v1163_v61 }
 0x383   :  { %1164 = vrcp.f32 %v224_v62 }
 0x390   :  { %v1165_v7 = vpop.eup %1164 }
 0x391   :  { %v239_v22 = vsub.f32 1.0, %v1165_v7  ;;  %v245_v24 = vmul.f32 %v1165_v7, %v1335_v42 }
 0x3e1   :  { %v249_v3 = vpop.permute.xlu1 %248 }
 0x3e2   :  { %v251_v4 = vadd.f32 %v249_v3, %v219_v2 }
 0x3e3   :  { %v230_v8 = vpop.permute.xlu0 %229 }
 0x3e4   :  { %v1033_v9 = vmul.f32 -1.442695, %v251_v4  ;;  %v232_v10 = vmul.f32 %v1165_v7, %v230_v8 }
 0x3e6   :  { %1166 = vpow2.f32 %v1033_v9  ;;  %234 = vrot.lane.b32.xlu1 %v232_v10, %s1248_s25 }
 0x3e7   :  { %v261_v14 = vpop.permute.xlu0 %260 }
 0x3f3   :  { %v1167_v11 = vpop.eup %1166 }
 0x3f4   :  { %v255_v12 = vadd.f32 1.0, %v1167_v11 }
 0x3f6   :  { %1168 = vrcp.f32 %v255_v12 }
 0x403   :  { %v1169_v13 = vpop.eup %1168 }
 0x404   :  { %v263_v15 = vmul.f32 %v1169_v13, %v261_v14  ;;  %v270_v28 = vsub.f32 1.0, %v1169_v13  ;;  %v276_v30 = vmul.f32 %v1169_v13, %v1339_v47 }
 0x406   :  { %265 = vrot.lane.b32.xlu0 %v263_v15, %s1248_s25 }
 0x458   :  { %v235_v16 = vpop.permute.xlu1 %234 }
 0x459   :  { %v237_v17 = vadd.f32 %v235_v16, %v216_v58 }
 0x45b   :  { %1170 = vtanh.f32 %v237_v17 }
 0x468   :  { %v1171_v18 = vpop.eup %1170 }
 0x469   :  { %241 = vrot.lane.b32.xlu1 %v1171_v18, %s1254_s9 }
 0x478   :  { %v266_v19 = vpop.permute.xlu0 %265 }
 0x479   :  { %v268_v20 = vadd.f32 %v266_v19, %v219_v2 }
 0x47b   :  { %1172 = vtanh.f32 %v268_v20 }
 0x488   :  { %v1173_v21 = vpop.eup %1172 }
 0x489   :  { %272 = vrot.lane.b32.xlu0 %v1173_v21, %s1254_s9 }
 0x4db   :  { %v242_v23 = vpop.permute.xlu1 %241 }
 0x4dc   :  { %v244_v25 = vmul.f32 %v242_v23, %v239_v22 }
 0x4de   :  { %v246_v26 = vadd.f32 %v245_v24, %v244_v25  ;;  %v1423_v24 = vld [vmem:[%s1604_s0 + $0xc] sm:$0xff]  }
 0x4df   :  { %v458_v25 = vunpack.c.l.bf16 %v1423_v24 }
 0x4e0   :  { %279 = vrot.lane.b32.xlu1 %v246_v26, %s1254_s9 }
 0x4fb   :  { %v273_v27 = vpop.permute.xlu0 %272 }
 0x4fc   :  { %v275_v29 = vmul.f32 %v273_v27, %v270_v28 }
 0x4fe   :  { %v1376_v31 = vadd.f32 %v276_v30, %v275_v29  ;;  %v1429_v30 = vld [vmem:[%s1605_s1 + $0xc] sm:$0xff]  }
 0x552   :  { %v280_v32 = vpop.permute.xlu1 %279 }
 0x553   :  { %1034 = vst.msk [vmem:[%s1606_s5 + $0x8] sm:$0xff] %vm161_vm1, %v280_v32  ;;  %v290_v33 = vsel %vm161_vm1, %v280_v32, %v1376_v31  ;;  %v461_v32 = vunpack.c.h.bf16 %v1429_v30 }
 0x554   :  { %v291_v34 = vpack.c.bf16 %v290_v33, %v290_v33 }
 0x556   :  { %1107 = vmatmul.mubr.msk.bf16.vlgmr.msra.gmra.mxu0 %vm34_vm2, %v291_v34 }
 0x557   :  { %1117 = vmatpush3.bf16.msra.mxu0 %v1294_v1  ;;  %1118 = vmatprep.mubr.msk.bf16.mxu0 %vm1247_vm0, %v1246_v0 }
 0x558   :  { %1128 = vmatprep.subr.bf16.mxu0 %v1246_v0 }
 0x616   :  { %v329_v35 = vpop.f32.mrf.mxu0 }
 0x617   :  { %369 = vrot.lane.b32.xlu1 %v329_v35, %s1253_s28  ;;  %v348_v36 = vadd.f32 %v329_v35, %v1316_v5  ;;  %v379_v39 = vadd.f32 %v329_v35, %v1318_v6  ;;  %v341_v42 = vadd.f32 %v337_v41, %v329_v35 }
 0x618   :  { %v1108_v37 = vpop.f32.mrf.mxu0 }
 0x619   :  { %350 = vrot.lane.b32.xlu0 %v348_v36, %s1252_s27  ;;  %v1039_v43 = vmul.f32 -1.442695, %v341_v42 }
 0x61a   :  { %v332_v38 = vpop.f32.mrf.mxu0 }
 0x61b   :  { %1174 = vpow2.f32 %v1039_v43 }
 0x61c   :  { %v1109_v40 = vpop.f32.mrf.mxu0 }
 0x61d   :  { %381 = vrot.lane.b32.xlu0 %v379_v39, %s1251_s4 }
 0x628   :  { %v1175_v44 = vpop.eup %1174 }
 0x629   :  { %v345_v45 = vadd.f32 1.0, %v1175_v44 }
 0x62b   :  { %1176 = vrcp.f32 %v345_v45 }
 0x638   :  { %v1177_v50 = vpop.eup %1176 }
 0x639   :  { %v360_v3 = vsub.f32 1.0, %v1177_v50  ;;  %v366_v7 = vmul.f32 %v1177_v50, %v246_v26 }
 0x689   :  { %v370_v48 = vpop.permute.xlu1 %369 }
 0x68a   :  { %v372_v49 = vadd.f32 %v370_v48, %v340_v46 }
 0x68b   :  { %v351_v51 = vpop.permute.xlu0 %350 }
 0x68c   :  { %v1040_v52 = vmul.f32 -1.442695, %v372_v49  ;;  %v353_v53 = vmul.f32 %v1177_v50, %v351_v51 }
 0x68e   :  { %1178 = vpow2.f32 %v1040_v52  ;;  %355 = vrot.lane.b32.xlu1 %v353_v53, %s1248_s25 }
 0x68f   :  { %v382_v57 = vpop.permute.xlu0 %381 }
 0x69b   :  { %v1179_v54 = vpop.eup %1178 }
 0x69c   :  { %v376_v55 = vadd.f32 1.0, %v1179_v54 }
 0x69e   :  { %1180 = vrcp.f32 %v376_v55 }
 0x6ab   :  { %v1181_v56 = vpop.eup %1180 }
 0x6ac   :  { %v384_v58 = vmul.f32 %v1181_v56, %v382_v57  ;;  %v391_v11 = vsub.f32 1.0, %v1181_v56  ;;  %v397_v13 = vmul.f32 %v1181_v56, %v1376_v31 }
 0x6ae   :  { %386 = vrot.lane.b32.xlu0 %v384_v58, %s1248_s25 }
 0x700   :  { %v356_v59 = vpop.permute.xlu1 %355 }
 0x701   :  { %v358_v60 = vadd.f32 %v356_v59, %v337_v41 }
 0x703   :  { %1182 = vtanh.f32 %v358_v60 }
 0x710   :  { %v1183_v61 = vpop.eup %1182 }
 0x711   :  { %362 = vrot.lane.b32.xlu1 %v1183_v61, %s1254_s9 }
 0x720   :  { %v387_v62 = vpop.permute.xlu0 %386 }
 0x721   :  { %v389_v63 = vadd.f32 %v387_v62, %v340_v46 }
 0x723   :  { %1184 = vtanh.f32 %v389_v63 }
 0x730   :  { %v1185_v2 = vpop.eup %1184 }
 0x731   :  { %393 = vrot.lane.b32.xlu0 %v1185_v2, %s1254_s9 }
 0x783   :  { %v363_v4 = vpop.permute.xlu1 %362 }
 0x784   :  { %v365_v8 = vmul.f32 %v363_v4, %v360_v3 }
 0x786   :  { %v367_v9 = vadd.f32 %v366_v7, %v365_v8 }
 0x788   :  { %400 = vrot.lane.b32.xlu1 %v367_v9, %s1254_s9 }
 0x7a3   :  { %v394_v10 = vpop.permute.xlu0 %393 }
 0x7a4   :  { %v396_v12 = vmul.f32 %v394_v10, %v391_v11  ;;  %v579_v10 = vunpack.c.h.bf16 %v1423_v24 }
 0x7a6   :  { %v1402_v14 = vadd.f32 %v397_v13, %v396_v12 }
 0x7fa   :  { %v401_v15 = vpop.permute.xlu1 %400 }
 0x7fb   :  { %1041 = vst.msk [vmem:[%s1606_s5 + $0x10] sm:$0xff] %vm161_vm1, %v401_v15  ;;  %v411_v16 = vsel %vm161_vm1, %v401_v15, %v1402_v14 }
 0x7fc   :  { %v412_v17 = vpack.c.bf16 %v411_v16, %v411_v16  ;;  %v582_v16 = vunpack.c.l.bf16 %v1429_v30 }
 0x7fe   :  { %1113 = vmatmul.mubr.msk.bf16.vlgmr.msra.gmra.mxu1 %vm34_vm2, %v412_v17 }
 0x7ff   :  { %1123 = vmatpush3.bf16.msra.mxu1 %v1294_v1  ;;  %1124 = vmatprep.mubr.msk.bf16.mxu1 %vm1247_vm0, %v1246_v0 }
 0x800   :  { %1134 = vmatprep.subr.bf16.mxu1 %v1246_v0 }
 0x8be   :  { %v450_v18 = vpop.f32.mrf.mxu1 }
 0x8bf   :  { %490 = vrot.lane.b32.xlu1 %v450_v18, %s1253_s28  ;;  %v469_v19 = vadd.f32 %v450_v18, %v1316_v5  ;;  %v500_v22 = vadd.f32 %v450_v18, %v1318_v6  ;;  %v462_v26 = vadd.f32 %v458_v25, %v450_v18 }
 0x8c0   :  { %v1114_v20 = vpop.f32.mrf.mxu1 }
 0x8c1   :  { %471 = vrot.lane.b32.xlu0 %v469_v19, %s1252_s27  ;;  %v1046_v27 = vmul.f32 -1.442695, %v462_v26 }
 0x8c2   :  { %v453_v21 = vpop.f32.mrf.mxu1 }
 0x8c3   :  { %1186 = vpow2.f32 %v1046_v27 }
 0x8c4   :  { %v1115_v23 = vpop.f32.mrf.mxu1 }
 0x8c5   :  { %502 = vrot.lane.b32.xlu0 %v500_v22, %s1251_s4 }
 0x8d0   :  { %v1187_v28 = vpop.eup %1186 }
 0x8d1   :  { %v466_v29 = vadd.f32 1.0, %v1187_v28 }
 0x8d3   :  { %1188 = vrcp.f32 %v466_v29 }
 0x8e0   :  { %v1189_v35 = vpop.eup %1188 }
 0x8e1   :  { %v481_v51 = vsub.f32 1.0, %v1189_v35  ;;  %v487_v53 = vmul.f32 %v1189_v35, %v367_v9 }
 0x931   :  { %v491_v33 = vpop.permute.xlu1 %490 }
 0x932   :  { %v493_v34 = vadd.f32 %v491_v33, %v461_v32 }
 0x933   :  { %v472_v36 = vpop.permute.xlu0 %471 }
 0x934   :  { %v1047_v37 = vmul.f32 -1.442695, %v493_v34  ;;  %v474_v38 = vmul.f32 %v1189_v35, %v472_v36 }
 0x936   :  { %1190 = vpow2.f32 %v1047_v37  ;;  %476 = vrot.lane.b32.xlu1 %v474_v38, %s1248_s25 }
 0x937   :  { %v503_v42 = vpop.permute.xlu0 %502 }
 0x943   :  { %v1191_v39 = vpop.eup %1190 }
 0x944   :  { %v497_v40 = vadd.f32 1.0, %v1191_v39 }
 0x946   :  { %1192 = vrcp.f32 %v497_v40 }
 0x953   :  { %v1193_v41 = vpop.eup %1192 }
 0x954   :  { %v505_v43 = vmul.f32 %v1193_v41, %v503_v42  ;;  %v512_v57 = vsub.f32 1.0, %v1193_v41  ;;  %v518_v59 = vmul.f32 %v1193_v41, %v1402_v14 }
 0x956   :  { %507 = vrot.lane.b32.xlu0 %v505_v43, %s1248_s25 }
 0x9a8   :  { %v477_v44 = vpop.permute.xlu1 %476 }
 0x9a9   :  { %v479_v45 = vadd.f32 %v477_v44, %v458_v25 }
 0x9ab   :  { %1194 = vtanh.f32 %v479_v45 }
 0x9b8   :  { %v1195_v46 = vpop.eup %1194 }
 0x9b9   :  { %483 = vrot.lane.b32.xlu1 %v1195_v46, %s1254_s9 }
 0x9c8   :  { %v508_v48 = vpop.permute.xlu0 %507 }
 0x9c9   :  { %v510_v49 = vadd.f32 %v508_v48, %v461_v32 }
 0x9cb   :  { %1196 = vtanh.f32 %v510_v49 }
 0x9d8   :  { %v1197_v50 = vpop.eup %1196 }
 0x9d9   :  { %514 = vrot.lane.b32.xlu0 %v1197_v50, %s1254_s9 }
 0xa2b   :  { %v484_v52 = vpop.permute.xlu1 %483 }
 0xa2c   :  { %v486_v54 = vmul.f32 %v484_v52, %v481_v51 }
 0xa2e   :  { %v488_v55 = vadd.f32 %v487_v53, %v486_v54 }
 0xa30   :  { %521 = vrot.lane.b32.xlu1 %v488_v55, %s1254_s9 }
 0xa4b   :  { %v515_v56 = vpop.permute.xlu0 %514 }
 0xa4c   :  { %v517_v58 = vmul.f32 %v515_v56, %v512_v57 }
 0xa4e   :  { %v1438_v60 = vadd.f32 %v518_v59, %v517_v58  ;;  %v1489_v59 = vld [vmem:[%s1605_s1 + $0x4] sm:$0xff]  }
 0xaa2   :  { %v522_v61 = vpop.permute.xlu1 %521 }
 0xaa3   :  { %1048 = vst.msk [vmem:[%s1606_s5 + $0x18] sm:$0xff] %vm161_vm1, %v522_v61  ;;  %v532_v62 = vsel %vm161_vm1, %v522_v61, %v1438_v60  ;;  %v703_v61 = vunpack.c.h.bf16 %v1489_v59 }
 0xaa4   :  { %v533_v63 = vpack.c.bf16 %v532_v62, %v532_v62 }
 0xaa6   :  { %1119 = vmatmul.mubr.msk.bf16.vlgmr.msra.gmra.mxu0 %vm34_vm2, %v533_v63 }
 0xaa7   :  { %1129 = vmatpush3.bf16.msra.mxu0 %v1294_v1  ;;  %1130 = vmatprep.mubr.msk.bf16.mxu0 %vm1247_vm0, %v1246_v0 }
 0xb66   :  { %v571_v2 = vpop.f32.mrf.mxu0 }
 0xb67   :  { %611 = vrot.lane.b32.xlu1 %v571_v2, %s1253_s28  ;;  %v590_v3 = vadd.f32 %v571_v2, %v1316_v5  ;;  %v621_v8 = vadd.f32 %v571_v2, %v1318_v6  ;;  %v583_v11 = vadd.f32 %v579_v10, %v571_v2 }
 0xb68   :  { %v1120_v4 = vpop.f32.mrf.mxu0 }
 0xb69   :  { %592 = vrot.lane.b32.xlu0 %v590_v3, %s1252_s27  ;;  %v1053_v12 = vmul.f32 -1.442695, %v583_v11 }
 0xb6a   :  { %v574_v7 = vpop.f32.mrf.mxu0 }
 0xb6b   :  { %1198 = vpow2.f32 %v1053_v12 }
 0xb6c   :  { %v1121_v9 = vpop.f32.mrf.mxu0 }
 0xb6d   :  { %623 = vrot.lane.b32.xlu0 %v621_v8, %s1251_s4 }
 0xb78   :  { %v1199_v13 = vpop.eup %1198 }
 0xb79   :  { %v587_v15 = vadd.f32 1.0, %v1199_v13 }
 0xb7b   :  { %1200 = vrcp.f32 %v587_v15 }
 0xb88   :  { %v1201_v19 = vpop.eup %1200 }
 0xb89   :  { %v602_v35 = vsub.f32 1.0, %v1201_v19  ;;  %v608_v37 = vmul.f32 %v1201_v19, %v488_v55 }
 0xbd9   :  { %v612_v17 = vpop.permute.xlu1 %611 }
 0xbda   :  { %v614_v18 = vadd.f32 %v612_v17, %v582_v16 }
 0xbdb   :  { %v593_v20 = vpop.permute.xlu0 %592 }
 0xbdc   :  { %v1054_v21 = vmul.f32 -1.442695, %v614_v18  ;;  %v595_v22 = vmul.f32 %v1201_v19, %v593_v20 }
 0xbde   :  { %1202 = vpow2.f32 %v1054_v21  ;;  %597 = vrot.lane.b32.xlu1 %v595_v22, %s1248_s25 }
 0xbdf   :  { %v624_v26 = vpop.permute.xlu0 %623 }
 0xbeb   :  { %v1203_v23 = vpop.eup %1202 }
 0xbec   :  { %v618_v25 = vadd.f32 1.0, %v1203_v23 }
 0xbee   :  { %1204 = vrcp.f32 %v618_v25 }
 0xbfb   :  { %v1205_v24 = vpop.eup %1204 }
 0xbfc   :  { %v626_v27 = vmul.f32 %v1205_v24, %v624_v26  ;;  %v633_v41 = vsub.f32 1.0, %v1205_v24  ;;  %v639_v43 = vmul.f32 %v1205_v24, %v1438_v60 }
 0xbfe   :  { %628 = vrot.lane.b32.xlu0 %v626_v27, %s1248_s25 }
 0xc50   :  { %v598_v28 = vpop.permute.xlu1 %597 }
 0xc51   :  { %v600_v29 = vadd.f32 %v598_v28, %v579_v10 }
 0xc53   :  { %1206 = vtanh.f32 %v600_v29 }
 0xc60   :  { %v1207_v30 = vpop.eup %1206 }
 0xc61   :  { %604 = vrot.lane.b32.xlu1 %v1207_v30, %s1254_s9 }
 0xc70   :  { %v629_v32 = vpop.permute.xlu0 %628 }
 0xc71   :  { %v631_v33 = vadd.f32 %v629_v32, %v582_v16 }
 0xc73   :  { %1208 = vtanh.f32 %v631_v33 }
 0xc80   :  { %v1209_v34 = vpop.eup %1208 }
 0xc81   :  { %635 = vrot.lane.b32.xlu0 %v1209_v34, %s1254_s9 }
 0xcd3   :  { %v605_v36 = vpop.permute.xlu1 %604 }
 0xcd4   :  { %v607_v38 = vmul.f32 %v605_v36, %v602_v35 }
 0xcd6   :  { %v609_v39 = vadd.f32 %v608_v37, %v607_v38 }
 0xcd8   :  { %642 = vrot.lane.b32.xlu1 %v609_v39, %s1254_s9 }
 0xcf3   :  { %v636_v40 = vpop.permute.xlu0 %635 }
 0xcf4   :  { %v638_v42 = vmul.f32 %v636_v40, %v633_v41 }
 0xcf6   :  { %v1463_v44 = vadd.f32 %v639_v43, %v638_v42 }
 0xd4a   :  { %v643_v45 = vpop.permute.xlu1 %642 }
 0xd4b   :  { %1055 = vst.msk [vmem:[%s1606_s5 + $0x20] sm:$0xff] %vm161_vm1, %v643_v45  ;;  %v653_v46 = vsel %vm161_vm1, %v643_v45, %v1463_v44 }
 0xd4c   :  { %v654_v48 = vpack.c.bf16 %v653_v46, %v653_v46  ;;  %v824_v46 = vunpack.c.l.bf16 %v1489_v59 }
 0xd4e   :  { %1125 = vmatmul.mubr.msk.bf16.vlgmr.msra.gmra.mxu1 %vm34_vm2, %v654_v48 }
 0xd4f   :  { %1135 = vmatpush3.bf16.msra.mxu1 %v1294_v1  ;;  %1136 = vmatprep.mubr.msk.bf16.mxu1 %vm1247_vm0, %v1246_v0  ;;  %v1483_v1 = vld [vmem:[%s1604_s0 + $0x14] sm:$0xff]  }
 0xd50   :  { %v700_v0 = vunpack.c.l.bf16 %v1483_v1  ;;  %v821_v40 = vunpack.c.h.bf16 %v1483_v1 }
 0xe0e   :  { %v692_v49 = vpop.f32.mrf.mxu1 }
 0xe0f   :  { %732 = vrot.lane.b32.xlu1 %v692_v49, %s1253_s28  ;;  %v711_v50 = vadd.f32 %v692_v49, %v1316_v5  ;;  %v742_v53 = vadd.f32 %v692_v49, %v1318_v6  ;;  %v704_v55 = vadd.f32 %v700_v0, %v692_v49 }
 0xe10   :  { %v1126_v51 = vpop.f32.mrf.mxu1 }
 0xe11   :  { %713 = vrot.lane.b32.xlu0 %v711_v50, %s1252_s27  ;;  %v1060_v56 = vmul.f32 -1.442695, %v704_v55 }
 0xe12   :  { %v695_v52 = vpop.f32.mrf.mxu1 }
 0xe13   :  { %1210 = vpow2.f32 %v1060_v56 }
 0xe14   :  { %v1127_v54 = vpop.f32.mrf.mxu1 }
 0xe15   :  { %744 = vrot.lane.b32.xlu0 %v742_v53, %s1251_s4 }
 0xe20   :  { %v1211_v57 = vpop.eup %1210 }
 0xe21   :  { %v708_v58 = vadd.f32 1.0, %v1211_v57 }
 0xe23   :  { %1212 = vrcp.f32 %v708_v58 }
 0xe30   :  { %v1213_v2 = vpop.eup %1212 }
 0xe31   :  { %v723_v20 = vsub.f32 1.0, %v1213_v2  ;;  %v729_v22 = vmul.f32 %v1213_v2, %v609_v39 }
 0xe81   :  { %v733_v62 = vpop.permute.xlu1 %732 }
 0xe82   :  { %v735_v63 = vadd.f32 %v733_v62, %v703_v61 }
 0xe83   :  { %v714_v3 = vpop.permute.xlu0 %713 }
 0xe84   :  { %v1061_v4 = vmul.f32 -1.442695, %v735_v63  ;;  %v716_v7 = vmul.f32 %v1213_v2, %v714_v3 }
 0xe86   :  { %1214 = vpow2.f32 %v1061_v4  ;;  %718 = vrot.lane.b32.xlu1 %v716_v7, %s1248_s25 }
 0xe87   :  { %v745_v11 = vpop.permute.xlu0 %744 }
 0xe93   :  { %v1215_v8 = vpop.eup %1214 }
 0xe94   :  { %v739_v9 = vadd.f32 1.0, %v1215_v8 }
 0xe96   :  { %1216 = vrcp.f32 %v739_v9 }
 0xea3   :  { %v1217_v10 = vpop.eup %1216 }
 0xea4   :  { %v747_v12 = vmul.f32 %v1217_v10, %v745_v11  ;;  %v754_v26 = vsub.f32 1.0, %v1217_v10  ;;  %v760_v28 = vmul.f32 %v1217_v10, %v1463_v44 }
 0xea6   :  { %749 = vrot.lane.b32.xlu0 %v747_v12, %s1248_s25 }
 0xef8   :  { %v719_v13 = vpop.permute.xlu1 %718 }
 0xef9   :  { %v721_v15 = vadd.f32 %v719_v13, %v700_v0 }
 0xefb   :  { %1218 = vtanh.f32 %v721_v15 }
 0xf08   :  { %v1219_v16 = vpop.eup %1218 }
 0xf09   :  { %725 = vrot.lane.b32.xlu1 %v1219_v16, %s1254_s9 }
 0xf18   :  { %v750_v17 = vpop.permute.xlu0 %749 }
 0xf19   :  { %v752_v18 = vadd.f32 %v750_v17, %v703_v61 }
 0xf1b   :  { %1220 = vtanh.f32 %v752_v18 }
 0xf28   :  { %v1221_v19 = vpop.eup %1220 }
 0xf29   :  { %756 = vrot.lane.b32.xlu0 %v1221_v19, %s1254_s9 }
 0xf7b   :  { %v726_v21 = vpop.permute.xlu1 %725 }
 0xf7c   :  { %v728_v23 = vmul.f32 %v726_v21, %v723_v20 }
 0xf7e   :  { %v730_v25 = vadd.f32 %v729_v22, %v728_v23 }
 0xf80   :  { %763 = vrot.lane.b32.xlu1 %v730_v25, %s1254_s9 }
 0xf9b   :  { %v757_v24 = vpop.permute.xlu0 %756 }
 0xf9c   :  { %v759_v27 = vmul.f32 %v757_v24, %v754_v26 }
 0xf9e   :  { %v1498_v29 = vadd.f32 %v760_v28, %v759_v27 }
 0xff2   :  { %v764_v30 = vpop.permute.xlu1 %763 }
 0xff3   :  { %1062 = vst.msk [vmem:[%s1606_s5 + $0x28] sm:$0xff] %vm161_vm1, %v764_v30  ;;  %v774_v32 = vsel %vm161_vm1, %v764_v30, %v1498_v29 }
 0xff4   :  { %v775_v33 = vpack.c.bf16 %v774_v32, %v774_v32 }
 0xff6   :  { %1131 = vmatmul.mubr.msk.bf16.vlgmr.msra.gmra.mxu0 %vm34_vm2, %v775_v33 }
0x10b6   :  { %v813_v34 = vpop.f32.mrf.mxu0 }
0x10b7   :  { %853 = vrot.lane.b32.xlu1 %v813_v34, %s1253_s28  ;;  %v832_v35 = vadd.f32 %v813_v34, %v1316_v5  ;;  %v863_v38 = vadd.f32 %v813_v34, %v1318_v6  ;;  %v825_v41 = vadd.f32 %v821_v40, %v813_v34 }
0x10b8   :  { %v1132_v36 = vpop.f32.mrf.mxu0 }
0x10b9   :  { %834 = vrot.lane.b32.xlu0 %v832_v35, %s1252_s27  ;;  %v1067_v42 = vmul.f32 -1.442695, %v825_v41 }
0x10ba   :  { %v816_v37 = vpop.f32.mrf.mxu0 }
0x10bb   :  { %1222 = vpow2.f32 %v1067_v42 }
0x10bc   :  { %v1133_v39 = vpop.f32.mrf.mxu0 }
0x10bd   :  { %865 = vrot.lane.b32.xlu0 %v863_v38, %s1251_s4 }
0x10c8   :  { %v1223_v43 = vpop.eup %1222 }
0x10c9   :  { %v829_v45 = vadd.f32 1.0, %v1223_v43 }
0x10cb   :  { %1224 = vrcp.f32 %v829_v45 }
0x10d8   :  { %v1225_v50 = vpop.eup %1224 }
0x10d9   :  { %v844_v2 = vsub.f32 1.0, %v1225_v50  ;;  %v850_v4 = vmul.f32 %v1225_v50, %v730_v25  ;;  %v1072_v25 = vld [vmem:[%s1604_s0 + $0x1c] sm:$0xf] }
0x10da   :  { %v942_v24 = vunpack.c.l.bf16 %v1072_v25 }
0x1129   :  { %v854_v48 = vpop.permute.xlu1 %853 }
0x112a   :  { %v856_v49 = vadd.f32 %v854_v48, %v824_v46 }
0x112b   :  { %v835_v51 = vpop.permute.xlu0 %834 }
0x112c   :  { %v1068_v52 = vmul.f32 -1.442695, %v856_v49  ;;  %v837_v53 = vmul.f32 %v1225_v50, %v835_v51 }
0x112e   :  { %1226 = vpow2.f32 %v1068_v52  ;;  %839 = vrot.lane.b32.xlu1 %v837_v53, %s1248_s25 }
0x112f   :  { %v866_v55 = vpop.permute.xlu0 %865 }
0x113b   :  { %v1227_v54 = vpop.eup %1226 }
0x113c   :  { %v860_v0 = vadd.f32 1.0, %v1227_v54 }
0x113e   :  { %1228 = vrcp.f32 %v860_v0 }
0x114b   :  { %v1229_v1 = vpop.eup %1228 }
0x114c   :  { %v868_v56 = vmul.f32 %v1229_v1, %v866_v55  ;;  %v875_v10 = vsub.f32 1.0, %v1229_v1  ;;  %v881_v12 = vmul.f32 %v1229_v1, %v1498_v29 }
0x114e   :  { %870 = vrot.lane.b32.xlu0 %v868_v56, %s1248_s25 }
0x11a0   :  { %v840_v57 = vpop.permute.xlu1 %839 }
0x11a1   :  { %v842_v58 = vadd.f32 %v840_v57, %v821_v40 }
0x11a3   :  { %1230 = vtanh.f32 %v842_v58 }
0x11b0   :  { %v1231_v59 = vpop.eup %1230 }
0x11b1   :  { %846 = vrot.lane.b32.xlu1 %v1231_v59, %s1254_s9 }
0x11c0   :  { %v871_v61 = vpop.permute.xlu0 %870 }
0x11c1   :  { %v873_v62 = vadd.f32 %v871_v61, %v824_v46 }
0x11c3   :  { %1232 = vtanh.f32 %v873_v62 }
0x11d0   :  { %v1233_v63 = vpop.eup %1232 }
0x11d1   :  { %877 = vrot.lane.b32.xlu0 %v1233_v63, %s1254_s9 }
0x1223   :  { %v847_v3 = vpop.permute.xlu1 %846 }
0x1224   :  { %v849_v7 = vmul.f32 %v847_v3, %v844_v2 }
0x1226   :  { %v1518_v8 = vadd.f32 %v850_v4, %v849_v7 }
0x1228   :  { %884 = vrot.lane.b32.xlu1 %v1518_v8, %s1254_s9 }
0x1243   :  { %v878_v9 = vpop.permute.xlu0 %877 }
0x1244   :  { %v880_v11 = vmul.f32 %v878_v9, %v875_v10 }
0x1246   :  { %v1523_v13 = vadd.f32 %v881_v12, %v880_v11 }
0x129a   :  { %v885_v15 = vpop.permute.xlu1 %884 }
0x129b   :  { %1069 = vst.msk [vmem:[%s1606_s5 + $0x30] sm:$0xff] %vm161_vm1, %v885_v15  ;;  %v895_v16 = vsel %vm161_vm1, %v885_v15, %v1523_v13 }
0x129c   :  { %v896_v17 = vpack.c.bf16 %v895_v16, %v895_v16 }
0x129e   :  { %1137 = vmatmul.mubr.msk.bf16.vlgmr.msra.gmra.mxu1 %vm34_vm2, %v896_v17 }
0x135e   :  { %v934_v18 = vpop.f32.mrf.mxu1 }
0x135f   :  { %973 = vrot.lane.b32.xlu0 %v934_v18, %s1253_s28  ;;  %v952_v19 = vadd.f32 %v934_v18, %v1316_v5  ;;  %v983_v21 = vadd.f32 %v934_v18, %v1318_v6  ;;  %v945_v26 = vadd.f32 %v942_v24, %v934_v18  ;;  %v943_v5 = vld [vmem:[%s1605_s1] sm:$0xf] }
0x1360   :  { %v1138_v20 = vpop.f32.mrf.mxu1  ;;  %v944_v6 = vunpack.c.l.bf16 %v943_v5 }
0x1361   :  { %954 = vrot.lane.b32.xlu1 %v952_v19, %s1252_s27  ;;  %v1073_v27 = vmul.f32 -1.442695, %v945_v26 }
0x1362   :  { %v937_v22 = vpop.f32.mrf.mxu1 }
0x1363   :  { %985 = vrot.lane.b32.xlu0 %v983_v21, %s1251_s4  ;;  %1234 = vpow2.f32 %v1073_v27 }
0x1364   :  { %v1139_v23 = vpop.f32.mrf.mxu1 }
0x1370   :  { %v1235_v28 = vpop.eup %1234 }
0x1371   :  { %v949_v30 = vadd.f32 1.0, %v1235_v28 }
0x1373   :  { %1236 = vrcp.f32 %v949_v30 }
0x1380   :  { %v1237_v34 = vpop.eup %1236 }
0x13d1   :  { %v974_v32 = vpop.permute.xlu0 %973 }
0x13d2   :  { %v976_v33 = vadd.f32 %v974_v32, %v944_v6 }
0x13d3   :  { %v955_v35 = vpop.permute.xlu1 %954 }
0x13d4   :  { %v1074_v36 = vmul.f32 -1.442695, %v976_v33  ;;  %v957_v37 = vmul.f32 %v1237_v34, %v955_v35 }
0x13d5   :  { %v986_v41 = vpop.permute.xlu0 %985 }
0x13d6   :  { %1238 = vpow2.f32 %v1074_v36  ;;  %959 = vrot.lane.b32.xlu1 %v957_v37, %s1248_s25 }
0x13e3   :  { %v1239_v38 = vpop.eup %1238 }
0x13e4   :  { %v980_v39 = vadd.f32 1.0, %v1239_v38 }
0x13e6   :  { %1240 = vrcp.f32 %v980_v39 }
0x13f3   :  { %v1241_v40 = vpop.eup %1240 }
0x13f4   :  { %v988_v42 = vmul.f32 %v1241_v40, %v986_v41  ;;  %v995_v54 = vsub.f32 1.0, %v1241_v40  ;;  %v1001_v1 = vmul.f32 %v1241_v40, %v1523_v13 }
0x13f6   :  { %990 = vrot.lane.b32.xlu0 %v988_v42, %s1248_s25 }
0x1448   :  { %v960_v43 = vpop.permute.xlu1 %959 }
0x1449   :  { %v962_v45 = vadd.f32 %v960_v43, %v942_v24 }
0x144b   :  { %1242 = vtanh.f32 %v962_v45 }
0x1458   :  { %v1243_v46 = vpop.eup %1242 }
0x1459   :  { %966 = vrot.lane.b32.xlu1 %v1243_v46, %s1254_s9 }
0x145d   :  { %164 = vrot.lane.b32.xlu1 %v1339_v47, %s1254_s9  ;;  %v964_v47 = vsub.f32 1.0, %v1237_v34 }
0x1461   :  { %406 = vrot.lane.b32.xlu1 %v1402_v14, %s1254_s9 }
0x1465   :  { %648 = vrot.lane.b32.xlu1 %v1463_v44, %s1254_s9  ;;  %v970_v44 = vmul.f32 %v1237_v34, %v1518_v8 }
0x1468   :  { %v991_v48 = vpop.permute.xlu0 %990 }
0x1469   :  { %v993_v49 = vadd.f32 %v991_v48, %v944_v6  ;;  %890 = vrot.lane.b32.xlu1 %v1523_v13, %s1254_s9 }
0x146b   :  { %1244 = vtanh.f32 %v993_v49 }
0x1478   :  { %v1245_v50 = vpop.eup %1244 }
0x1479   :  { %997 = vrot.lane.b32.xlu0 %v1245_v50, %s1254_s9 }
0x147d   :  { %285 = vrot.lane.b32.xlu0 %v1376_v31, %s1254_s9 }
0x1481   :  { %527 = vrot.lane.b32.xlu0 %v1438_v60, %s1254_s9 }
0x1485   :  { %769 = vrot.lane.b32.xlu0 %v1498_v29, %s1254_s9 }
0x14cb   :  { %v967_v14 = vpop.permute.xlu1 %966 }
0x14cc   :  { %v969_v51 = vmul.f32 %v967_v14, %v964_v47 }
0x14ce   :  { %v971_v52 = vadd.f32 %v970_v44, %v969_v51 }
0x14cf   :  { %v165_v53 = vpop.permute.xlu1 %164 }
0x14d0   :  { %1028 = vst.msk [vmem:[%s1607_s6 + $0x38] sm:$0xff] %vm161_vm1, %v165_v53  ;;  %1004 = vrot.lane.b32.xlu0 %v971_v52, %s1254_s9 }
0x14d3   :  { %v407_v31 = vpop.permute.xlu1 %406 }
0x14d4   :  { %1042 = vst.msk [vmem:[%s1607_s6 + $0x28] sm:$0xff] %vm161_vm1, %v407_v31 }
0x14d7   :  { %v649_v60 = vpop.permute.xlu1 %648 }
0x14d8   :  { %1056 = vst.msk [vmem:[%s1607_s6 + $0x18] sm:$0xff] %vm161_vm1, %v649_v60 }
0x14db   :  { %v891_v29 = vpop.permute.xlu1 %890 }
0x14dc   :  { %1070 = vst.msk [vmem:[%s1607_s6 + $0x8] sm:$0xff] %vm161_vm1, %v891_v29 }
0x14eb   :  { %v998_v0 = vpop.permute.xlu0 %997 }
0x14ec   :  { %v1000_v55 = vmul.f32 %v998_v0, %v995_v54 }
0x14ee   :  { %v1002_v56 = vadd.f32 %v1001_v1, %v1000_v55 }
0x14ef   :  { %v286_v57 = vpop.permute.xlu0 %285 }
0x14f0   :  { %1035 = vst.msk [vmem:[%s1607_s6 + $0x30] sm:$0xff] %vm161_vm1, %v286_v57  ;;  %1010 = vrot.lane.b32.xlu1 %v1002_v56, %s1254_s9 }
0x14f3   :  { %v528_v58 = vpop.permute.xlu0 %527 }
0x14f4   :  { %1049 = vst.msk [vmem:[%s1607_s6 + $0x20] sm:$0xff] %vm161_vm1, %v528_v58 }
0x14f7   :  { %v770_v59 = vpop.permute.xlu0 %769 }
0x14f8   :  { %1063 = vst.msk [vmem:[%s1607_s6 + $0x10] sm:$0xff] %vm161_vm1, %v770_v59 }
0x1542   :  { %v1005_v61 = vpop.permute.xlu0 %1004 }
0x1543   :  { %1075 = vst.msk [vmem:[%s1606_s5 + $0x38] sm:$0xff] %vm161_vm1, %v1005_v61 }
0x1562   :  { %v1011_v62 = vpop.permute.xlu1 %1010 }
0x1563   :  { %1013 = vst.msk [vmem:[%s1607_s6] sm:$0xff] %vm161_vm1, %v1011_v62 }

// kernel: encoder_block_forward.7
= control target key start
LH: loop header
LB: loop body
LE: loop exit
PB: predicated region body
PF: predicated region fallthrough
CT: control target
= control target key end

     0   :  { %v1355_v0 = vmov 0.0   ;;  %vm1356_vm0 = vmmov 0   ;;  %s1357_s25 = smov 16   ;;  %v1358_v4 = vmov 0.0|0.0   ;;  %s1361_s27 = smov 112   ;;  %vm179_vm1 = vcmask 64512   ;;  %s1764_s2 = inlined_call_operand.vmem [shape: bf16[16,48], index: 2, kind: input, shape index: {}]   ;;  %s1765_s3 = inlined_call_operand.vmem [shape: f32[1,8], index: 3, kind: input, shape index: {}]   ;;  %s1766_s4 = inlined_call_operand.vmem [shape: f32[1,8], index: 4, kind: input, shape index: {}]   ;;  %s1767_s0 = inlined_call_operand.vmem [shape: bf16[8,8,24], index: 0, kind: input, shape index: {}]   ;;  %s1768_s1 = inlined_call_operand.vmem [shape: bf16[8,8,24], index: 1, kind: input, shape index: {}]   ;;  %s1769_s5 = inlined_call_operand.vmem [shape: bf16[8,8,8], index: 5, kind: output, shape index: {0}]   ;;  %s1770_s6 = inlined_call_operand.vmem [shape: bf16[8,8,8], index: 6, kind: output, shape index: {1}]  }
   0x1   :  { %1201 = vmatprep.subr.bf16.mxu0 %v1355_v0  ;;  %v1403_v1 = vld [vmem:[%s1764_s2] sm:$0xff]   ;;  %1203 = vmatprep.mubr.msk.bf16.mxu0 %vm1356_vm0, %v1355_v0  ;;  %s1362_s28 = smov 104   ;;  %v1440_v19 = vld [vmem:[%s1768_s1 + $0x18] sm:$0xff]   ;;  %s1363_s9 = smov 120   ;;  %vm34_vm2 = vcmask 130048   ;;  %vm164_vm3 = vcmask 60416  }
   0x2   :  { %v1102_v2 = vld [vmem:[%s1765_s3] ss:$0 sm:$0xff]  ;;  %1207 = vmatprep.subr.bf16.mxu1 %v1355_v0  ;;  %1209 = vmatprep.mubr.msk.bf16.mxu1 %vm1356_vm0, %v1355_v0  ;;  %s1359_s3 = smov 40   ;;  %v82_v23 = vunpack.c.h.bf16 %v1440_v19  ;;  %v1468_v57 = vld [vmem:[%s1767_s0 + $0x4] sm:$0xff]   ;;  %v230_v63 = vunpack.c.l.bf16 %v1440_v19 }
   0x3   :  { %1202 = vmatpush3.bf16.msra.mxu0 %v1403_v1  ;;  %95 = vrot.lane.b32.xlu0 %v1102_v2, %s1357_s25  ;;  %v1104_v3 = vld [vmem:[%s1766_s4] ss:$0 sm:$0xff]  ;;  %s1360_s4 = smov 88   ;;  %v227_v58 = vunpack.c.l.bf16 %v1468_v57 }
   0x4   :  { %1208 = vmatpush3.bf16.msra.mxu1 %v1403_v1  ;;  %1213 = vmatprep.subr.bf16.mxu0 %v1355_v0  ;;  %v78_v13 = vld [vmem:[%s1767_s0] sm:$0xf] }
   0x5   :  { %1219 = vmatprep.subr.bf16.mxu1 %v1355_v0  ;;  %v79_v14 = vunpack.c.l.bf16 %v78_v13 }
   0x6   :  { %1204 = vmatmul.mubr.bf16.vlgmr.msra.gmra.mxu0 %v1358_v4 }
   0x7   :  { %134 = vrot.lane.b32.xlu0 %v1104_v3, %s1359_s3  ;;  %1214 = vmatpush3.bf16.msra.mxu0 %v1403_v1 }
   0x8   :  { %1215 = vmatprep.mubr.msk.bf16.mxu0 %vm1356_vm0, %v1355_v0  ;;  %1225 = vmatprep.subr.bf16.mxu0 %v1355_v0 }
  0x75   :  { %v1425_v5 = vpop.permute.xlu0 %95 }
  0x79   :  { %v1427_v6 = vpop.permute.xlu0 %134 }
  0xc6   :  { %v72_v7 = vpop.f32.mrf.mxu0 }
  0xc7   :  { %v137_v8 = vadd.f32 %v1427_v6, %v72_v7  ;;  %v98_v9 = vadd.f32 %v1425_v5, %v72_v7  ;;  %v83_v15 = vadd.f32 %v79_v14, %v72_v7 }
  0xc8   :  { %v1205_v10 = vpop.f32.mrf.mxu0 }
  0xc9   :  { %139 = vrot.lane.b32.xlu0 %v137_v8, %s1360_s4  ;;  %100 = vrot.lane.b32.xlu1 %v98_v9, %s1361_s27  ;;  %v1101_v16 = vmul.f32 -1.442695, %v83_v15 }
  0xca   :  { %v75_v11 = vpop.f32.mrf.mxu0 }
  0xcb   :  { %1259 = vpow2.f32 %v1101_v16 }
  0xcc   :  { %v1206_v12 = vpop.f32.mrf.mxu0 }
  0xcd   :  { %119 = vrot.lane.b32.xlu1 %v72_v7, %s1362_s28 }
  0xd8   :  { %v1260_v17 = vpop.eup %1259 }
  0xd9   :  { %v87_v18 = vadd.f32 1.0, %v1260_v17 }
  0xdb   :  { %1261 = vrcp.f32 %v87_v18 }
  0xe8   :  { %v1262_v20 = vpop.eup %1261 }
  0xe9   :  { %v110_v38 = vsub.f32 1.0, %v1262_v20  ;;  %v116_v40 = vmul.f32 0.0, %v1262_v20 }
 0x13b   :  { %v101_v21 = vpop.permute.xlu1 %100  ;;  %v140_v30 = vpop.permute.xlu0 %139 }
 0x13c   :  { %v103_v22 = vmul.f32 %v1262_v20, %v101_v21 }
 0x13e   :  { %105 = vrot.lane.b32.xlu1 %v103_v22, %s1357_s25 }
 0x13f   :  { %v120_v24 = vpop.permute.xlu1 %119 }
 0x140   :  { %v122_v25 = vadd.f32 %v120_v24, %v82_v23 }
 0x142   :  { %v1103_v26 = vmul.f32 -1.442695, %v122_v25 }
 0x144   :  { %1263 = vpow2.f32 %v1103_v26 }
 0x151   :  { %v1264_v27 = vpop.eup %1263 }
 0x152   :  { %v126_v28 = vadd.f32 1.0, %v1264_v27 }
 0x154   :  { %1265 = vrcp.f32 %v126_v28 }
 0x161   :  { %v1266_v29 = vpop.eup %1265 }
 0x162   :  { %v142_v31 = vmul.f32 %v1266_v29, %v140_v30  ;;  %v149_v44 = vsub.f32 1.0, %v1266_v29  ;;  %v155_v46 = vmul.f32 0.0, %v1266_v29 }
 0x164   :  { %144 = vrot.lane.b32.xlu0 %v142_v31, %s1357_s25 }
 0x1b0   :  { %v106_v32 = vpop.permute.xlu1 %105 }
 0x1b1   :  { %v108_v33 = vadd.f32 %v106_v32, %v79_v14 }
 0x1b3   :  { %1267 = vtanh.f32 %v108_v33 }
 0x1c0   :  { %v1268_v34 = vpop.eup %1267 }
 0x1c1   :  { %112 = vrot.lane.b32.xlu1 %v1268_v34, %s1363_s9 }
 0x1d6   :  { %v145_v35 = vpop.permute.xlu0 %144 }
 0x1d7   :  { %v147_v36 = vadd.f32 %v145_v35, %v82_v23 }
 0x1d9   :  { %1269 = vtanh.f32 %v147_v36 }
 0x1e6   :  { %v1270_v37 = vpop.eup %1269 }
 0x1e7   :  { %151 = vrot.lane.b32.xlu0 %v1270_v37, %s1363_s9 }
 0x233   :  { %v113_v39 = vpop.permute.xlu1 %112 }
 0x234   :  { %v115_v41 = vmul.f32 %v113_v39, %v110_v38 }
 0x236   :  { %v1447_v42 = vadd.f32 %v116_v40, %v115_v41  ;;  %v358_v40 = vunpack.c.h.bf16 %v1468_v57 }
 0x238   :  { %176 = vrot.lane.b32.xlu1 %v1447_v42, %s1363_s9 }
 0x259   :  { %v152_v43 = vpop.permute.xlu0 %151 }
 0x25a   :  { %v154_v45 = vmul.f32 %v152_v43, %v149_v44 }
 0x25c   :  { %v1451_v47 = vadd.f32 %v155_v46, %v154_v45  ;;  %v1500_v46 = vld [vmem:[%s1768_s1 + $0x10] sm:$0xff]  }
 0x2aa   :  { %v177_v48 = vpop.permute.xlu1 %176 }
 0x2ab   :  { %v180_v49 = vsel %vm179_vm1, %v177_v48, %v1451_v47  ;;  %v361_v48 = vunpack.c.h.bf16 %v1500_v46 }
 0x2ac   :  { %v181_v50 = vpack.c.bf16 %v180_v49, %v180_v49 }
 0x2ae   :  { %1210 = vmatmul.mubr.msk.bf16.vlgmr.msra.gmra.mxu1 %vm34_vm2, %v181_v50 }
 0x2af   :  { %1220 = vmatpush3.bf16.msra.mxu1 %v1403_v1  ;;  %1221 = vmatprep.mubr.msk.bf16.mxu1 %vm1356_vm0, %v1355_v0 }
 0x2b0   :  { %1231 = vmatprep.subr.bf16.mxu1 %v1355_v0 }
 0x36e   :  { %v219_v51 = vpop.f32.mrf.mxu1 }
 0x36f   :  { %259 = vrot.lane.b32.xlu1 %v219_v51, %s1362_s28  ;;  %v238_v52 = vadd.f32 %v219_v51, %v1425_v5  ;;  %v269_v55 = vadd.f32 %v219_v51, %v1427_v6  ;;  %v231_v59 = vadd.f32 %v227_v58, %v219_v51 }
 0x370   :  { %v1211_v53 = vpop.f32.mrf.mxu1 }
 0x371   :  { %240 = vrot.lane.b32.xlu0 %v238_v52, %s1361_s27  ;;  %v1111_v60 = vmul.f32 -1.442695, %v231_v59 }
 0x372   :  { %v222_v54 = vpop.f32.mrf.mxu1 }
 0x373   :  { %1271 = vpow2.f32 %v1111_v60 }
 0x374   :  { %v1212_v56 = vpop.f32.mrf.mxu1 }
 0x375   :  { %271 = vrot.lane.b32.xlu0 %v269_v55, %s1360_s4 }
 0x380   :  { %v1272_v61 = vpop.eup %1271 }
 0x381   :  { %v235_v62 = vadd.f32 1.0, %v1272_v61 }
 0x383   :  { %1273 = vrcp.f32 %v235_v62 }
 0x390   :  { %v1274_v4 = vpop.eup %1273 }
 0x391   :  { %v250_v21 = vsub.f32 1.0, %v1274_v4  ;;  %v256_v23 = vmul.f32 %v1274_v4, %v1447_v42 }
 0x3e1   :  { %v260_v2 = vpop.permute.xlu1 %259 }
 0x3e2   :  { %v262_v3 = vadd.f32 %v260_v2, %v230_v63 }
 0x3e3   :  { %v241_v7 = vpop.permute.xlu0 %240 }
 0x3e4   :  { %v1112_v8 = vmul.f32 -1.442695, %v262_v3  ;;  %v243_v9 = vmul.f32 %v1274_v4, %v241_v7 }
 0x3e6   :  { %1275 = vpow2.f32 %v1112_v8  ;;  %245 = vrot.lane.b32.xlu1 %v243_v9, %s1357_s25 }
 0x3e7   :  { %v272_v13 = vpop.permute.xlu0 %271 }
 0x3f3   :  { %v1276_v10 = vpop.eup %1275 }
 0x3f4   :  { %v266_v11 = vadd.f32 1.0, %v1276_v10 }
 0x3f6   :  { %1277 = vrcp.f32 %v266_v11 }
 0x403   :  { %v1278_v12 = vpop.eup %1277 }
 0x404   :  { %v274_v14 = vmul.f32 %v1278_v12, %v272_v13  ;;  %v281_v27 = vsub.f32 1.0, %v1278_v12  ;;  %v287_v29 = vmul.f32 %v1278_v12, %v1451_v47 }
 0x406   :  { %276 = vrot.lane.b32.xlu0 %v274_v14, %s1357_s25 }
 0x458   :  { %v246_v15 = vpop.permute.xlu1 %245 }
 0x459   :  { %v248_v16 = vadd.f32 %v246_v15, %v227_v58 }
 0x45b   :  { %1279 = vtanh.f32 %v248_v16 }
 0x468   :  { %v1280_v17 = vpop.eup %1279 }
 0x469   :  { %252 = vrot.lane.b32.xlu1 %v1280_v17, %s1363_s9 }
 0x478   :  { %v277_v18 = vpop.permute.xlu0 %276 }
 0x479   :  { %v279_v19 = vadd.f32 %v277_v18, %v230_v63 }
 0x47b   :  { %1281 = vtanh.f32 %v279_v19 }
 0x488   :  { %v1282_v20 = vpop.eup %1281 }
 0x489   :  { %283 = vrot.lane.b32.xlu0 %v1282_v20, %s1363_s9 }
 0x4db   :  { %v253_v22 = vpop.permute.xlu1 %252 }
 0x4dc   :  { %v255_v24 = vmul.f32 %v253_v22, %v250_v21 }
 0x4de   :  { %v1477_v25 = vadd.f32 %v256_v23, %v255_v24 }
 0x4e0   :  { %308 = vrot.lane.b32.xlu1 %v1477_v25, %s1363_s9 }
 0x4fb   :  { %v284_v26 = vpop.permute.xlu0 %283 }
 0x4fc   :  { %v286_v28 = vmul.f32 %v284_v26, %v281_v27  ;;  %v1530_v26 = vld [vmem:[%s1767_s0 + $0xc] sm:$0xff]  }
 0x4fd   :  { %v489_v27 = vunpack.c.l.bf16 %v1530_v26 }
 0x4fe   :  { %v1482_v30 = vadd.f32 %v287_v29, %v286_v28 }
 0x552   :  { %v309_v31 = vpop.permute.xlu1 %308 }
 0x553   :  { %v311_v32 = vsel %vm179_vm1, %v309_v31, %v1482_v30 }
 0x554   :  { %v312_v33 = vpack.c.bf16 %v311_v32, %v311_v32 }
 0x556   :  { %1216 = vmatmul.mubr.msk.bf16.vlgmr.msra.gmra.mxu0 %vm34_vm2, %v312_v33  ;;  %v492_v33 = vunpack.c.l.bf16 %v1500_v46 }
 0x557   :  { %1226 = vmatpush3.bf16.msra.mxu0 %v1403_v1  ;;  %1227 = vmatprep.mubr.msk.bf16.mxu0 %vm1356_vm0, %v1355_v0 }
 0x558   :  { %1237 = vmatprep.subr.bf16.mxu0 %v1355_v0 }
 0x616   :  { %v350_v34 = vpop.f32.mrf.mxu0 }
 0x617   :  { %390 = vrot.lane.b32.xlu1 %v350_v34, %s1362_s28  ;;  %v369_v35 = vadd.f32 %v350_v34, %v1425_v5  ;;  %v400_v38 = vadd.f32 %v350_v34, %v1427_v6  ;;  %v362_v41 = vadd.f32 %v358_v40, %v350_v34 }
 0x618   :  { %v1217_v36 = vpop.f32.mrf.mxu0 }
 0x619   :  { %371 = vrot.lane.b32.xlu0 %v369_v35, %s1361_s27  ;;  %v1120_v43 = vmul.f32 -1.442695, %v362_v41 }
 0x61a   :  { %v353_v37 = vpop.f32.mrf.mxu0 }
 0x61b   :  { %1283 = vpow2.f32 %v1120_v43 }
 0x61c   :  { %v1218_v39 = vpop.f32.mrf.mxu0 }
 0x61d   :  { %402 = vrot.lane.b32.xlu0 %v400_v38, %s1360_s4 }
 0x628   :  { %v1284_v44 = vpop.eup %1283 }
 0x629   :  { %v366_v45 = vadd.f32 1.0, %v1284_v44 }
 0x62b   :  { %1285 = vrcp.f32 %v366_v45 }
 0x638   :  { %v1286_v51 = vpop.eup %1285 }
 0x639   :  { %v381_v4 = vsub.f32 1.0, %v1286_v51  ;;  %v387_v8 = vmul.f32 %v1286_v51, %v1477_v25 }
 0x689   :  { %v391_v49 = vpop.permute.xlu1 %390 }
 0x68a   :  { %v393_v50 = vadd.f32 %v391_v49, %v361_v48 }
 0x68b   :  { %v372_v52 = vpop.permute.xlu0 %371 }
 0x68c   :  { %v1121_v53 = vmul.f32 -1.442695, %v393_v50  ;;  %v374_v54 = vmul.f32 %v1286_v51, %v372_v52 }
 0x68e   :  { %1287 = vpow2.f32 %v1121_v53  ;;  %376 = vrot.lane.b32.xlu1 %v374_v54, %s1357_s25 }
 0x68f   :  { %v403_v58 = vpop.permute.xlu0 %402 }
 0x69b   :  { %v1288_v55 = vpop.eup %1287 }
 0x69c   :  { %v397_v56 = vadd.f32 1.0, %v1288_v55 }
 0x69e   :  { %1289 = vrcp.f32 %v397_v56 }
 0x6ab   :  { %v1290_v57 = vpop.eup %1289 }
 0x6ac   :  { %v405_v59 = vmul.f32 %v1290_v57, %v403_v58  ;;  %v412_v12 = vsub.f32 1.0, %v1290_v57  ;;  %v418_v14 = vmul.f32 %v1290_v57, %v1482_v30 }
 0x6ae   :  { %407 = vrot.lane.b32.xlu0 %v405_v59, %s1357_s25 }
 0x700   :  { %v377_v60 = vpop.permute.xlu1 %376 }
 0x701   :  { %v379_v61 = vadd.f32 %v377_v60, %v358_v40 }
 0x703   :  { %1291 = vtanh.f32 %v379_v61 }
 0x710   :  { %v1292_v62 = vpop.eup %1291 }
 0x711   :  { %383 = vrot.lane.b32.xlu1 %v1292_v62, %s1363_s9 }
 0x720   :  { %v408_v63 = vpop.permute.xlu0 %407 }
 0x721   :  { %v410_v2 = vadd.f32 %v408_v63, %v361_v48 }
 0x723   :  { %1293 = vtanh.f32 %v410_v2 }
 0x730   :  { %v1294_v3 = vpop.eup %1293 }
 0x731   :  { %414 = vrot.lane.b32.xlu0 %v1294_v3, %s1363_s9 }
 0x783   :  { %v384_v7 = vpop.permute.xlu1 %383 }
 0x784   :  { %v386_v9 = vmul.f32 %v384_v7, %v381_v4 }
 0x786   :  { %v1508_v10 = vadd.f32 %v387_v8, %v386_v9 }
 0x788   :  { %439 = vrot.lane.b32.xlu1 %v1508_v10, %s1363_s9 }
 0x7a3   :  { %v415_v11 = vpop.permute.xlu0 %414 }
 0x7a4   :  { %v417_v13 = vmul.f32 %v415_v11, %v412_v12 }
 0x7a6   :  { %v1513_v15 = vadd.f32 %v418_v14, %v417_v13  ;;  %v620_v13 = vunpack.c.h.bf16 %v1530_v26 }
 0x7fa   :  { %v440_v16 = vpop.permute.xlu1 %439 }
 0x7fb   :  { %v442_v17 = vsel %vm179_vm1, %v440_v16, %v1513_v15 }
 0x7fc   :  { %v443_v18 = vpack.c.bf16 %v442_v17, %v442_v17 }
 0x7fe   :  { %1222 = vmatmul.mubr.msk.bf16.vlgmr.msra.gmra.mxu1 %vm34_vm2, %v443_v18 }
 0x7ff   :  { %1232 = vmatpush3.bf16.msra.mxu1 %v1403_v1  ;;  %1233 = vmatprep.mubr.msk.bf16.mxu1 %vm1356_vm0, %v1355_v0 }
 0x800   :  { %1243 = vmatprep.subr.bf16.mxu1 %v1355_v0 }
 0x8be   :  { %v481_v19 = vpop.f32.mrf.mxu1 }
 0x8bf   :  { %521 = vrot.lane.b32.xlu1 %v481_v19, %s1362_s28  ;;  %v500_v20 = vadd.f32 %v481_v19, %v1425_v5  ;;  %v531_v23 = vadd.f32 %v481_v19, %v1427_v6  ;;  %v493_v28 = vadd.f32 %v489_v27, %v481_v19  ;;  %v1561_v19 = vld [vmem:[%s1768_s1 + $0x8] sm:$0xff]  }
 0x8c0   :  { %v1223_v21 = vpop.f32.mrf.mxu1 }
 0x8c1   :  { %502 = vrot.lane.b32.xlu0 %v500_v20, %s1361_s27  ;;  %v1129_v29 = vmul.f32 -1.442695, %v493_v28  ;;  %v623_v20 = vunpack.c.h.bf16 %v1561_v19 }
 0x8c2   :  { %v484_v22 = vpop.f32.mrf.mxu1 }
 0x8c3   :  { %1295 = vpow2.f32 %v1129_v29 }
 0x8c4   :  { %v1224_v24 = vpop.f32.mrf.mxu1 }
 0x8c5   :  { %533 = vrot.lane.b32.xlu0 %v531_v23, %s1360_s4 }
 0x8d0   :  { %v1296_v31 = vpop.eup %1295 }
 0x8d1   :  { %v497_v32 = vadd.f32 1.0, %v1296_v31 }
 0x8d3   :  { %1297 = vrcp.f32 %v497_v32 }
 0x8e0   :  { %v1298_v36 = vpop.eup %1297 }
 0x8e1   :  { %v512_v53 = vsub.f32 1.0, %v1298_v36  ;;  %v518_v55 = vmul.f32 %v1298_v36, %v1508_v10 }
 0x931   :  { %v522_v34 = vpop.permute.xlu1 %521 }
 0x932   :  { %v524_v35 = vadd.f32 %v522_v34, %v492_v33 }
 0x933   :  { %v503_v37 = vpop.permute.xlu0 %502 }
 0x934   :  { %v1130_v38 = vmul.f32 -1.442695, %v524_v35  ;;  %v505_v39 = vmul.f32 %v1298_v36, %v503_v37 }
 0x936   :  { %1299 = vpow2.f32 %v1130_v38  ;;  %507 = vrot.lane.b32.xlu1 %v505_v39, %s1357_s25 }
 0x937   :  { %v534_v44 = vpop.permute.xlu0 %533 }
 0x943   :  { %v1300_v40 = vpop.eup %1299 }
 0x944   :  { %v528_v41 = vadd.f32 1.0, %v1300_v40 }
 0x946   :  { %1301 = vrcp.f32 %v528_v41 }
 0x953   :  { %v1302_v43 = vpop.eup %1301 }
 0x954   :  { %v536_v45 = vmul.f32 %v1302_v43, %v534_v44  ;;  %v543_v59 = vsub.f32 1.0, %v1302_v43  ;;  %v549_v61 = vmul.f32 %v1302_v43, %v1513_v15 }
 0x956   :  { %538 = vrot.lane.b32.xlu0 %v536_v45, %s1357_s25 }
 0x9a8   :  { %v508_v48 = vpop.permute.xlu1 %507 }
 0x9a9   :  { %v510_v49 = vadd.f32 %v508_v48, %v489_v27 }
 0x9ab   :  { %1303 = vtanh.f32 %v510_v49 }
 0x9b8   :  { %v1304_v46 = vpop.eup %1303 }
 0x9b9   :  { %514 = vrot.lane.b32.xlu1 %v1304_v46, %s1363_s9 }
 0x9c8   :  { %v539_v50 = vpop.permute.xlu0 %538 }
 0x9c9   :  { %v541_v51 = vadd.f32 %v539_v50, %v492_v33 }
 0x9cb   :  { %1305 = vtanh.f32 %v541_v51 }
 0x9d8   :  { %v1306_v52 = vpop.eup %1305 }
 0x9d9   :  { %545 = vrot.lane.b32.xlu0 %v1306_v52, %s1363_s9 }
 0xa2b   :  { %v515_v54 = vpop.permute.xlu1 %514 }
 0xa2c   :  { %v517_v56 = vmul.f32 %v515_v54, %v512_v53 }
 0xa2e   :  { %v1539_v57 = vadd.f32 %v518_v55, %v517_v56 }
 0xa30   :  { %570 = vrot.lane.b32.xlu1 %v1539_v57, %s1363_s9 }
 0xa4b   :  { %v546_v58 = vpop.permute.xlu0 %545 }
 0xa4c   :  { %v548_v60 = vmul.f32 %v546_v58, %v543_v59 }
 0xa4e   :  { %v1544_v62 = vadd.f32 %v549_v61, %v548_v60 }
 0xaa2   :  { %v571_v63 = vpop.permute.xlu1 %570 }
 0xaa3   :  { %v573_v2 = vsel %vm179_vm1, %v571_v63, %v1544_v62 }
 0xaa4   :  { %v574_v3 = vpack.c.bf16 %v573_v2, %v573_v2 }
 0xaa6   :  { %1228 = vmatmul.mubr.msk.bf16.vlgmr.msra.gmra.mxu0 %vm34_vm2, %v574_v3 }
 0xaa7   :  { %1238 = vmatpush3.bf16.msra.mxu0 %v1403_v1  ;;  %1239 = vmatprep.mubr.msk.bf16.mxu0 %vm1356_vm0, %v1355_v0 }
 0xb66   :  { %v612_v4 = vpop.f32.mrf.mxu0 }
 0xb67   :  { %652 = vrot.lane.b32.xlu1 %v612_v4, %s1362_s28  ;;  %v631_v7 = vadd.f32 %v612_v4, %v1425_v5  ;;  %v662_v11 = vadd.f32 %v612_v4, %v1427_v6  ;;  %v624_v14 = vadd.f32 %v620_v13, %v612_v4 }
 0xb68   :  { %v1229_v8 = vpop.f32.mrf.mxu0 }
 0xb69   :  { %633 = vrot.lane.b32.xlu0 %v631_v7, %s1361_s27  ;;  %v1138_v16 = vmul.f32 -1.442695, %v624_v14  ;;  %v754_v7 = vunpack.c.l.bf16 %v1561_v19 }
 0xb6a   :  { %v615_v9 = vpop.f32.mrf.mxu0 }
 0xb6b   :  { %1307 = vpow2.f32 %v1138_v16 }
 0xb6c   :  { %v1230_v12 = vpop.f32.mrf.mxu0 }
 0xb6d   :  { %664 = vrot.lane.b32.xlu0 %v662_v11, %s1360_s4 }
 0xb78   :  { %v1308_v17 = vpop.eup %1307 }
 0xb79   :  { %v628_v18 = vadd.f32 1.0, %v1308_v17 }
 0xb7b   :  { %1309 = vrcp.f32 %v628_v18 }
 0xb88   :  { %v1310_v23 = vpop.eup %1309 }
 0xb89   :  { %v643_v40 = vsub.f32 1.0, %v1310_v23  ;;  %v649_v43 = vmul.f32 %v1310_v23, %v1539_v57 }
 0xbd9   :  { %v653_v21 = vpop.permute.xlu1 %652 }
 0xbda   :  { %v655_v22 = vadd.f32 %v653_v21, %v623_v20 }
 0xbdb   :  { %v634_v24 = vpop.permute.xlu0 %633 }
 0xbdc   :  { %v1139_v27 = vmul.f32 -1.442695, %v655_v22  ;;  %v636_v28 = vmul.f32 %v1310_v23, %v634_v24 }
 0xbde   :  { %1311 = vpow2.f32 %v1139_v27  ;;  %638 = vrot.lane.b32.xlu1 %v636_v28, %s1357_s25 }
 0xbdf   :  { %v665_v32 = vpop.permute.xlu0 %664 }
 0xbeb   :  { %v1312_v26 = vpop.eup %1311 }
 0xbec   :  { %v659_v29 = vadd.f32 1.0, %v1312_v26 }
 0xbee   :  { %1313 = vrcp.f32 %v659_v29 }
 0xbfb   :  { %v1314_v31 = vpop.eup %1313 }
 0xbfc   :  { %v667_v33 = vmul.f32 %v1314_v31, %v665_v32  ;;  %v674_v49 = vsub.f32 1.0, %v1314_v31  ;;  %v680_v50 = vmul.f32 %v1314_v31, %v1544_v62 }
 0xbfe   :  { %669 = vrot.lane.b32.xlu0 %v667_v33, %s1357_s25 }
 0xc50   :  { %v639_v34 = vpop.permute.xlu1 %638 }
 0xc51   :  { %v641_v35 = vadd.f32 %v639_v34, %v620_v13 }
 0xc53   :  { %1315 = vtanh.f32 %v641_v35 }
 0xc60   :  { %v1316_v36 = vpop.eup %1315 }
 0xc61   :  { %645 = vrot.lane.b32.xlu1 %v1316_v36, %s1363_s9 }
 0xc70   :  { %v670_v37 = vpop.permute.xlu0 %669 }
 0xc71   :  { %v672_v38 = vadd.f32 %v670_v37, %v623_v20 }
 0xc73   :  { %1317 = vtanh.f32 %v672_v38 }
 0xc80   :  { %v1318_v39 = vpop.eup %1317 }
 0xc81   :  { %676 = vrot.lane.b32.xlu0 %v1318_v39, %s1363_s9 }
 0xcd3   :  { %v646_v41 = vpop.permute.xlu1 %645 }
 0xcd4   :  { %v648_v44 = vmul.f32 %v646_v41, %v643_v40 }
 0xcd6   :  { %v1569_v45 = vadd.f32 %v649_v43, %v648_v44 }
 0xcd8   :  { %701 = vrot.lane.b32.xlu1 %v1569_v45, %s1363_s9 }
 0xcf3   :  { %v677_v48 = vpop.permute.xlu0 %676 }
 0xcf4   :  { %v679_v46 = vmul.f32 %v677_v48, %v674_v49 }
 0xcf6   :  { %v1574_v51 = vadd.f32 %v680_v50, %v679_v46 }
 0xd4a   :  { %v702_v52 = vpop.permute.xlu1 %701 }
 0xd4b   :  { %v704_v53 = vsel %vm179_vm1, %v702_v52, %v1574_v51 }
 0xd4c   :  { %v705_v54 = vpack.c.bf16 %v704_v53, %v704_v53 }
 0xd4e   :  { %1234 = vmatmul.mubr.msk.bf16.vlgmr.msra.gmra.mxu1 %vm34_vm2, %v705_v54 }
 0xd4f   :  { %1244 = vmatpush3.bf16.msra.mxu1 %v1403_v1  ;;  %1245 = vmatprep.mubr.msk.bf16.mxu1 %vm1356_vm0, %v1355_v0  ;;  %v1590_v1 = vld [vmem:[%s1767_s0 + $0x14] sm:$0xff]  }
 0xd50   :  { %v751_v0 = vunpack.c.l.bf16 %v1590_v1  ;;  %v882_v52 = vunpack.c.h.bf16 %v1590_v1 }
 0xe0e   :  { %v743_v55 = vpop.f32.mrf.mxu1 }
 0xe0f   :  { %783 = vrot.lane.b32.xlu1 %v743_v55, %s1362_s28  ;;  %v762_v56 = vadd.f32 %v743_v55, %v1425_v5  ;;  %v793_v60 = vadd.f32 %v743_v55, %v1427_v6  ;;  %v755_v63 = vadd.f32 %v751_v0, %v743_v55 }
 0xe10   :  { %v1235_v58 = vpop.f32.mrf.mxu1 }
 0xe11   :  { %764 = vrot.lane.b32.xlu0 %v762_v56, %s1361_s27  ;;  %v1147_v2 = vmul.f32 -1.442695, %v755_v63  ;;  %v1618_v58 = vld [vmem:[%s1768_s1] sm:$0xff]  }
 0xe12   :  { %v746_v59 = vpop.f32.mrf.mxu1 }
 0xe13   :  { %1319 = vpow2.f32 %v1147_v2  ;;  %v885_v59 = vunpack.c.h.bf16 %v1618_v58 }
 0xe14   :  { %v1236_v61 = vpop.f32.mrf.mxu1 }
 0xe15   :  { %795 = vrot.lane.b32.xlu0 %v793_v60, %s1360_s4 }
 0xe20   :  { %v1320_v3 = vpop.eup %1319 }
 0xe21   :  { %v759_v4 = vadd.f32 1.0, %v1320_v3 }
 0xe23   :  { %1321 = vrcp.f32 %v759_v4 }
 0xe30   :  { %v1322_v11 = vpop.eup %1321 }
 0xe31   :  { %v774_v26 = vsub.f32 1.0, %v1322_v11  ;;  %v780_v31 = vmul.f32 %v1322_v11, %v1569_v45 }
 0xe81   :  { %v784_v8 = vpop.permute.xlu1 %783 }
 0xe82   :  { %v786_v9 = vadd.f32 %v784_v8, %v754_v7 }
 0xe83   :  { %v765_v12 = vpop.permute.xlu0 %764 }
 0xe84   :  { %v1148_v13 = vmul.f32 -1.442695, %v786_v9  ;;  %v767_v14 = vmul.f32 %v1322_v11, %v765_v12 }
 0xe86   :  { %1323 = vpow2.f32 %v1148_v13  ;;  %769 = vrot.lane.b32.xlu1 %v767_v14, %s1357_s25 }
 0xe87   :  { %v796_v20 = vpop.permute.xlu0 %795 }
 0xe93   :  { %v1324_v16 = vpop.eup %1323 }
 0xe94   :  { %v790_v17 = vadd.f32 1.0, %v1324_v16 }
 0xe96   :  { %1325 = vrcp.f32 %v790_v17 }
 0xea3   :  { %v1326_v18 = vpop.eup %1325 }
 0xea4   :  { %v798_v21 = vmul.f32 %v1326_v18, %v796_v20  ;;  %v805_v35 = vsub.f32 1.0, %v1326_v18  ;;  %v811_v37 = vmul.f32 %v1326_v18, %v1574_v51 }
 0xea6   :  { %800 = vrot.lane.b32.xlu0 %v798_v21, %s1357_s25 }
 0xef8   :  { %v770_v22 = vpop.permute.xlu1 %769 }
 0xef9   :  { %v772_v23 = vadd.f32 %v770_v22, %v751_v0 }
 0xefb   :  { %1327 = vtanh.f32 %v772_v23 }
 0xf08   :  { %v1328_v19 = vpop.eup %1327 }
 0xf09   :  { %776 = vrot.lane.b32.xlu1 %v1328_v19, %s1363_s9 }
 0xf18   :  { %v801_v24 = vpop.permute.xlu0 %800 }
 0xf19   :  { %v803_v27 = vadd.f32 %v801_v24, %v754_v7 }
 0xf1b   :  { %1329 = vtanh.f32 %v803_v27 }
 0xf28   :  { %v1330_v28 = vpop.eup %1329 }
 0xf29   :  { %807 = vrot.lane.b32.xlu0 %v1330_v28, %s1363_s9 }
 0xf7b   :  { %v777_v29 = vpop.permute.xlu1 %776 }
 0xf7c   :  { %v779_v32 = vmul.f32 %v777_v29, %v774_v26 }
 0xf7e   :  { %v1599_v33 = vadd.f32 %v780_v31, %v779_v32 }
 0xf80   :  { %832 = vrot.lane.b32.xlu1 %v1599_v33, %s1363_s9 }
 0xf9b   :  { %v808_v34 = vpop.permute.xlu0 %807 }
 0xf9c   :  { %v810_v36 = vmul.f32 %v808_v34, %v805_v35 }
 0xf9e   :  { %v1604_v38 = vadd.f32 %v811_v37, %v810_v36 }
 0xff2   :  { %v833_v39 = vpop.permute.xlu1 %832 }
 0xff3   :  { %v835_v40 = vsel %vm179_vm1, %v833_v39, %v1604_v38 }
 0xff4   :  { %v836_v41 = vpack.c.bf16 %v835_v40, %v835_v40 }
 0xff6   :  { %1240 = vmatmul.mubr.msk.bf16.vlgmr.msra.gmra.mxu0 %vm34_vm2, %v836_v41  ;;  %v1163_v41 = vld [vmem:[%s1767_s0 + $0x1c] sm:$0xf] }
0x10b6   :  { %v874_v43 = vpop.f32.mrf.mxu0 }
0x10b7   :  { %914 = vrot.lane.b32.xlu1 %v874_v43, %s1362_s28  ;;  %v893_v44 = vadd.f32 %v874_v43, %v1425_v5  ;;  %v924_v46 = vadd.f32 %v874_v43, %v1427_v6  ;;  %v886_v53 = vadd.f32 %v882_v52, %v874_v43  ;;  %v1013_v43 = vunpack.c.l.bf16 %v1163_v41 }
0x10b8   :  { %v1241_v48 = vpop.f32.mrf.mxu0 }
0x10b9   :  { %895 = vrot.lane.b32.xlu0 %v893_v44, %s1361_s27  ;;  %v1156_v54 = vmul.f32 -1.442695, %v886_v53 }
0x10ba   :  { %v877_v49 = vpop.f32.mrf.mxu0 }
0x10bb   :  { %1331 = vpow2.f32 %v1156_v54 }
0x10bc   :  { %v1242_v50 = vpop.f32.mrf.mxu0 }
0x10bd   :  { %926 = vrot.lane.b32.xlu0 %v924_v46, %s1360_s4 }
0x10c8   :  { %v1332_v55 = vpop.eup %1331 }
0x10c9   :  { %v890_v56 = vadd.f32 1.0, %v1332_v55 }
0x10cb   :  { %1333 = vrcp.f32 %v890_v56 }
0x10d8   :  { %v1334_v0 = vpop.eup %1333 }
0x10d9   :  { %v905_v18 = vsub.f32 1.0, %v1334_v0  ;;  %v911_v21 = vmul.f32 %v1334_v0, %v1599_v33 }
0x1129   :  { %v915_v60 = vpop.permute.xlu1 %914 }
0x112a   :  { %v917_v61 = vadd.f32 %v915_v60, %v885_v59 }
0x112b   :  { %v896_v63 = vpop.permute.xlu0 %895 }
0x112c   :  { %v1157_v2 = vmul.f32 -1.442695, %v917_v61  ;;  %v898_v3 = vmul.f32 %v1334_v0, %v896_v63 }
0x112e   :  { %1335 = vpow2.f32 %v1157_v2  ;;  %900 = vrot.lane.b32.xlu1 %v898_v3, %s1357_s25  ;;  %v1169_v3 = vpack.c.bf16 %v1447_v42, %v1447_v42  ;;  %v1177_v42 = vpack.c.bf16 %v1569_v45, %v1569_v45  ;;  %v1172_v45 = vpack.c.bf16 %v1482_v30, %v1482_v30 }
0x112f   :  { %v927_v8 = vpop.permute.xlu0 %926  ;;  %v1180_v30 = vpack.c.bf16 %v1604_v38, %v1604_v38 }
0x113b   :  { %v1336_v1 = vpop.eup %1335 }
0x113c   :  { %v921_v4 = vadd.f32 1.0, %v1336_v1  ;;  %v1171_v1 = vpack.c.bf16 %v1477_v25, %v1477_v25  ;;  %v1179_v25 = vpack.c.bf16 %v1599_v33, %v1599_v33  ;;  %v1174_v33 = vpack.c.bf16 %v1513_v15, %v1513_v15 }
0x113e   :  { %1337 = vrcp.f32 %v921_v4  ;;  %v1173_v4 = vpack.c.bf16 %v1508_v10, %v1508_v10 }
0x114b   :  { %v1338_v7 = vpop.eup %1337 }
0x114c   :  { %v929_v9 = vmul.f32 %v1338_v7, %v927_v8  ;;  %v936_v24 = vsub.f32 1.0, %v1338_v7  ;;  %v942_v28 = vmul.f32 %v1338_v7, %v1604_v38  ;;  %v1175_v7 = vpack.c.bf16 %v1539_v57, %v1539_v57 }
0x114e   :  { %931 = vrot.lane.b32.xlu0 %v929_v9, %s1357_s25 }
0x11a0   :  { %v901_v11 = vpop.permute.xlu1 %900 }
0x11a1   :  { %v903_v12 = vadd.f32 %v901_v11, %v882_v52  ;;  %v1170_v11 = vpack.c.bf16 %v1451_v47, %v1451_v47  ;;  %v1178_v47 = vpack.c.bf16 %v1574_v51, %v1574_v51 }
0x11a3   :  { %1339 = vtanh.f32 %v903_v12  ;;  %v1176_v12 = vpack.c.bf16 %v1544_v62, %v1544_v62 }
0x11b0   :  { %v1340_v13 = vpop.eup %1339 }
0x11b1   :  { %907 = vrot.lane.b32.xlu1 %v1340_v13, %s1363_s9 }
0x11c0   :  { %v932_v14 = vpop.permute.xlu0 %931 }
0x11c1   :  { %v934_v16 = vadd.f32 %v932_v14, %v885_v59 }
0x11c3   :  { %1341 = vtanh.f32 %v934_v16 }
0x11d0   :  { %v1342_v17 = vpop.eup %1341 }
0x11d1   :  { %938 = vrot.lane.b32.xlu0 %v1342_v17, %s1363_s9 }
0x1223   :  { %v908_v20 = vpop.permute.xlu1 %907 }
0x1224   :  { %v910_v22 = vmul.f32 %v908_v20, %v905_v18 }
0x1226   :  { %v1626_v23 = vadd.f32 %v911_v21, %v910_v22 }
0x1228   :  { %963 = vrot.lane.b32.xlu1 %v1626_v23, %s1363_s9  ;;  %v1181_v10 = vpack.c.bf16 %v1626_v23, %v1626_v23 }
0x1243   :  { %v939_v19 = vpop.permute.xlu0 %938 }
0x1244   :  { %v941_v27 = vmul.f32 %v939_v19, %v936_v24 }
0x1246   :  { %v1631_v26 = vadd.f32 %v942_v28, %v941_v27 }
0x1248   :  { %v1182_v15 = vpack.c.bf16 %v1631_v26, %v1631_v26 }
0x129a   :  { %v964_v29 = vpop.permute.xlu1 %963 }
0x129b   :  { %v966_v31 = vsel %vm179_vm1, %v964_v29, %v1631_v26 }
0x129c   :  { %v967_v32 = vpack.c.bf16 %v966_v31, %v966_v31 }
0x129e   :  { %1246 = vmatmul.mubr.msk.bf16.vlgmr.msra.gmra.mxu1 %vm34_vm2, %v967_v32 }
0x135e   :  { %v1005_v34 = vpop.f32.mrf.mxu1 }
0x135f   :  { %1044 = vrot.lane.b32.xlu0 %v1005_v34, %s1362_s28  ;;  %v1023_v35 = vadd.f32 %v1005_v34, %v1425_v5  ;;  %v1054_v37 = vadd.f32 %v1005_v34, %v1427_v6  ;;  %v1016_v44 = vadd.f32 %v1013_v43, %v1005_v34  ;;  %v1015_v5 = vunpack.c.l.bf16 %v1618_v58 }
0x1360   :  { %v1247_v36 = vpop.f32.mrf.mxu1 }
0x1361   :  { %1025 = vrot.lane.b32.xlu1 %v1023_v35, %s1361_s27  ;;  %v1164_v48 = vmul.f32 -1.442695, %v1016_v44 }
0x1362   :  { %v1008_v39 = vpop.f32.mrf.mxu1 }
0x1363   :  { %1056 = vrot.lane.b32.xlu0 %v1054_v37, %s1360_s4  ;;  %1343 = vpow2.f32 %v1164_v48 }
0x1364   :  { %v1248_v40 = vpop.f32.mrf.mxu1 }
0x1370   :  { %v1344_v49 = vpop.eup %1343 }
0x1371   :  { %v1020_v46 = vadd.f32 1.0, %v1344_v49 }
0x1373   :  { %1345 = vrcp.f32 %v1020_v46 }
0x1380   :  { %v1346_v6 = vpop.eup %1345 }
0x1381   :  { %v1035_v13 = vsub.f32 1.0, %v1346_v6  ;;  %v1041_v62 = vmul.f32 %v1346_v6, %v1626_v23 }
0x13d1   :  { %v1045_v50 = vpop.permute.xlu0 %1044 }
0x13d2   :  { %v1047_v52 = vadd.f32 %v1045_v50, %v1015_v5 }
0x13d3   :  { %v1026_v53 = vpop.permute.xlu1 %1025 }
0x13d4   :  { %v1165_v54 = vmul.f32 -1.442695, %v1047_v52  ;;  %v1028_v55 = vmul.f32 %v1346_v6, %v1026_v53 }
0x13d5   :  { %v1057_v61 = vpop.permute.xlu0 %1056 }
0x13d6   :  { %1347 = vpow2.f32 %v1165_v54  ;;  %1030 = vrot.lane.b32.xlu1 %v1028_v55, %s1357_s25 }
0x13e3   :  { %v1348_v56 = vpop.eup %1347 }
0x13e4   :  { %v1051_v59 = vadd.f32 1.0, %v1348_v56 }
0x13e6   :  { %1349 = vrcp.f32 %v1051_v59 }
0x13f3   :  { %v1646_v60 = vpop.eup %1349 }
0x13f4   :  { %v1059_v0 = vmul.f32 %v1646_v60, %v1057_v61  ;;  %v1066_v24 = vsub.f32 1.0, %v1646_v60  ;;  %v1072_v28 = vmul.f32 %v1646_v60, %v1631_v26 }
0x13f6   :  { %1061 = vrot.lane.b32.xlu0 %v1059_v0, %s1357_s25 }
0x1448   :  { %v1031_v58 = vpop.permute.xlu1 %1030 }
0x1449   :  { %v1033_v63 = vadd.f32 %v1031_v58, %v1013_v43 }
0x144b   :  { %1351 = vtanh.f32 %v1033_v63 }
0x1458   :  { %v1352_v2 = vpop.eup %1351 }
0x1459   :  { %1037 = vrot.lane.b32.xlu1 %v1352_v2, %s1363_s9 }
0x145d   :  { %161 = vrot.lane.b32.xlu1 %v1169_v3, %s1363_s9 }
0x1461   :  { %293 = vrot.lane.b32.xlu1 %v1171_v1, %s1363_s9 }
0x1465   :  { %424 = vrot.lane.b32.xlu1 %v1173_v4, %s1363_s9 }
0x1468   :  { %v1062_v8 = vpop.permute.xlu0 %1061 }
0x1469   :  { %v1064_v9 = vadd.f32 %v1062_v8, %v1015_v5  ;;  %555 = vrot.lane.b32.xlu1 %v1175_v7, %s1363_s9 }
0x146b   :  { %1353 = vtanh.f32 %v1064_v9 }
0x146d   :  { %686 = vrot.lane.b32.xlu1 %v1177_v42, %s1363_s9 }
0x1471   :  { %817 = vrot.lane.b32.xlu1 %v1179_v25, %s1363_s9 }
0x1475   :  { %948 = vrot.lane.b32.xlu1 %v1181_v10, %s1363_s9 }
0x1478   :  { %v1354_v57 = vpop.eup %1353 }
0x1479   :  { %1068 = vrot.lane.b32.xlu0 %v1354_v57, %s1363_s9 }
0x147d   :  { %170 = vrot.lane.b32.xlu0 %v1170_v11, %s1363_s9 }
0x1481   :  { %302 = vrot.lane.b32.xlu0 %v1172_v45, %s1363_s9 }
0x1485   :  { %433 = vrot.lane.b32.xlu0 %v1174_v33, %s1363_s9 }
0x1489   :  { %564 = vrot.lane.b32.xlu0 %v1176_v12, %s1363_s9 }
0x148d   :  { %695 = vrot.lane.b32.xlu0 %v1178_v47, %s1363_s9 }
0x1491   :  { %826 = vrot.lane.b32.xlu0 %v1180_v30, %s1363_s9 }
0x1495   :  { %957 = vrot.lane.b32.xlu0 %v1182_v15, %s1363_s9 }
0x14cb   :  { %v1038_v14 = vpop.permute.xlu1 %1037 }
0x14cc   :  { %v1040_v16 = vmul.f32 %v1038_v14, %v1035_v13 }
0x14ce   :  { %v1042_v17 = vadd.f32 %v1041_v62, %v1040_v16 }
0x14cf   :  { %v162_v51 = vpop.permute.xlu1 %161 }
0x14d0   :  { %v1183_v18 = vpack.c.bf16 %v1042_v17, %v1042_v17  ;;  %165 = vst.msk [vmem:[%s1769_s5] sm:$0xf] %vm164_vm3, %v162_v51 }
0x14d2   :  { %1078 = vrot.lane.b32.xlu1 %v1183_v18, %s1363_s9 }
0x14d3   :  { %v294_v38 = vpop.permute.xlu1 %293 }
0x14d4   :  { %1114 = vst.msk [vmem:[%s1769_s5 + $0x4] sm:$0xf] %vm164_vm3, %v294_v38 }
0x14d7   :  { %v425_v20 = vpop.permute.xlu1 %424 }
0x14d8   :  { %1123 = vst.msk [vmem:[%s1769_s5 + $0x8] sm:$0xf] %vm164_vm3, %v425_v20 }
0x14db   :  { %v556_v21 = vpop.permute.xlu1 %555 }
0x14dc   :  { %1132 = vst.msk [vmem:[%s1769_s5 + $0xc] sm:$0xf] %vm164_vm3, %v556_v21 }
0x14df   :  { %v687_v22 = vpop.permute.xlu1 %686 }
0x14e0   :  { %1141 = vst.msk [vmem:[%s1769_s5 + $0x10] sm:$0xf] %vm164_vm3, %v687_v22 }
0x14e3   :  { %v818_v23 = vpop.permute.xlu1 %817 }
0x14e4   :  { %1150 = vst.msk [vmem:[%s1769_s5 + $0x14] sm:$0xf] %vm164_vm3, %v818_v23 }
0x14e7   :  { %v949_v19 = vpop.permute.xlu1 %948 }
0x14e8   :  { %1159 = vst.msk [vmem:[%s1769_s5 + $0x18] sm:$0xf] %vm164_vm3, %v949_v19 }
0x14eb   :  { %v1069_v27 = vpop.permute.xlu0 %1068 }
0x14ec   :  { %v1071_v29 = vmul.f32 %v1069_v27, %v1066_v24 }
0x14ee   :  { %v1073_v31 = vadd.f32 %v1072_v28, %v1071_v29 }
0x14ef   :  { %v171_v32 = vpop.permute.xlu0 %170 }
0x14f0   :  { %v1184_v34 = vpack.c.bf16 %v1073_v31, %v1073_v31  ;;  %1107 = vst.msk [vmem:[%s1770_s6 + $0x1c] sm:$0xf] %vm164_vm3, %v171_v32 }
0x14f2   :  { %1087 = vrot.lane.b32.xlu0 %v1184_v34, %s1363_s9 }
0x14f3   :  { %v303_v35 = vpop.permute.xlu0 %302 }
0x14f4   :  { %1116 = vst.msk [vmem:[%s1770_s6 + $0x18] sm:$0xf] %vm164_vm3, %v303_v35 }
0x14f7   :  { %v434_v36 = vpop.permute.xlu0 %433 }
0x14f8   :  { %1125 = vst.msk [vmem:[%s1770_s6 + $0x14] sm:$0xf] %vm164_vm3, %v434_v36 }
0x14fb   :  { %v565_v26 = vpop.permute.xlu0 %564 }
0x14fc   :  { %1134 = vst.msk [vmem:[%s1770_s6 + $0x10] sm:$0xf] %vm164_vm3, %v565_v26 }
0x14ff   :  { %v696_v37 = vpop.permute.xlu0 %695 }
0x1500   :  { %1143 = vst.msk [vmem:[%s1770_s6 + $0xc] sm:$0xf] %vm164_vm3, %v696_v37 }
0x1503   :  { %v827_v39 = vpop.permute.xlu0 %826 }
0x1504   :  { %1152 = vst.msk [vmem:[%s1770_s6 + $0x8] sm:$0xf] %vm164_vm3, %v827_v39 }
0x1507   :  { %v958_v40 = vpop.permute.xlu0 %957 }
0x1508   :  { %1161 = vst.msk [vmem:[%s1770_s6 + $0x4] sm:$0xf] %vm164_vm3, %v958_v40 }
0x1544   :  { %v1079_v41 = vpop.permute.xlu1 %1078 }
0x1545   :  { %1167 = vst.msk [vmem:[%s1769_s5 + $0x1c] sm:$0xf] %vm164_vm3, %v1079_v41 }
0x1564   :  { %v1088_v43 = vpop.permute.xlu0 %1087 }
0x1565   :  { %1090 = vst.msk [vmem:[%s1770_s6] sm:$0xf] %vm164_vm3, %v1088_v43 }

</bundles_post_ra>
